<compile_context>
chip_gen: v6e
topology: v6e:2x2x1
jax: 0.10.0
libtpu: 0.0.40
codegen_flags: <defaults>
</compile_context>

<pallas_src>
import functools
import math

import jax
import jax.numpy as jnp
from jax import lax
from jax.experimental import pallas as pl
from jax.experimental.pallas import tpu as pltpu


# ----------------------------------------------------------------------------
# Tiling / in-kernel helpers
# ----------------------------------------------------------------------------

def _tile(dim, pref, align):
    """Largest tile <= pref that divides `dim` and is `align`-aligned, else full."""
    if dim <= pref:
        return dim
    t = (pref // align) * align
    while t >= align:
        if dim % t == 0:
            return t
        t -= align
    return dim


@functools.lru_cache(maxsize=None)
def _vmem_limit_bytes():
    """Generation-aware scoped-VMEM ceiling: ~75% of physical VMEM
    (~96 MiB on v5e/v6e, ~48 MiB on v7x); 64 MiB fallback if the query fails."""
    try:
        cap = int(pltpu.get_tpu_info().vmem_capacity_bytes)
        return min(cap * 3 // 4, 100 * 1024 * 1024)
    except Exception:
        return 64 * 1024 * 1024


def _cparams(*semantics):
    return pltpu.CompilerParams(dimension_semantics=tuple(semantics),
                                vmem_limit_bytes=_vmem_limit_bytes())


def _layernorm(x, g, b):
    """f32 LayerNorm over the last axis (eps=1e-5, biased variance)."""
    mean = jnp.mean(x, axis=-1, keepdims=True)
    xc = x - mean
    var = jnp.mean(xc * xc, axis=-1, keepdims=True)
    return xc * lax.rsqrt(var + 1e-5) * g + b


def _time_shift(xn):
    """xx[t] = xn[t-1], xx[0] = 0   (nn.ZeroPad2d((0,0,1,-1))).

    Implemented as an XLU sublane roll + row-0 mask: the roll uses the
    otherwise-idle XLU slot, so it is essentially free compared with the
    old f32 (T,T) shift-matrix MXU matmul.
    """
    rolled = pltpu.roll(xn, shift=1, axis=0)
    row = lax.broadcasted_iota(jnp.int32, xn.shape, 0)
    return jnp.where(row == 0, jnp.zeros_like(rolled), rolled)


# ----------------------------------------------------------------------------
# Pallas kernels
# ----------------------------------------------------------------------------

def layernorm_kernel(x_ref, g_ref, b_ref, o_ref):
    o_ref[...] = _layernorm(x_ref[...].astype(jnp.float32),
                            g_ref[...], b_ref[...]).astype(o_ref.dtype)


def att_proj_kernel(x_ref, g_ref, b_ref, mk_ref, mv_ref, mr_ref,
                    wk_ref, wv_ref, wr_ref, k_ref, v_ref, r_ref, xn_s):
    """Fused LN1 + time-shift + three mixed projections (k, v, sigmoid(r)).

    LN1 is computed once per batch row (j == 0) into a VMEM scratch and reused
    across all j weight tiles; the time-shift (XLU roll) and the mix blends are
    cheap VPU/XLU filler recomputed under the MXU-bound projections.
    """
    j = pl.program_id(1)

    @pl.when(j == 0)
    def _():
        xn_s[...] = _layernorm(x_ref[...].astype(jnp.float32),
                               g_ref[...], b_ref[...])

    xn = xn_s[...]
    xx = _time_shift(xn)
    mk = mk_ref[...]
    mv = mv_ref[...]
    mr = mr_ref[...]
    xk = (xn * mk + xx * (1.0 - mk)).astype(jnp.bfloat16)
    xv = (xn * mv + xx * (1.0 - mv)).astype(jnp.bfloat16)
    xr = (xn * mr + xx * (1.0 - mr)).astype(jnp.bfloat16)
    k_ref[...] = jnp.dot(xk, wk_ref[...],
                         preferred_element_type=jnp.float32).astype(k_ref.dtype)
    v_ref[...] = jnp.dot(xv, wv_ref[...],
                         preferred_element_type=jnp.float32).astype(v_ref.dtype)
    r_ref[...] = jax.nn.sigmoid(
        jnp.dot(xr, wr_ref[...],
                preferred_element_type=jnp.float32)).astype(r_ref.dtype)


def make_wkv_kernel(t_chunk):
    """WKV recurrence on a (T, G, 128) channel-group block, fused with r*y.

    Matches wkv_cuda forward: w = -exp(time_decay), u = time_first; u/k/v are
    bf16-rounded, internal accumulation f32, y is bf16.  Per-timestep tensors
    are (G, lanes) so every VPU/EUP op runs at full vreg occupancy, and the
    exp(-|d|) + select trick halves the EUP exp count (bit-identical, since
    p = max(a, b) makes one of the two exps exactly 1).
    """
    def kernel(w_ref, u_ref, k_ref, v_ref, r_ref, o_ref, ybuf):
        T = k_ref.shape[0]
        u = u_ref[...].astype(jnp.bfloat16).astype(jnp.float32)   # bf16-round u
        neg_w = -jnp.exp(w_ref[...].astype(jnp.float32))          # w stays f32
        G, L = u.shape
        n_chunks = T // t_chunk

        def chunk_body(c, carry):
            aa, bb, pp = carry                                    # (G, L) f32 each
            start = pl.multiple_of(c * t_chunk, t_chunk)
            kc = k_ref[pl.ds(start, t_chunk), :, :].astype(jnp.float32)
            vc = v_ref[pl.ds(start, t_chunk), :, :].astype(jnp.float32)
            rc = r_ref[pl.ds(start, t_chunk), :, :].astype(jnp.float32)
            for i in range(t_chunk):          # static unroll
                kt = kc[i]
                vt = vc[i]
                # y_t = (e1*aa + e2*vt) / (e1*bb + e2), p = max(pp, u + kt)
                ww = u + kt
                d = pp - ww
                e = jnp.exp(-jnp.abs(d))
                ge = d >= 0.0
                e1 = jnp.where(ge, 1.0, e)
                e2 = jnp.where(ge, e, 1.0)
                ybuf[i, :, :] = (e1 * aa + e2 * vt) * pl.reciprocal(
                    e1 * bb + e2, approx=True)
                # state update with p2 = max(pp - exp(w_decay), kt)
                ww2 = pp + neg_w
                d2 = ww2 - kt
                eb = jnp.exp(-jnp.abs(d2))
                ge2 = d2 >= 0.0
                e1b = jnp.where(ge2, 1.0, eb)
                e2b = jnp.where(ge2, eb, 1.0)
                aa = e1b * aa + e2b * vt
                bb = e1b * bb + e2b
                pp = jnp.maximum(ww2, kt)
            # reference y is bf16; fuse the r * y multiply here (saves a pass)
            y = ybuf[...].astype(jnp.bfloat16).astype(jnp.float32)
            o_ref[pl.ds(start, t_chunk), :, :] = (rc * y).astype(o_ref.dtype)
            return aa, bb, pp

        zeros = jnp.zeros((G, L), jnp.float32)
        init = (zeros, zeros, jnp.full((G, L), -1e38, jnp.float32))
        lax.fori_loop(0, n_chunks, chunk_body, init)
    return kernel


def make_matmul_kernel(n_extra, epilogue):
    """Tiled matmul with f32 VMEM accumulator and an epilogue over extra tiles."""
    def kernel(*refs):
        x_ref, w_ref = refs[0], refs[1]
        extra_refs = refs[2:2 + n_extra]
        o_ref = refs[2 + n_extra]
        acc_ref = refs[3 + n_extra]
        kk = pl.program_id(2)

        @pl.when(kk == 0)
        def _():
            acc_ref[...] = jnp.zeros_like(acc_ref)

        acc_ref[...] += jnp.dot(x_ref[...], w_ref[...],
                                preferred_element_type=jnp.float32)

        @pl.when(kk == pl.num_programs(2) - 1)
        def _():
            extras = [e[...].astype(jnp.float32) for e in extra_refs]
            o_ref[...] = epilogue(acc_ref[...], *extras).astype(o_ref.dtype)
    return kernel


def ffn_pre_kernel(x_ref, g_ref, b_ref, mk_ref, mr_ref, xk_ref, xr_ref):
    """Fused LN2 + time-shift + the two mix blends (xk, xr), bf16 outputs."""
    xn = _layernorm(x_ref[...].astype(jnp.float32), g_ref[...], b_ref[...])
    xx = _time_shift(xn)
    mk = mk_ref[...]
    mr = mr_ref[...]
    xk_ref[...] = (xn * mk + xx * (1.0 - mk)).astype(xk_ref.dtype)
    xr_ref[...] = (xn * mr + xx * (1.0 - mr)).astype(xr_ref.dtype)


def ffn_main_kernel(x_ref, xk_ref, r_ref, wk_ref, wv_ref, o_ref, acc_ref):
    """relu(xk @ Wk)^2 @ Wv chain, r* and residual add.

    The hidden (4C) dim is the reduction grid axis, so the (tm, 4C)
    intermediate never leaves VMEM; the (C,C) receptance weight lives in a
    separate tiled matmul (keeps this kernel inside v7x's 64 MiB VMEM).
    """
    h = pl.program_id(1)

    @pl.when(h == 0)
    def _():
        acc_ref[...] = jnp.zeros_like(acc_ref)

    kh = jnp.dot(xk_ref[...], wk_ref[...], preferred_element_type=jnp.float32)
    kh = jnp.square(jnp.maximum(kh, 0.0)).astype(jnp.bfloat16)
    acc_ref[...] += jnp.dot(kh, wv_ref[...], preferred_element_type=jnp.float32)

    @pl.when(h == pl.num_programs(1) - 1)
    def _():
        o_ref[...] = (x_ref[...].astype(jnp.float32)
                      + r_ref[...].astype(jnp.float32)
                      * acc_ref[...]).astype(o_ref.dtype)


def head_kernel(x_ref, g_ref, b_ref, w_ref, o_ref):
    """Fused final LayerNorm + vocab projection tile."""
    xn = _layernorm(x_ref[...].astype(jnp.float32), g_ref[...], b_ref[...])
    o_ref[...] = jnp.dot(xn.astype(jnp.bfloat16), w_ref[...],
                         preferred_element_type=jnp.float32).astype(o_ref.dtype)


# ----------------------------------------------------------------------------
# Pallas wrappers
# ----------------------------------------------------------------------------

def pallas_layernorm(x2, g, b, tm=512):
    N, C = x2.shape
    tm_ = _tile(N, tm, 8)
    return pl.pallas_call(
        layernorm_kernel,
        out_shape=jax.ShapeDtypeStruct((N, C), jnp.bfloat16),
        grid=(N // tm_,),
        in_specs=[pl.BlockSpec((tm_, C), lambda i: (i, 0)),
                  pl.BlockSpec((1, C), lambda i: (0, 0)),
                  pl.BlockSpec((1, C), lambda i: (0, 0))],
        out_specs=pl.BlockSpec((tm_, C), lambda i: (i, 0)),
        compiler_params=_cparams("parallel"),
    )(x2, g, b)


def pallas_att_proj(x, ln_g, ln_b, mix_k, mix_v, mix_r, wk, wv, wr, tj=512):
    B, T, C = x.shape
    tj_ = _tile(C, tj, 128)
    n_j = C // tj_
    spec_x = pl.BlockSpec((None, T, C), lambda b, j: (b, 0, 0))
    spec_p = pl.BlockSpec((1, C), lambda b, j: (0, 0))
    spec_w = pl.BlockSpec((C, tj_), lambda b, j: (0, j))
    spec_o = pl.BlockSpec((None, T, tj_), lambda b, j: (b, 0, j))
    out_sds = jax.ShapeDtypeStruct((B, T, C), jnp.bfloat16)
    return pl.pallas_call(
        att_proj_kernel,
        out_shape=(out_sds, out_sds, out_sds),
        grid=(B, n_j),
        in_specs=[spec_x, spec_p, spec_p, spec_p, spec_p, spec_p,
                  spec_w, spec_w, spec_w],
        out_specs=(spec_o, spec_o, spec_o),
        scratch_shapes=[pltpu.VMEM((T, C), jnp.float32)],   # cached LN1 result
        compiler_params=_cparams("parallel", "arbitrary"),
    )(x, ln_g, ln_b, mix_k, mix_v, mix_r, wk, wv, wr)


def pallas_wkv(time_decay, time_first, k, v, r, g_pref=16):
    """k, v, r: (B, T, C) bfloat16.  Returns rwkv = r * wkv(k, v), bfloat16."""
    B, T, C = k.shape
    lane = 128 if C % 128 == 0 else C          # degrade gracefully when C < 128
    groups = C // lane
    G = _tile(groups, g_pref, 8)               # channel groups per grid step
    n_cg = groups // G
    # TODO(synk): pad T to a multiple of 8 upstream so the narrow-chunk
    # fallback (which loses ILP) can never trigger.
    t_chunk = 8 if T % 8 == 0 else (4 if T % 4 == 0 else (2 if T % 2 == 0 else 1))

    k4 = k.reshape(B, T, groups, lane)
    v4 = v.reshape(B, T, groups, lane)
    r4 = r.reshape(B, T, groups, lane)
    w2 = time_decay.reshape(groups, lane).astype(jnp.float32)
    u2 = time_first.reshape(groups, lane).astype(jnp.float32)

    spec_p = pl.BlockSpec((G, lane), lambda b, c: (c, 0))
    spec_s = pl.BlockSpec((None, T, G, lane), lambda b, c: (b, 0, c, 0))
    out = pl.pallas_call(
        make_wkv_kernel(t_chunk),
        out_shape=jax.ShapeDtypeStruct((B, T, groups, lane), jnp.bfloat16),
        grid=(B, n_cg),
        in_specs=[spec_p, spec_p, spec_s, spec_s, spec_s],
        out_specs=spec_s,
        scratch_shapes=[pltpu.VMEM((t_chunk, G, lane), jnp.float32)],
        compiler_params=_cparams("parallel", "parallel"),
    )(w2, u2, k4, v4, r4)
    return out.reshape(B, T, C)


def pallas_matmul(x, w, extras=(), epilogue=None, out_dtype=jnp.bfloat16,
                  tm=512, tn=512, tk=4096):
    """Tiled x @ w with optional fused epilogue(acc, *extra_tiles)."""
    if epilogue is None:
        epilogue = lambda acc: acc
    N, K = x.shape
    H = w.shape[1]
    tm_ = _tile(N, tm, 8)
    tn_ = _tile(H, tn, 128)
    tk_ = _tile(K, tk, 128)
    in_specs = [pl.BlockSpec((tm_, tk_), lambda i, j, kk: (i, kk)),
                pl.BlockSpec((tk_, tn_), lambda i, j, kk: (kk, j))]
    in_specs += [pl.BlockSpec((tm_, tn_), lambda i, j, kk: (i, j)) for _ in extras]
    return pl.pallas_call(
        make_matmul_kernel(len(extras), epilogue),
        out_shape=jax.ShapeDtypeStruct((N, H), out_dtype),
        grid=(N // tm_, H // tn_, K // tk_),
        in_specs=in_specs,
        out_specs=pl.BlockSpec((tm_, tn_), lambda i, j, kk: (i, j)),
        scratch_shapes=[pltpu.VMEM((tm_, tn_), jnp.float32)],
        compiler_params=_cparams("parallel", "parallel", "arbitrary"),
    )(x, w, *extras)


def pallas_ffn_pre(x, ln_g, ln_b, mix_k, mix_r):
    B, T, C = x.shape
    spec_x = pl.BlockSpec((None, T, C), lambda b: (b, 0, 0))
    spec_p = pl.BlockSpec((1, C), lambda b: (0, 0))
    out_sds = jax.ShapeDtypeStruct((B, T, C), jnp.bfloat16)
    # TODO(synk): tile T with a one-row halo for very long sequences so the
    # (T, C) blocks stay under the v7x VMEM budget.
    return pl.pallas_call(
        ffn_pre_kernel,
        out_shape=(out_sds, out_sds),
        grid=(B,),
        in_specs=[spec_x, spec_p, spec_p, spec_p, spec_p],
        out_specs=(spec_x, spec_x),
        compiler_params=_cparams("parallel"),
    )(x, ln_g, ln_b, mix_k, mix_r)


def pallas_ffn_main(x2, xk2, r2, wk, wv, tm=256, th=512):
    N, C = x2.shape
    H = wk.shape[1]                            # 4*C
    tm_ = _tile(N, tm, 8)
    th_ = _tile(H, th, 128)
    spec_nc = pl.BlockSpec((tm_, C), lambda i, h: (i, 0))
    return pl.pallas_call(
        ffn_main_kernel,
        out_shape=jax.ShapeDtypeStruct((N, C), jnp.bfloat16),
        grid=(N // tm_, H // th_),
        in_specs=[spec_nc, spec_nc, spec_nc,
                  pl.BlockSpec((C, th_), lambda i, h: (0, h)),
                  pl.BlockSpec((th_, C), lambda i, h: (h, 0))],
        out_specs=spec_nc,
        scratch_shapes=[pltpu.VMEM((tm_, C), jnp.float32)],   # value accumulator
        compiler_params=_cparams("parallel", "arbitrary"),
    )(x2, xk2, r2, wk, wv)


def pallas_head(x2, ln_g, ln_b, w, tm=1024, tv=1024):
    N, C = x2.shape
    V = w.shape[1]
    tm_ = _tile(N, tm, 8)
    tv_ = _tile(V, tv, 128)
    return pl.pallas_call(
        head_kernel,
        out_shape=jax.ShapeDtypeStruct((N, V), jnp.float32),
        grid=(N // tm_, V // tv_),
        in_specs=[pl.BlockSpec((tm_, C), lambda i, j: (i, 0)),
                  pl.BlockSpec((1, C), lambda i, j: (0, 0)),
                  pl.BlockSpec((1, C), lambda i, j: (0, 0)),
                  pl.BlockSpec((C, tv_), lambda i, j: (0, j))],
        out_specs=pl.BlockSpec((tm_, tv_), lambda i, j: (i, j)),
        compiler_params=_cparams("parallel", "parallel"),
    )(x2, ln_g, ln_b, w)


# ----------------------------------------------------------------------------
# Model: parameter construction + forward
# ----------------------------------------------------------------------------

def init_params(key, vocab_size, n_embd, n_layer):
    C = n_embd
    params = {}
    keys = jax.random.split(key, 3 + 8 * n_layer)
    ki = iter(keys)

    def lin(k, d_in, d_out):
        # deterministic synthetic init, stored pre-transposed as (in, out), bf16
        w = jax.random.normal(k, (d_out, d_in), jnp.float32) * 0.1
        return w.T.astype(jnp.bfloat16)

    params["emb"] = jax.random.normal(next(ki), (vocab_size, C), jnp.float32) * 0.1
    params["head"] = lin(next(ki), C, vocab_size)
    params["ln0"] = (jnp.ones((1, C), jnp.float32), jnp.zeros((1, C), jnp.float32))
    params["ln_out"] = (jnp.ones((1, C), jnp.float32), jnp.zeros((1, C), jnp.float32))

    x_vec = jnp.arange(C, dtype=jnp.float32) / C            # x[0,0,i] = i/C

    blocks = []
    for layer_id in range(n_layer):
        r0 = layer_id / (n_layer - 1) if n_layer > 1 else 0.0
        r1 = 1.0 - layer_id / n_layer

        decay_speed = jnp.array(
            [-5.0 + 8.0 * (h / (C - 1)) ** (0.7 + 1.3 * r0) for h in range(C)],
            dtype=jnp.float32)
        zigzag = jnp.array([((i + 1) % 3 - 1) * 0.5 for i in range(C)],
                           dtype=jnp.float32)
        time_first = jnp.full((C,), math.log(0.3), jnp.float32) + zigzag

        blk = {
            "ln1": (jnp.ones((1, C), jnp.float32), jnp.zeros((1, C), jnp.float32)),
            "ln2": (jnp.ones((1, C), jnp.float32), jnp.zeros((1, C), jnp.float32)),
            "att": {
                "time_decay": decay_speed,
                "time_first": time_first,
                "time_mix_k": jnp.power(x_vec, r1).reshape(1, C),
                "time_mix_v": (jnp.power(x_vec, r1) + 0.3 * r0).reshape(1, C),
                "time_mix_r": jnp.power(x_vec, 0.5 * r1).reshape(1, C),
                "key": lin(next(ki), C, C),
                "value": lin(next(ki), C, C),
                "receptance": lin(next(ki), C, C),
                "output": lin(next(ki), C, C),
            },
            "ffn": {
                "time_mix_k": jnp.power(x_vec, r1).reshape(1, C),
                "time_mix_r": jnp.power(x_vec, r1).reshape(1, C),
                "key": lin(next(ki), C, 4 * C),
                "receptance": lin(next(ki), C, C),
                "value": lin(next(ki), 4 * C, C),
            },
        }
        blocks.append(blk)
    params["blocks"] = blocks
    return params


def rwkv_forward(params, idx):
    B, T = idx.shape
    C = params["emb"].shape[1]
    N = B * T
    # TODO(synk): embedding gather kept in plain JAX (scalar-indexed gather).
    x = jnp.take(params["emb"], idx, axis=0)                           # (B, T, C)
    # Residual stream kept in bf16 end-to-end; all LN / accumulation is f32.
    x = pallas_layernorm(x.reshape(N, C), *params["ln0"]).reshape(B, T, C)

    for blk in params["blocks"]:
        att = blk["att"]
        k, v, r = pallas_att_proj(
            x, blk["ln1"][0], blk["ln1"][1],
            att["time_mix_k"], att["time_mix_v"], att["time_mix_r"],
            att["key"], att["value"], att["receptance"])
        rwkv = pallas_wkv(att["time_decay"], att["time_first"], k, v, r)
        # output projection fused with the residual add: x = x + rwkv @ W_out
        x = pallas_matmul(rwkv.reshape(N, C), att["output"],
                          extras=(x.reshape(N, C),),
                          epilogue=lambda acc, res: acc + res,
                          out_dtype=jnp.bfloat16).reshape(B, T, C)

        ffn = blk["ffn"]
        # channel-mix: xk/xr blend -> r = sigmoid(xr@Wr) -> x += r*Wv(relu(Wk xk)^2)
        xk, xr = pallas_ffn_pre(x, blk["ln2"][0], blk["ln2"][1],
                                ffn["time_mix_k"], ffn["time_mix_r"])
        rr = pallas_matmul(xr.reshape(N, C), ffn["receptance"],
                           epilogue=jax.nn.sigmoid, out_dtype=jnp.bfloat16)
        x = pallas_ffn_main(x.reshape(N, C), xk.reshape(N, C), rr,
                            ffn["key"], ffn["value"]).reshape(B, T, C)

    logits = pallas_head(x.reshape(N, C),
                         params["ln_out"][0], params["ln_out"][1],
                         params["head"])
    return logits.reshape(B, T, -1)


# ----------------------------------------------------------------------------

if __name__ == "__main__":
    VOCAB = 64
    N_EMBD = 32
    N_LAYER = 2
    B, T = 2, 8

    key = jax.random.PRNGKey(0)
    k_params, k_idx = jax.random.split(key)
    params = init_params(k_params, VOCAB, N_EMBD, N_LAYER)
    idx = jax.random.randint(k_idx, (B, T), 0, VOCAB, dtype=jnp.int32)

    fwd = jax.jit(functools.partial(rwkv_forward, params))
    logits = fwd(idx)
    jax.block_until_ready(logits)
    assert logits.shape == (B, T, VOCAB)
    assert bool(jnp.all(jnp.isfinite(logits)))
    print("KERNEL_OK")
</pallas_src>

<mosaic_0001>
module attributes {stable_mosaic.version = 11 : i64} {
  func.func @kernel(%arg0: i32, %arg1: i32, %arg2: i32, %arg3: memref<16x32xbf16, #tpu.memory_space<vmem>>, %arg4: memref<32x32xbf16, #tpu.memory_space<vmem>>, %arg5: memref<16x32xbf16, #tpu.memory_space<vmem>>, %arg6: memref<16x32xbf16, #tpu.memory_space<vmem>>, %arg7: memref<16x32xf32, #tpu.memory_space<vmem>>) attributes {dimension_semantics = [#tpu.dimension_semantics<parallel>, #tpu.dimension_semantics<parallel>, #tpu.dimension_semantics<arbitrary>], iteration_bounds = array<i64: 1, 1, 1>, scalar_prefetch = 0 : i64, scratch_operands = 1 : i64, tpu.core_type = #tpu.core_type<tc>, window_params = [{transform_indices = @transform_0, window_bounds = array<i64: 16, 32>}, {transform_indices = @transform_1, window_bounds = array<i64: 32, 32>}, {transform_indices = @transform_2, window_bounds = array<i64: 16, 32>}, {transform_indices = @transform_3, window_bounds = array<i64: 16, 32>}]} {
    %c0_i32 = arith.constant 0 : i32
    %0 = arith.cmpi eq, %arg2, %c0_i32 : i32
    %1 = arith.extui %0 : i1 to i32
    %c0_i32_0 = arith.constant 0 : i32
    %2 = arith.cmpi ne, %1, %c0_i32_0 : i32
    scf.if %2 {
      %cst_10 = arith.constant 0.000000e+00 : f32
      %12 = vector.broadcast %cst_10 : f32 to vector<16x32xf32>
      %c0_11 = arith.constant 0 : index
      %c0_12 = arith.constant 0 : index
      %13 = vector.load %arg7[%c0_11, %c0_12] : memref<16x32xf32, #tpu.memory_space<vmem>>, vector<16x32xf32>
      tpu.vector_store %arg7[%c0_11, %c0_12], %12 {strides = array<i32>} : memref<16x32xf32, #tpu.memory_space<vmem>>, vector<16x32xf32>,
    } else {
    }
    %c0 = arith.constant 0 : index
    %c0_1 = arith.constant 0 : index
    %3 = vector.load %arg7[%c0, %c0_1] : memref<16x32xf32, #tpu.memory_space<vmem>>, vector<16x32xf32>
    %c0_2 = arith.constant 0 : index
    %c0_3 = arith.constant 0 : index
    %4 = vector.load %arg3[%c0_2, %c0_3] : memref<16x32xbf16, #tpu.memory_space<vmem>>, vector<16x32xbf16>
    %c0_4 = arith.constant 0 : index
    %c0_5 = arith.constant 0 : index
    %5 = vector.load %arg4[%c0_4, %c0_5] : memref<32x32xbf16, #tpu.memory_space<vmem>>, vector<32x32xbf16>
    %cst = arith.constant dense<0.000000e+00> : vector<16x32xf32>
    %6 = tpu.matmul %4, %5, %cst {dimension_numbers = #tpu.dot_dimension_numbers<[1], [0], [0], [1], [0, 0, 1, 1], [], []>} : vector<16x32xbf16>, vector<32x32xbf16>, vector<16x32xf32> -> vector<16x32xf32>
    %7 = arith.addf %3, %6 : vector<16x32xf32>
    %c0_6 = arith.constant 0 : index
    %c0_7 = arith.constant 0 : index
    %8 = vector.load %arg7[%c0_6, %c0_7] : memref<16x32xf32, #tpu.memory_space<vmem>>, vector<16x32xf32>
    tpu.vector_store %arg7[%c0_6, %c0_7], %7 {strides = array<i32>} : memref<16x32xf32, #tpu.memory_space<vmem>>, vector<16x32xf32>,
    %c0_i32_8 = arith.constant 0 : i32
    %9 = arith.cmpi eq, %arg2, %c0_i32_8 : i32
    %10 = arith.extui %9 : i1 to i32
    %c0_i32_9 = arith.constant 0 : i32
    %11 = arith.cmpi ne, %10, %c0_i32_9 : i32
    scf.if %11 {
      %c0_10 = arith.constant 0 : index
      %c0_11 = arith.constant 0 : index
      %12 = vector.load %arg5[%c0_10, %c0_11] : memref<16x32xbf16, #tpu.memory_space<vmem>>, vector<16x32xbf16>
      %13 = arith.extf %12 : vector<16x32xbf16> to vector<16x32xf32>
      %c0_12 = arith.constant 0 : index
      %c0_13 = arith.constant 0 : index
      %14 = vector.load %arg7[%c0_12, %c0_13] : memref<16x32xf32, #tpu.memory_space<vmem>>, vector<16x32xf32>
      %15 = arith.addf %14, %13 : vector<16x32xf32>
      %16 = arith.truncf %15 : vector<16x32xf32> to vector<16x32xbf16>
      %c0_14 = arith.constant 0 : index
      %c0_15 = arith.constant 0 : index
      %17 = vector.load %arg6[%c0_14, %c0_15] : memref<16x32xbf16, #tpu.memory_space<vmem>>, vector<16x32xbf16>
      tpu.vector_store %arg6[%c0_14, %c0_15], %16 {strides = array<i32>} : memref<16x32xbf16, #tpu.memory_space<vmem>>, vector<16x32xbf16>,
    } else {
    }
    return
  }
  func.func @transform_0(%arg0: i32, %arg1: i32, %arg2: i32) -> (i32, i32) {
    %c0_i32 = arith.constant 0 : i32
    return %arg0, %arg2 : i32, i32
  }
  func.func @transform_1(%arg0: i32, %arg1: i32, %arg2: i32) -> (i32, i32) {
    %c0_i32 = arith.constant 0 : i32
    return %arg2, %arg1 : i32, i32
  }
  func.func @transform_2(%arg0: i32, %arg1: i32, %arg2: i32) -> (i32, i32) {
    %c0_i32 = arith.constant 0 : i32
    return %arg0, %arg1 : i32, i32
  }
  func.func @transform_3(%arg0: i32, %arg1: i32, %arg2: i32) -> (i32, i32) {
    %c0_i32 = arith.constant 0 : i32
    return %arg0, %arg1 : i32, i32
  }
}

module attributes {stable_mosaic.version = 11 : i64} {
  func.func @att_proj_kernel(%arg0: i32, %arg1: i32, %arg2: memref<1x8x32xbf16, #tpu.memory_space<vmem>>, %arg3: memref<1x32xf32, #tpu.memory_space<vmem>>, %arg4: memref<1x32xf32, #tpu.memory_space<vmem>>, %arg5: memref<1x32xf32, #tpu.memory_space<vmem>>, %arg6: memref<1x32xf32, #tpu.memory_space<vmem>>, %arg7: memref<1x32xf32, #tpu.memory_space<vmem>>, %arg8: memref<32x32xbf16, #tpu.memory_space<vmem>>, %arg9: memref<32x32xbf16, #tpu.memory_space<vmem>>, %arg10: memref<32x32xbf16, #tpu.memory_space<vmem>>, %arg11: memref<1x8x32xbf16, #tpu.memory_space<vmem>>, %arg12: memref<1x8x32xbf16, #tpu.memory_space<vmem>>, %arg13: memref<1x8x32xbf16, #tpu.memory_space<vmem>>, %arg14: memref<8x32xf32, #tpu.memory_space<vmem>>) attributes {dimension_semantics = [#tpu.dimension_semantics<parallel>, #tpu.dimension_semantics<arbitrary>], iteration_bounds = array<i64: 2, 1>, scalar_prefetch = 0 : i64, scratch_operands = 1 : i64, tpu.core_type = #tpu.core_type<tc>, window_params = [{transform_indices = @transform_0, window_bounds = array<i64: 1, 8, 32>}, {pipeline_mode = #tpu.pipeline_mode<synchronous>, transform_indices = @transform_1, window_bounds = array<i64: 1, 32>}, {pipeline_mode = #tpu.pipeline_mode<synchronous>, transform_indices = @transform_2, window_bounds = array<i64: 1, 32>}, {pipeline_mode = #tpu.pipeline_mode<synchronous>, transform_indices = @transform_3, window_bounds = array<i64: 1, 32>}, {pipeline_mode = #tpu.pipeline_mode<synchronous>, transform_indices = @transform_4, window_bounds = array<i64: 1, 32>}, {pipeline_mode = #tpu.pipeline_mode<synchronous>, transform_indices = @transform_5, window_bounds = array<i64: 1, 32>}, {transform_indices = @transform_6, window_bounds = array<i64: 32, 32>}, {transform_indices = @transform_7, window_bounds = array<i64: 32, 32>}, {transform_indices = @transform_8, window_bounds = array<i64: 32, 32>}, {transform_indices = @transform_9, window_bounds = array<i64: 1, 8, 32>}, {transform_indices = @transform_10, window_bounds = array<i64: 1, 8, 32>}, {transform_indices = @transform_11, window_bounds = array<i64: 1, 8, 32>}]} {
    %c0_i32 = arith.constant 0 : i32
    %0 = arith.cmpi eq, %arg1, %c0_i32 : i32
    %1 = arith.extui %0 : i1 to i32
    %c0_i32_0 = arith.constant 0 : i32
    %2 = arith.cmpi ne, %1, %c0_i32_0 : i32
    scf.if %2 {
      %c0_31 = arith.constant 0 : index
      %c0_32 = arith.constant 0 : index
      %c0_33 = arith.constant 0 : index
      %60 = vector.load %arg2[%c0_31, %c0_32, %c0_33] : memref<1x8x32xbf16, #tpu.memory_space<vmem>>, vector<1x8x32xbf16>
      %61 = vector.shape_cast %60 : vector<1x8x32xbf16> to vector<8x32xbf16>
      %62 = arith.extf %61 : vector<8x32xbf16> to vector<8x32xf32>
      %c0_34 = arith.constant 0 : index
      %c0_35 = arith.constant 0 : index
      %63 = vector.load %arg3[%c0_34, %c0_35] : memref<1x32xf32, #tpu.memory_space<vmem>>, vector<1x32xf32>
      %c0_36 = arith.constant 0 : index
      %c0_37 = arith.constant 0 : index
      %64 = vector.load %arg4[%c0_36, %c0_37] : memref<1x32xf32, #tpu.memory_space<vmem>>, vector<1x32xf32>
      %cst_38 = arith.constant dense<0.000000e+00> : vector<8xf32>
      %65 = vector.multi_reduction <add>, %62, %cst_38 [1] : vector<8x32xf32> to vector<8xf32>
      %66 = vector.shape_cast %65 : vector<8xf32> to vector<8x1xf32>
      %cst_39 = arith.constant 3.200000e+01 : f32
      %67 = vector.broadcast %cst_39 : f32 to vector<8x1xf32>
      %68 = arith.divf %66, %67 : vector<8x1xf32>
      %69 = vector.broadcast %68 : vector<8x1xf32> to vector<8x32xf32>
      %70 = arith.subf %62, %69 : vector<8x32xf32>
      %71 = arith.mulf %70, %70 : vector<8x32xf32>
      %cst_40 = arith.constant dense<0.000000e+00> : vector<8xf32>
      %72 = vector.multi_reduction <add>, %71, %cst_40 [1] : vector<8x32xf32> to vector<8xf32>
      %73 = vector.shape_cast %72 : vector<8xf32> to vector<8x1xf32>
      %cst_41 = arith.constant 3.200000e+01 : f32
      %74 = vector.broadcast %cst_41 : f32 to vector<8x1xf32>
      %75 = arith.divf %73, %74 : vector<8x1xf32>
      %cst_42 = arith.constant 9.99999974E-6 : f32
      %76 = vector.broadcast %cst_42 : f32 to vector<8x1xf32>
      %77 = arith.addf %75, %76 : vector<8x1xf32>
      %78 = math.rsqrt %77 : vector<8x1xf32>
      %79 = vector.broadcast %78 : vector<8x1xf32> to vector<8x32xf32>
      %80 = arith.mulf %70, %79 : vector<8x32xf32>
      %81 = vector.broadcast %63 : vector<1x32xf32> to vector<8x32xf32>
      %82 = arith.mulf %80, %81 : vector<8x32xf32>
      %83 = vector.broadcast %64 : vector<1x32xf32> to vector<8x32xf32>
      %84 = arith.addf %82, %83 : vector<8x32xf32>
      %c0_43 = arith.constant 0 : index
      %c0_44 = arith.constant 0 : index
      %85 = vector.load %arg14[%c0_43, %c0_44] : memref<8x32xf32, #tpu.memory_space<vmem>>, vector<8x32xf32>
      tpu.vector_store %arg14[%c0_43, %c0_44], %84 {strides = array<i32>} : memref<8x32xf32, #tpu.memory_space<vmem>>, vector<8x32xf32>,
    } else {
    }
    %c0 = arith.constant 0 : index
    %c0_1 = arith.constant 0 : index
    %3 = vector.load %arg14[%c0, %c0_1] : memref<8x32xf32, #tpu.memory_space<vmem>>, vector<8x32xf32>
    %c1_i32 = arith.constant 1 : i32
    %4 = tpu.dynamic_rotate %3 by %c1_i32 dim 0 : vector<8x32xf32>, i32 -> vector<8x32xf32>
    %5 = tpu.iota {dimensions = array<i32: 0>} : vector<8x32xi32>
    %c0_i32_2 = arith.constant 0 : i32
    %6 = vector.broadcast %c0_i32_2 : i32 to vector<8x32xi32>
    %7 = arith.cmpi eq, %5, %6 : vector<8x32xi32>
    %cst = arith.constant 0.000000e+00 : f32
    %8 = vector.broadcast %cst : f32 to vector<8x32xf32>
    %9 = arith.select %7, %8, %4 : vector<8x32xi1>, vector<8x32xf32>
    %c0_3 = arith.constant 0 : index
    %c0_4 = arith.constant 0 : index
    %10 = vector.load %arg5[%c0_3, %c0_4] : memref<1x32xf32, #tpu.memory_space<vmem>>, vector<1x32xf32>
    %c0_5 = arith.constant 0 : index
    %c0_6 = arith.constant 0 : index
    %11 = vector.load %arg6[%c0_5, %c0_6] : memref<1x32xf32, #tpu.memory_space<vmem>>, vector<1x32xf32>
    %c0_7 = arith.constant 0 : index
    %c0_8 = arith.constant 0 : index
    %12 = vector.load %arg7[%c0_7, %c0_8] : memref<1x32xf32, #tpu.memory_space<vmem>>, vector<1x32xf32>
    %13 = vector.broadcast %10 : vector<1x32xf32> to vector<8x32xf32>
    %14 = arith.mulf %3, %13 : vector<8x32xf32>
    %cst_9 = arith.constant 1.000000e+00 : f32
    %15 = vector.broadcast %cst_9 : f32 to vector<1x32xf32>
    %16 = arith.subf %15, %10 : vector<1x32xf32>
    %17 = vector.broadcast %16 : vector<1x32xf32> to vector<8x32xf32>
    %18 = arith.mulf %9, %17 : vector<8x32xf32>
    %19 = arith.addf %14, %18 : vector<8x32xf32>
    %20 = arith.truncf %19 : vector<8x32xf32> to vector<8x32xbf16>
    %21 = vector.broadcast %11 : vector<1x32xf32> to vector<8x32xf32>
    %22 = arith.mulf %3, %21 : vector<8x32xf32>
    %cst_10 = arith.constant 1.000000e+00 : f32
    %23 = vector.broadcast %cst_10 : f32 to vector<1x32xf32>
    %24 = arith.subf %23, %11 : vector<1x32xf32>
    %25 = vector.broadcast %24 : vector<1x32xf32> to vector<8x32xf32>
    %26 = arith.mulf %9, %25 : vector<8x32xf32>
    %27 = arith.addf %22, %26 : vector<8x32xf32>
    %28 = arith.truncf %27 : vector<8x32xf32> to vector<8x32xbf16>
    %29 = vector.broadcast %12 : vector<1x32xf32> to vector<8x32xf32>
    %30 = arith.mulf %3, %29 : vector<8x32xf32>
    %cst_11 = arith.constant 1.000000e+00 : f32
    %31 = vector.broadcast %cst_11 : f32 to vector<1x32xf32>
    %32 = arith.subf %31, %12 : vector<1x32xf32>
    %33 = vector.broadcast %32 : vector<1x32xf32> to vector<8x32xf32>
    %34 = arith.mulf %9, %33 : vector<8x32xf32>
    %35 = arith.addf %30, %34 : vector<8x32xf32>
    %36 = arith.truncf %35 : vector<8x32xf32> to vector<8x32xbf16>
    %c0_12 = arith.constant 0 : index
    %c0_13 = arith.constant 0 : index
    %37 = vector.load %arg8[%c0_12, %c0_13] : memref<32x32xbf16, #tpu.memory_space<vmem>>, vector<32x32xbf16>
    %cst_14 = arith.constant dense<0.000000e+00> : vector<8x32xf32>
    %38 = tpu.matmul %20, %37, %cst_14 {dimension_numbers = #tpu.dot_dimension_numbers<[1], [0], [0], [1], [0, 0, 1, 1], [], []>} : vector<8x32xbf16>, vector<32x32xbf16>, vector<8x32xf32> -> vector<8x32xf32>
    %39 = arith.truncf %38 : vector<8x32xf32> to vector<8x32xbf16>
    %c0_15 = arith.constant 0 : index
    %c0_16 = arith.constant 0 : index
    %c0_17 = arith.constant 0 : index
    %40 = vector.load %arg11[%c0_15, %c0_16, %c0_17] : memref<1x8x32xbf16, #tpu.memory_space<vmem>>, vector<1x8x32xbf16>
    %41 = vector.shape_cast %40 : vector<1x8x32xbf16> to vector<8x32xbf16>
    %42 = vector.shape_cast %39 : vector<8x32xbf16> to vector<1x8x32xbf16>
    tpu.vector_store %arg11[%c0_15, %c0_16, %c0_17], %42 {strides = array<i32>} : memref<1x8x32xbf16, #tpu.memory_space<vmem>>, vector<1x8x32xbf16>,
    %c0_18 = arith.constant 0 : index
    %c0_19 = arith.constant 0 : index
    %43 = vector.load %arg9[%c0_18, %c0_19] : memref<32x32xbf16, #tpu.memory_space<vmem>>, vector<32x32xbf16>
    %cst_20 = arith.constant dense<0.000000e+00> : vector<8x32xf32>
    %44 = tpu.matmul %28, %43, %cst_20 {dimension_numbers = #tpu.dot_dimension_numbers<[1], [0], [0], [1], [0, 0, 1, 1], [], []>} : vector<8x32xbf16>, vector<32x32xbf16>, vector<8x32xf32> -> vector<8x32xf32>
    %45 = arith.truncf %44 : vector<8x32xf32> to vector<8x32xbf16>
    %c0_21 = arith.constant 0 : index
    %c0_22 = arith.constant 0 : index
    %c0_23 = arith.constant 0 : index
    %46 = vector.load %arg12[%c0_21, %c0_22, %c0_23] : memref<1x8x32xbf16, #tpu.memory_space<vmem>>, vector<1x8x32xbf16>
    %47 = vector.shape_cast %46 : vector<1x8x32xbf16> to vector<8x32xbf16>
    %48 = vector.shape_cast %45 : vector<8x32xbf16> to vector<1x8x32xbf16>
    tpu.vector_store %arg12[%c0_21, %c0_22, %c0_23], %48 {strides = array<i32>} : memref<1x8x32xbf16, #tpu.memory_space<vmem>>, vector<1x8x32xbf16>,
    %c0_24 = arith.constant 0 : index
    %c0_25 = arith.constant 0 : index
    %49 = vector.load %arg10[%c0_24, %c0_25] : memref<32x32xbf16, #tpu.memory_space<vmem>>, vector<32x32xbf16>
    %cst_26 = arith.constant dense<0.000000e+00> : vector<8x32xf32>
    %50 = tpu.matmul %36, %49, %cst_26 {dimension_numbers = #tpu.dot_dimension_numbers<[1], [0], [0], [1], [0, 0, 1, 1], [], []>} : vector<8x32xbf16>, vector<32x32xbf16>, vector<8x32xf32> -> vector<8x32xf32>
    %51 = arith.negf %50 : vector<8x32xf32>
    %52 = math.exp %51 : vector<8x32xf32>
    %cst_27 = arith.constant 1.000000e+00 : f32
    %53 = vector.broadcast %cst_27 : f32 to vector<8x32xf32>
    %54 = arith.addf %53, %52 : vector<8x32xf32>
    %55 = arith.divf %53, %54 : vector<8x32xf32>
    %56 = arith.truncf %55 : vector<8x32xf32> to vector<8x32xbf16>
    %c0_28 = arith.constant 0 : index
    %c0_29 = arith.constant 0 : index
    %c0_30 = arith.constant 0 : index
    %57 = vector.load %arg13[%c0_28, %c0_29, %c0_30] : memref<1x8x32xbf16, #tpu.memory_space<vmem>>, vector<1x8x32xbf16>
    %58 = vector.shape_cast %57 : vector<1x8x32xbf16> to vector<8x32xbf16>
    %59 = vector.shape_cast %56 : vector<8x32xbf16> to vector<1x8x32xbf16>
    tpu.vector_store %arg13[%c0_28, %c0_29, %c0_30], %59 {strides = array<i32>} : memref<1x8x32xbf16, #tpu.memory_space<vmem>>, vector<1x8x32xbf16>,
    return
  }
  func.func @transform_0(%arg0: i32, %arg1: i32) -> (i32, i32, i32) {
    %c0_i32 = arith.constant 0 : i32
    %c0_i32_0 = arith.constant 0 : i32
    %c0_i32_1 = arith.constant 0 : i32
    return %arg0, %c0_i32, %c0_i32_0 : i32, i32, i32
  }
  func.func @transform_1(%arg0: i32, %arg1: i32) -> (i32, i32) {
    %c0_i32 = arith.constant 0 : i32
    %c0_i32_0 = arith.constant 0 : i32
    %c0_i32_1 = arith.constant 0 : i32
    return %c0_i32, %c0_i32_0 : i32, i32
  }
  func.func @transform_2(%arg0: i32, %arg1: i32) -> (i32, i32) {
    %c0_i32 = arith.constant 0 : i32
    %c0_i32_0 = arith.constant 0 : i32
    %c0_i32_1 = arith.constant 0 : i32
    return %c0_i32, %c0_i32_0 : i32, i32
  }
  func.func @transform_3(%arg0: i32, %arg1: i32) -> (i32, i32) {
    %c0_i32 = arith.constant 0 : i32
    %c0_i32_0 = arith.constant 0 : i32
    %c0_i32_1 = arith.constant 0 : i32
    return %c0_i32, %c0_i32_0 : i32, i32
  }
  func.func @transform_4(%arg0: i32, %arg1: i32) -> (i32, i32) {
    %c0_i32 = arith.constant 0 : i32
    %c0_i32_0 = arith.constant 0 : i32
    %c0_i32_1 = arith.constant 0 : i32
    return %c0_i32, %c0_i32_0 : i32, i32
  }
  func.func @transform_5(%arg0: i32, %arg1: i32) -> (i32, i32) {
    %c0_i32 = arith.constant 0 : i32
    %c0_i32_0 = arith.constant 0 : i32
    %c0_i32_1 = arith.constant 0 : i32
    return %c0_i32, %c0_i32_0 : i32, i32
  }
  func.func @transform_6(%arg0: i32, %arg1: i32) -> (i32, i32) {
    %c0_i32 = arith.constant 0 : i32
    %c0_i32_0 = arith.constant 0 : i32
    return %c0_i32, %arg1 : i32, i32
  }
  func.func @transform_7(%arg0: i32, %arg1: i32) -> (i32, i32) {
    %c0_i32 = arith.constant 0 : i32
    %c0_i32_0 = arith.constant 0 : i32
    return %c0_i32, %arg1 : i32, i32
  }
  func.func @transform_8(%arg0: i32, %arg1: i32) -> (i32, i32) {
    %c0_i32 = arith.constant 0 : i32
    %c0_i32_0 = arith.constant 0 : i32
    return %c0_i32, %arg1 : i32, i32
  }
  func.func @transform_9(%arg0: i32, %arg1: i32) -> (i32, i32, i32) {
    %c0_i32 = arith.constant 0 : i32
    %c0_i32_0 = arith.constant 0 : i32
    return %arg0, %c0_i32, %arg1 : i32, i32, i32
  }
  func.func @transform_10(%arg0: i32, %arg1: i32) -> (i32, i32, i32) {
    %c0_i32 = arith.constant 0 : i32
    %c0_i32_0 = arith.constant 0 : i32
    return %arg0, %c0_i32, %arg1 : i32, i32, i32
  }
  func.func @transform_11(%arg0: i32, %arg1: i32) -> (i32, i32, i32) {
    %c0_i32 = arith.constant 0 : i32
    %c0_i32_0 = arith.constant 0 : i32
    return %arg0, %c0_i32, %arg1 : i32, i32, i32
  }
}

module attributes {stable_mosaic.version = 11 : i64} {
  func.func @layernorm_kernel(%arg0: i32, %arg1: memref<16x32xf32, #tpu.memory_space<vmem>>, %arg2: memref<1x32xf32, #tpu.memory_space<vmem>>, %arg3: memref<1x32xf32, #tpu.memory_space<vmem>>, %arg4: memref<16x32xbf16, #tpu.memory_space<vmem>>) attributes {dimension_semantics = [#tpu.dimension_semantics<parallel>], iteration_bounds = array<i64: 1>, scalar_prefetch = 0 : i64, scratch_operands = 0 : i64, tpu.core_type = #tpu.core_type<tc>, window_params = [{transform_indices = @transform_0, window_bounds = array<i64: 16, 32>}, {pipeline_mode = #tpu.pipeline_mode<synchronous>, transform_indices = @transform_1, window_bounds = array<i64: 1, 32>}, {pipeline_mode = #tpu.pipeline_mode<synchronous>, transform_indices = @transform_2, window_bounds = array<i64: 1, 32>}, {transform_indices = @transform_3, window_bounds = array<i64: 16, 32>}]} {
    %c0 = arith.constant 0 : index
    %c0_0 = arith.constant 0 : index
    %0 = vector.load %arg1[%c0, %c0_0] : memref<16x32xf32, #tpu.memory_space<vmem>>, vector<16x32xf32>
    %c0_1 = arith.constant 0 : index
    %c0_2 = arith.constant 0 : index
    %1 = vector.load %arg2[%c0_1, %c0_2] : memref<1x32xf32, #tpu.memory_space<vmem>>, vector<1x32xf32>
    %c0_3 = arith.constant 0 : index
    %c0_4 = arith.constant 0 : index
    %2 = vector.load %arg3[%c0_3, %c0_4] : memref<1x32xf32, #tpu.memory_space<vmem>>, vector<1x32xf32>
    %cst = arith.constant dense<0.000000e+00> : vector<16xf32>
    %3 = vector.multi_reduction <add>, %0, %cst [1] : vector<16x32xf32> to vector<16xf32>
    %4 = vector.shape_cast %3 : vector<16xf32> to vector<16x1xf32>
    %cst_5 = arith.constant 3.200000e+01 : f32
    %5 = vector.broadcast %cst_5 : f32 to vector<16x1xf32>
    %6 = arith.divf %4, %5 : vector<16x1xf32>
    %7 = vector.broadcast %6 : vector<16x1xf32> to vector<16x32xf32>
    %8 = arith.subf %0, %7 : vector<16x32xf32>
    %9 = arith.mulf %8, %8 : vector<16x32xf32>
    %cst_6 = arith.constant dense<0.000000e+00> : vector<16xf32>
    %10 = vector.multi_reduction <add>, %9, %cst_6 [1] : vector<16x32xf32> to vector<16xf32>
    %11 = vector.shape_cast %10 : vector<16xf32> to vector<16x1xf32>
    %cst_7 = arith.constant 3.200000e+01 : f32
    %12 = vector.broadcast %cst_7 : f32 to vector<16x1xf32>
    %13 = arith.divf %11, %12 : vector<16x1xf32>
    %cst_8 = arith.constant 9.99999974E-6 : f32
    %14 = vector.broadcast %cst_8 : f32 to vector<16x1xf32>
    %15 = arith.addf %13, %14 : vector<16x1xf32>
    %16 = math.rsqrt %15 : vector<16x1xf32>
    %17 = vector.broadcast %16 : vector<16x1xf32> to vector<16x32xf32>
    %18 = arith.mulf %8, %17 : vector<16x32xf32>
    %19 = vector.broadcast %1 : vector<1x32xf32> to vector<16x32xf32>
    %20 = arith.mulf %18, %19 : vector<16x32xf32>
    %21 = vector.broadcast %2 : vector<1x32xf32> to vector<16x32xf32>
    %22 = arith.addf %20, %21 : vector<16x32xf32>
    %23 = arith.truncf %22 : vector<16x32xf32> to vector<16x32xbf16>
    %c0_9 = arith.constant 0 : index
    %c0_10 = arith.constant 0 : index
    %24 = vector.load %arg4[%c0_9, %c0_10] : memref<16x32xbf16, #tpu.memory_space<vmem>>, vector<16x32xbf16>
    tpu.vector_store %arg4[%c0_9, %c0_10], %23 {strides = array<i32>} : memref<16x32xbf16, #tpu.memory_space<vmem>>, vector<16x32xbf16>,
    return
  }
  func.func @transform_0(%arg0: i32) -> (i32, i32) {
    %c0_i32 = arith.constant 0 : i32
    %c0_i32_0 = arith.constant 0 : i32
    return %arg0, %c0_i32 : i32, i32
  }
  func.func @transform_1(%arg0: i32) -> (i32, i32) {
    %c0_i32 = arith.constant 0 : i32
    %c0_i32_0 = arith.constant 0 : i32
    %c0_i32_1 = arith.constant 0 : i32
    return %c0_i32, %c0_i32_0 : i32, i32
  }
  func.func @transform_2(%arg0: i32) -> (i32, i32) {
    %c0_i32 = arith.constant 0 : i32
    %c0_i32_0 = arith.constant 0 : i32
    %c0_i32_1 = arith.constant 0 : i32
    return %c0_i32, %c0_i32_0 : i32, i32
  }
  func.func @transform_3(%arg0: i32) -> (i32, i32) {
    %c0_i32 = arith.constant 0 : i32
    %c0_i32_0 = arith.constant 0 : i32
    return %arg0, %c0_i32 : i32, i32
  }
}

module attributes {stable_mosaic.version = 11 : i64} {
  func.func @kernel(%arg0: i32, %arg1: i32, %arg2: memref<1x32xf32, #tpu.memory_space<vmem>>, %arg3: memref<1x32xf32, #tpu.memory_space<vmem>>, %arg4: memref<1x8x1x32xbf16, #tpu.memory_space<vmem>>, %arg5: memref<1x8x1x32xbf16, #tpu.memory_space<vmem>>, %arg6: memref<1x8x1x32xbf16, #tpu.memory_space<vmem>>, %arg7: memref<1x8x1x32xbf16, #tpu.memory_space<vmem>>, %arg8: memref<8x1x32xf32, #tpu.memory_space<vmem>>) attributes {dimension_semantics = [#tpu.dimension_semantics<parallel>, #tpu.dimension_semantics<parallel>], iteration_bounds = array<i64: 2, 1>, scalar_prefetch = 0 : i64, scratch_operands = 1 : i64, tpu.core_type = #tpu.core_type<tc>, window_params = [{transform_indices = @transform_0, window_bounds = array<i64: 1, 32>}, {transform_indices = @transform_1, window_bounds = array<i64: 1, 32>}, {transform_indices = @transform_2, window_bounds = array<i64: 1, 8, 1, 32>}, {transform_indices = @transform_3, window_bounds = array<i64: 1, 8, 1, 32>}, {transform_indices = @transform_4, window_bounds = array<i64: 1, 8, 1, 32>}, {transform_indices = @transform_5, window_bounds = array<i64: 1, 8, 1, 32>}]} {
    %c0 = arith.constant 0 : index
    %c0_0 = arith.constant 0 : index
    %0 = vector.load %arg3[%c0, %c0_0] : memref<1x32xf32, #tpu.memory_space<vmem>>, vector<1x32xf32>
    %1 = arith.truncf %0 : vector<1x32xf32> to vector<1x32xbf16>
    %2 = arith.extf %1 : vector<1x32xbf16> to vector<1x32xf32>
    %c0_1 = arith.constant 0 : index
    %c0_2 = arith.constant 0 : index
    %3 = vector.load %arg2[%c0_1, %c0_2] : memref<1x32xf32, #tpu.memory_space<vmem>>, vector<1x32xf32>
    %4 = math.exp %3 : vector<1x32xf32>
    %cst = arith.constant 0.000000e+00 : f32
    %5 = vector.broadcast %cst : f32 to vector<1x32xf32>
    %6 = arith.subf %5, %4 : vector<1x32xf32>
    %cst_3 = arith.constant 0.000000e+00 : f32
    %7 = vector.broadcast %cst_3 : f32 to vector<1x32xf32>
    %cst_4 = arith.constant -9.99999968E+37 : f32
    %8 = vector.broadcast %cst_4 : f32 to vector<1x32xf32>
    %c0_i32 = arith.constant 0 : i32
    %c8_i32 = arith.constant 8 : i32
    %9 = arith.muli %c0_i32, %c8_i32 : i32
    %10 = tpu.assume_multiple %9, 8 : i32
    %c0_5 = arith.constant 0 : index
    %11 = arith.index_cast %10 : i32 to index
    %c0_6 = arith.constant 0 : index
    %c0_7 = arith.constant 0 : index
    %12 = vector.load %arg4[%c0_5, %11, %c0_6, %c0_7] : memref<1x8x1x32xbf16, #tpu.memory_space<vmem>>, vector<1x8x1x32xbf16>
    %13 = vector.shape_cast %12 : vector<1x8x1x32xbf16> to vector<8x1x32xbf16>
    %14 = arith.extf %13 : vector<8x1x32xbf16> to vector<8x1x32xf32>
    %c0_8 = arith.constant 0 : index
    %15 = arith.index_cast %10 : i32 to index
    %c0_9 = arith.constant 0 : index
    %c0_10 = arith.constant 0 : index
    %16 = vector.load %arg5[%c0_8, %15, %c0_9, %c0_10] : memref<1x8x1x32xbf16, #tpu.memory_space<vmem>>, vector<1x8x1x32xbf16>
    %17 = vector.shape_cast %16 : vector<1x8x1x32xbf16> to vector<8x1x32xbf16>
    %18 = arith.extf %17 : vector<8x1x32xbf16> to vector<8x1x32xf32>
    %c0_11 = arith.constant 0 : index
    %19 = arith.index_cast %10 : i32 to index
    %c0_12 = arith.constant 0 : index
    %c0_13 = arith.constant 0 : index
    %20 = vector.load %arg6[%c0_11, %19, %c0_12, %c0_13] : memref<1x8x1x32xbf16, #tpu.memory_space<vmem>>, vector<1x8x1x32xbf16>
    %21 = vector.shape_cast %20 : vector<1x8x1x32xbf16> to vector<8x1x32xbf16>
    %22 = arith.extf %21 : vector<8x1x32xbf16> to vector<8x1x32xf32>
    %23 = vector.extract_strided_slice %14 {offsets = [0, 0, 0], sizes = [1, 1, 32], strides = [1, 1, 1]} : vector<8x1x32xf32> to vector<1x1x32xf32>
    %24 = vector.shape_cast %23 : vector<1x1x32xf32> to vector<1x32xf32>
    %25 = vector.extract_strided_slice %18 {offsets = [0, 0, 0], sizes = [1, 1, 32], strides = [1, 1, 1]} : vector<8x1x32xf32> to vector<1x1x32xf32>
    %26 = vector.shape_cast %25 : vector<1x1x32xf32> to vector<1x32xf32>
    %27 = arith.addf %2, %24 : vector<1x32xf32>
    %28 = arith.subf %8, %27 : vector<1x32xf32>
    %29 = math.absf %28 : vector<1x32xf32>
    %cst_14 = arith.constant 0.000000e+00 : f32
    %30 = vector.broadcast %cst_14 : f32 to vector<1x32xf32>
    %31 = arith.subf %30, %29 : vector<1x32xf32>
    %32 = math.exp %31 : vector<1x32xf32>
    %cst_15 = arith.constant 0.000000e+00 : f32
    %33 = vector.broadcast %cst_15 : f32 to vector<1x32xf32>
    %34 = arith.cmpf oge, %28, %33 : vector<1x32xf32>
    %cst_16 = arith.constant 1.000000e+00 : f32
    %35 = vector.broadcast %cst_16 : f32 to vector<1x32xf32>
    %36 = arith.select %34, %35, %32 : vector<1x32xi1>, vector<1x32xf32>
    %cst_17 = arith.constant 1.000000e+00 : f32
    %37 = vector.broadcast %cst_17 : f32 to vector<1x32xf32>
    %38 = arith.select %34, %32, %37 : vector<1x32xi1>, vector<1x32xf32>
    %39 = arith.mulf %36, %7 : vector<1x32xf32>
    %40 = arith.mulf %38, %26 : vector<1x32xf32>
    %41 = arith.addf %39, %40 : vector<1x32xf32>
    %42 = arith.mulf %36, %7 : vector<1x32xf32>
    %43 = arith.addf %42, %38 : vector<1x32xf32>
    %44 = tpu.reciprocal %43 {approx = true} : vector<1x32xf32> -> vector<1x32xf32>
    %45 = arith.mulf %41, %44 : vector<1x32xf32>
    %c0_18 = arith.constant 0 : index
    %c0_19 = arith.constant 0 : index
    %c0_20 = arith.constant 0 : index
    %46 = vector.load %arg8[%c0_18, %c0_19, %c0_20] : memref<8x1x32xf32, #tpu.memory_space<vmem>>, vector<1x1x32xf32>
    %47 = vector.shape_cast %46 : vector<1x1x32xf32> to vector<1x32xf32>
    %48 = vector.shape_cast %45 : vector<1x32xf32> to vector<1x1x32xf32>
    tpu.vector_store %arg8[%c0_18, %c0_19, %c0_20], %48 {strides = array<i32>} : memref<8x1x32xf32, #tpu.memory_space<vmem>>, vector<1x1x32xf32>,
    %49 = arith.addf %8, %6 : vector<1x32xf32>
    %50 = arith.subf %49, %24 : vector<1x32xf32>
    %51 = math.absf %50 : vector<1x32xf32>
    %cst_21 = arith.constant 0.000000e+00 : f32
    %52 = vector.broadcast %cst_21 : f32 to vector<1x32xf32>
    %53 = arith.subf %52, %51 : vector<1x32xf32>
    %54 = math.exp %53 : vector<1x32xf32>
    %cst_22 = arith.constant 0.000000e+00 : f32
    %55 = vector.broadcast %cst_22 : f32 to vector<1x32xf32>
    %56 = arith.cmpf oge, %50, %55 : vector<1x32xf32>
    %cst_23 = arith.constant 1.000000e+00 : f32
    %57 = vector.broadcast %cst_23 : f32 to vector<1x32xf32>
    %58 = arith.select %56, %57, %54 : vector<1x32xi1>, vector<1x32xf32>
    %cst_24 = arith.constant 1.000000e+00 : f32
    %59 = vector.broadcast %cst_24 : f32 to vector<1x32xf32>
    %60 = arith.select %56, %54, %59 : vector<1x32xi1>, vector<1x32xf32>
    %61 = arith.mulf %58, %7 : vector<1x32xf32>
    %62 = arith.mulf %60, %26 : vector<1x32xf32>
    %63 = arith.addf %61, %62 : vector<1x32xf32>
    %64 = arith.mulf %58, %7 : vector<1x32xf32>
    %65 = arith.addf %64, %60 : vector<1x32xf32>
    %66 = arith.maximumf %49, %24 : vector<1x32xf32>
    %67 = vector.extract_strided_slice %14 {offsets = [1, 0, 0], sizes = [1, 1, 32], strides = [1, 1, 1]} : vector<8x1x32xf32> to vector<1x1x32xf32>
    %68 = vector.shape_cast %67 : vector<1x1x32xf32> to vector<1x32xf32>
    %69 = vector.extract_strided_slice %18 {offsets = [1, 0, 0], sizes = [1, 1, 32], strides = [1, 1, 1]} : vector<8x1x32xf32> to vector<1x1x32xf32>
    %70 = vector.shape_cast %69 : vector<1x1x32xf32> to vector<1x32xf32>
    %71 = arith.addf %2, %68 : vector<1x32xf32>
    %72 = arith.subf %66, %71 : vector<1x32xf32>
    %73 = math.absf %72 : vector<1x32xf32>
    %cst_25 = arith.constant 0.000000e+00 : f32
    %74 = vector.broadcast %cst_25 : f32 to vector<1x32xf32>
    %75 = arith.subf %74, %73 : vector<1x32xf32>
    %76 = math.exp %75 : vector<1x32xf32>
    %cst_26 = arith.constant 0.000000e+00 : f32
    %77 = vector.broadcast %cst_26 : f32 to vector<1x32xf32>
    %78 = arith.cmpf oge, %72, %77 : vector<1x32xf32>
    %cst_27 = arith.constant 1.000000e+00 : f32
    %79 = vector.broadcast %cst_27 : f32 to vector<1x32xf32>
    %80 = arith.select %78, %79, %76 : vector<1x32xi1>, vector<1x32xf32>
    %cst_28 = arith.constant 1.000000e+00 : f32
    %81 = vector.broadcast %cst_28 : f32 to vector<1x32xf32>
    %82 = arith.select %78, %76, %81 : vector<1x32xi1>, vector<1x32xf32>
    %83 = arith.mulf %80, %63 : vector<1x32xf32>
    %84 = arith.mulf %82, %70 : vector<1x32xf32>
    %85 = arith.addf %83, %84 : vector<1x32xf32>
    %86 = arith.mulf %80, %65 : vector<1x32xf32>
    %87 = arith.addf %86, %82 : vector<1x32xf32>
    %88 = tpu.reciprocal %87 {approx = true} : vector<1x32xf32> -> vector<1x32xf32>
    %89 = arith.mulf %85, %88 : vector<1x32xf32>
    %c1 = arith.constant 1 : index
    %c0_29 = arith.constant 0 : index
    %c0_30 = arith.constant 0 : index
    %90 = vector.load %arg8[%c1, %c0_29, %c0_30] : memref<8x1x32xf32, #tpu.memory_space<vmem>>, vector<1x1x32xf32>
    %91 = vector.shape_cast %90 : vector<1x1x32xf32> to vector<1x32xf32>
    %92 = vector.shape_cast %89 : vector<1x32xf32> to vector<1x1x32xf32>
    tpu.vector_store %arg8[%c1, %c0_29, %c0_30], %92 {strides = array<i32>} : memref<8x1x32xf32, #tpu.memory_space<vmem>>, vector<1x1x32xf32>,
    %93 = arith.addf %66, %6 : vector<1x32xf32>
    %94 = arith.subf %93, %68 : vector<1x32xf32>
    %95 = math.absf %94 : vector<1x32xf32>
    %cst_31 = arith.constant 0.000000e+00 : f32
    %96 = vector.broadcast %cst_31 : f32 to vector<1x32xf32>
    %97 = arith.subf %96, %95 : vector<1x32xf32>
    %98 = math.exp %97 : vector<1x32xf32>
    %cst_32 = arith.constant 0.000000e+00 : f32
    %99 = vector.broadcast %cst_32 : f32 to vector<1x32xf32>
    %100 = arith.cmpf oge, %94, %99 : vector<1x32xf32>
    %cst_33 = arith.constant 1.000000e+00 : f32
    %101 = vector.broadcast %cst_33 : f32 to vector<1x32xf32>
    %102 = arith.select %100, %101, %98 : vector<1x32xi1>, vector<1x32xf32>
    %cst_34 = arith.constant 1.000000e+00 : f32
    %103 = vector.broadcast %cst_34 : f32 to vector<1x32xf32>
    %104 = arith.select %100, %98, %103 : vector<1x32xi1>, vector<1x32xf32>
    %105 = arith.mulf %102, %63 : vector<1x32xf32>
    %106 = arith.mulf %104, %70 : vector<1x32xf32>
    %107 = arith.addf %105, %106 : vector<1x32xf32>
    %108 = arith.mulf %102, %65 : vector<1x32xf32>
    %109 = arith.addf %108, %104 : vector<1x32xf32>
    %110 = arith.maximumf %93, %68 : vector<1x32xf32>
    %111 = vector.extract_strided_slice %14 {offsets = [2, 0, 0], sizes = [1, 1, 32], strides = [1, 1, 1]} : vector<8x1x32xf32> to vector<1x1x32xf32>
    %112 = vector.shape_cast %111 : vector<1x1x32xf32> to vector<1x32xf32>
    %113 = vector.extract_strided_slice %18 {offsets = [2, 0, 0], sizes = [1, 1, 32], strides = [1, 1, 1]} : vector<8x1x32xf32> to vector<1x1x32xf32>
    %114 = vector.shape_cast %113 : vector<1x1x32xf32> to vector<1x32xf32>
    %115 = arith.addf %2, %112 : vector<1x32xf32>
    %116 = arith.subf %110, %115 : vector<1x32xf32>
    %117 = math.absf %116 : vector<1x32xf32>
    %cst_35 = arith.constant 0.000000e+00 : f32
    %118 = vector.broadcast %cst_35 : f32 to vector<1x32xf32>
    %119 = arith.subf %118, %117 : vector<1x32xf32>
    %120 = math.exp %119 : vector<1x32xf32>
    %cst_36 = arith.constant 0.000000e+00 : f32
    %121 = vector.broadcast %cst_36 : f32 to vector<1x32xf32>
    %122 = arith.cmpf oge, %116, %121 : vector<1x32xf32>
    %cst_37 = arith.constant 1.000000e+00 : f32
    %123 = vector.broadcast %cst_37 : f32 to vector<1x32xf32>
    %124 = arith.select %122, %123, %120 : vector<1x32xi1>, vector<1x32xf32>
    %cst_38 = arith.constant 1.000000e+00 : f32
    %125 = vector.broadcast %cst_38 : f32 to vector<1x32xf32>
    %126 = arith.select %122, %120, %125 : vector<1x32xi1>, vector<1x32xf32>
    %127 = arith.mulf %124, %107 : vector<1x32xf32>
    %128 = arith.mulf %126, %114 : vector<1x32xf32>
    %129 = arith.addf %127, %128 : vector<1x32xf32>
    %130 = arith.mulf %124, %109 : vector<1x32xf32>
    %131 = arith.addf %130, %126 : vector<1x32xf32>
    %132 = tpu.reciprocal %131 {approx = true} : vector<1x32xf32> -> vector<1x32xf32>
    %133 = arith.mulf %129, %132 : vector<1x32xf32>
    %c2 = arith.constant 2 : index
    %c0_39 = arith.constant 0 : index
    %c0_40 = arith.constant 0 : index
    %134 = vector.load %arg8[%c2, %c0_39, %c0_40] : memref<8x1x32xf32, #tpu.memory_space<vmem>>, vector<1x1x32xf32>
    %135 = vector.shape_cast %134 : vector<1x1x32xf32> to vector<1x32xf32>
    %136 = vector.shape_cast %133 : vector<1x32xf32> to vector<1x1x32xf32>
    tpu.vector_store %arg8[%c2, %c0_39, %c0_40], %136 {strides = array<i32>} : memref<8x1x32xf32, #tpu.memory_space<vmem>>, vector<1x1x32xf32>,
    %137 = arith.addf %110, %6 : vector<1x32xf32>
    %138 = arith.subf %137, %112 : vector<1x32xf32>
    %139 = math.absf %138 : vector<1x32xf32>
    %cst_41 = arith.constant 0.000000e+00 : f32
    %140 = vector.broadcast %cst_41 : f32 to vector<1x32xf32>
    %141 = arith.subf %140, %139 : vector<1x32xf32>
    %142 = math.exp %141 : vector<1x32xf32>
    %cst_42 = arith.constant 0.000000e+00 : f32
    %143 = vector.broadcast %cst_42 : f32 to vector<1x32xf32>
    %144 = arith.cmpf oge, %138, %143 : vector<1x32xf32>
    %cst_43 = arith.constant 1.000000e+00 : f32
    %145 = vector.broadcast %cst_43 : f32 to vector<1x32xf32>
    %146 = arith.select %144, %145, %142 : vector<1x32xi1>, vector<1x32xf32>
    %cst_44 = arith.constant 1.000000e+00 : f32
    %147 = vector.broadcast %cst_44 : f32 to vector<1x32xf32>
    %148 = arith.select %144, %142, %147 : vector<1x32xi1>, vector<1x32xf32>
    %149 = arith.mulf %146, %107 : vector<1x32xf32>
    %150 = arith.mulf %148, %114 : vector<1x32xf32>
    %151 = arith.addf %149, %150 : vector<1x32xf32>
    %152 = arith.mulf %146, %109 : vector<1x32xf32>
    %153 = arith.addf %152, %148 : vector<1x32xf32>
    %154 = arith.maximumf %137, %112 : vector<1x32xf32>
    %155 = vector.extract_strided_slice %14 {offsets = [3, 0, 0], sizes = [1, 1, 32], strides = [1, 1, 1]} : vector<8x1x32xf32> to vector<1x1x32xf32>
    %156 = vector.shape_cast %155 : vector<1x1x32xf32> to vector<1x32xf32>
    %157 = vector.extract_strided_slice %18 {offsets = [3, 0, 0], sizes = [1, 1, 32], strides = [1, 1, 1]} : vector<8x1x32xf32> to vector<1x1x32xf32>
    %158 = vector.shape_cast %157 : vector<1x1x32xf32> to vector<1x32xf32>
    %159 = arith.addf %2, %156 : vector<1x32xf32>
    %160 = arith.subf %154, %159 : vector<1x32xf32>
    %161 = math.absf %160 : vector<1x32xf32>
    %cst_45 = arith.constant 0.000000e+00 : f32
    %162 = vector.broadcast %cst_45 : f32 to vector<1x32xf32>
    %163 = arith.subf %162, %161 : vector<1x32xf32>
    %164 = math.exp %163 : vector<1x32xf32>
    %cst_46 = arith.constant 0.000000e+00 : f32
    %165 = vector.broadcast %cst_46 : f32 to vector<1x32xf32>
    %166 = arith.cmpf oge, %160, %165 : vector<1x32xf32>
    %cst_47 = arith.constant 1.000000e+00 : f32
    %167 = vector.broadcast %cst_47 : f32 to vector<1x32xf32>
    %168 = arith.select %166, %167, %164 : vector<1x32xi1>, vector<1x32xf32>
    %cst_48 = arith.constant 1.000000e+00 : f32
    %169 = vector.broadcast %cst_48 : f32 to vector<1x32xf32>
    %170 = arith.select %166, %164, %169 : vector<1x32xi1>, vector<1x32xf32>
    %171 = arith.mulf %168, %151 : vector<1x32xf32>
    %172 = arith.mulf %170, %158 : vector<1x32xf32>
    %173 = arith.addf %171, %172 : vector<1x32xf32>
    %174 = arith.mulf %168, %153 : vector<1x32xf32>
    %175 = arith.addf %174, %170 : vector<1x32xf32>
    %176 = tpu.reciprocal %175 {approx = true} : vector<1x32xf32> -> vector<1x32xf32>
    %177 = arith.mulf %173, %176 : vector<1x32xf32>
    %c3 = arith.constant 3 : index
    %c0_49 = arith.constant 0 : index
    %c0_50 = arith.constant 0 : index
    %178 = vector.load %arg8[%c3, %c0_49, %c0_50] : memref<8x1x32xf32, #tpu.memory_space<vmem>>, vector<1x1x32xf32>
    %179 = vector.shape_cast %178 : vector<1x1x32xf32> to vector<1x32xf32>
    %180 = vector.shape_cast %177 : vector<1x32xf32> to vector<1x1x32xf32>
    tpu.vector_store %arg8[%c3, %c0_49, %c0_50], %180 {strides = array<i32>} : memref<8x1x32xf32, #tpu.memory_space<vmem>>, vector<1x1x32xf32>,
    %181 = arith.addf %154, %6 : vector<1x32xf32>
    %182 = arith.subf %181, %156 : vector<1x32xf32>
    %183 = math.absf %182 : vector<1x32xf32>
    %cst_51 = arith.constant 0.000000e+00 : f32
    %184 = vector.broadcast %cst_51 : f32 to vector<1x32xf32>
    %185 = arith.subf %184, %183 : vector<1x32xf32>
    %186 = math.exp %185 : vector<1x32xf32>
    %cst_52 = arith.constant 0.000000e+00 : f32
    %187 = vector.broadcast %cst_52 : f32 to vector<1x32xf32>
    %188 = arith.cmpf oge, %182, %187 : vector<1x32xf32>
    %cst_53 = arith.constant 1.000000e+00 : f32
    %189 = vector.broadcast %cst_53 : f32 to vector<1x32xf32>
    %190 = arith.select %188, %189, %186 : vector<1x32xi1>, vector<1x32xf32>
    %cst_54 = arith.constant 1.000000e+00 : f32
    %191 = vector.broadcast %cst_54 : f32 to vector<1x32xf32>
    %192 = arith.select %188, %186, %191 : vector<1x32xi1>, vector<1x32xf32>
    %193 = arith.mulf %190, %151 : vector<1x32xf32>
    %194 = arith.mulf %192, %158 : vector<1x32xf32>
    %195 = arith.addf %193, %194 : vector<1x32xf32>
    %196 = arith.mulf %190, %153 : vector<1x32xf32>
    %197 = arith.addf %196, %192 : vector<1x32xf32>
    %198 = arith.maximumf %181, %156 : vector<1x32xf32>
    %199 = vector.extract_strided_slice %14 {offsets = [4, 0, 0], sizes = [1, 1, 32], strides = [1, 1, 1]} : vector<8x1x32xf32> to vector<1x1x32xf32>
    %200 = vector.shape_cast %199 : vector<1x1x32xf32> to vector<1x32xf32>
    %201 = vector.extract_strided_slice %18 {offsets = [4, 0, 0], sizes = [1, 1, 32], strides = [1, 1, 1]} : vector<8x1x32xf32> to vector<1x1x32xf32>
    %202 = vector.shape_cast %201 : vector<1x1x32xf32> to vector<1x32xf32>
    %203 = arith.addf %2, %200 : vector<1x32xf32>
    %204 = arith.subf %198, %203 : vector<1x32xf32>
    %205 = math.absf %204 : vector<1x32xf32>
    %cst_55 = arith.constant 0.000000e+00 : f32
    %206 = vector.broadcast %cst_55 : f32 to vector<1x32xf32>
    %207 = arith.subf %206, %205 : vector<1x32xf32>
    %208 = math.exp %207 : vector<1x32xf32>
    %cst_56 = arith.constant 0.000000e+00 : f32
    %209 = vector.broadcast %cst_56 : f32 to vector<1x32xf32>
    %210 = arith.cmpf oge, %204, %209 : vector<1x32xf32>
    %cst_57 = arith.constant 1.000000e+00 : f32
    %211 = vector.broadcast %cst_57 : f32 to vector<1x32xf32>
    %212 = arith.select %210, %211, %208 : vector<1x32xi1>, vector<1x32xf32>
    %cst_58 = arith.constant 1.000000e+00 : f32
    %213 = vector.broadcast %cst_58 : f32 to vector<1x32xf32>
    %214 = arith.select %210, %208, %213 : vector<1x32xi1>, vector<1x32xf32>
    %215 = arith.mulf %212, %195 : vector<1x32xf32>
    %216 = arith.mulf %214, %202 : vector<1x32xf32>
    %217 = arith.addf %215, %216 : vector<1x32xf32>
    %218 = arith.mulf %212, %197 : vector<1x32xf32>
    %219 = arith.addf %218, %214 : vector<1x32xf32>
    %220 = tpu.reciprocal %219 {approx = true} : vector<1x32xf32> -> vector<1x32xf32>
    %221 = arith.mulf %217, %220 : vector<1x32xf32>
    %c4 = arith.constant 4 : index
    %c0_59 = arith.constant 0 : index
    %c0_60 = arith.constant 0 : index
    %222 = vector.load %arg8[%c4, %c0_59, %c0_60] : memref<8x1x32xf32, #tpu.memory_space<vmem>>, vector<1x1x32xf32>
    %223 = vector.shape_cast %222 : vector<1x1x32xf32> to vector<1x32xf32>
    %224 = vector.shape_cast %221 : vector<1x32xf32> to vector<1x1x32xf32>
    tpu.vector_store %arg8[%c4, %c0_59, %c0_60], %224 {strides = array<i32>} : memref<8x1x32xf32, #tpu.memory_space<vmem>>, vector<1x1x32xf32>,
    %225 = arith.addf %198, %6 : vector<1x32xf32>
    %226 = arith.subf %225, %200 : vector<1x32xf32>
    %227 = math.absf %226 : vector<1x32xf32>
    %cst_61 = arith.constant 0.000000e+00 : f32
    %228 = vector.broadcast %cst_61 : f32 to vector<1x32xf32>
    %229 = arith.subf %228, %227 : vector<1x32xf32>
    %230 = math.exp %229 : vector<1x32xf32>
    %cst_62 = arith.constant 0.000000e+00 : f32
    %231 = vector.broadcast %cst_62 : f32 to vector<1x32xf32>
    %232 = arith.cmpf oge, %226, %231 : vector<1x32xf32>
    %cst_63 = arith.constant 1.000000e+00 : f32
    %233 = vector.broadcast %cst_63 : f32 to vector<1x32xf32>
    %234 = arith.select %232, %233, %230 : vector<1x32xi1>, vector<1x32xf32>
    %cst_64 = arith.constant 1.000000e+00 : f32
    %235 = vector.broadcast %cst_64 : f32 to vector<1x32xf32>
    %236 = arith.select %232, %230, %235 : vector<1x32xi1>, vector<1x32xf32>
    %237 = arith.mulf %234, %195 : vector<1x32xf32>
    %238 = arith.mulf %236, %202 : vector<1x32xf32>
    %239 = arith.addf %237, %238 : vector<1x32xf32>
    %240 = arith.mulf %234, %197 : vector<1x32xf32>
    %241 = arith.addf %240, %236 : vector<1x32xf32>
    %242 = arith.maximumf %225, %200 : vector<1x32xf32>
    %243 = vector.extract_strided_slice %14 {offsets = [5, 0, 0], sizes = [1, 1, 32], strides = [1, 1, 1]} : vector<8x1x32xf32> to vector<1x1x32xf32>
    %244 = vector.shape_cast %243 : vector<1x1x32xf32> to vector<1x32xf32>
    %245 = vector.extract_strided_slice %18 {offsets = [5, 0, 0], sizes = [1, 1, 32], strides = [1, 1, 1]} : vector<8x1x32xf32> to vector<1x1x32xf32>
    %246 = vector.shape_cast %245 : vector<1x1x32xf32> to vector<1x32xf32>
    %247 = arith.addf %2, %244 : vector<1x32xf32>
    %248 = arith.subf %242, %247 : vector<1x32xf32>
    %249 = math.absf %248 : vector<1x32xf32>
    %cst_65 = arith.constant 0.000000e+00 : f32
    %250 = vector.broadcast %cst_65 : f32 to vector<1x32xf32>
    %251 = arith.subf %250, %249 : vector<1x32xf32>
    %252 = math.exp %251 : vector<1x32xf32>
    %cst_66 = arith.constant 0.000000e+00 : f32
    %253 = vector.broadcast %cst_66 : f32 to vector<1x32xf32>
    %254 = arith.cmpf oge, %248, %253 : vector<1x32xf32>
    %cst_67 = arith.constant 1.000000e+00 : f32
    %255 = vector.broadcast %cst_67 : f32 to vector<1x32xf32>
    %256 = arith.select %254, %255, %252 : vector<1x32xi1>, vector<1x32xf32>
    %cst_68 = arith.constant 1.000000e+00 : f32
    %257 = vector.broadcast %cst_68 : f32 to vector<1x32xf32>
    %258 = arith.select %254, %252, %257 : vector<1x32xi1>, vector<1x32xf32>
    %259 = arith.mulf %256, %239 : vector<1x32xf32>
    %260 = arith.mulf %258, %246 : vector<1x32xf32>
    %261 = arith.addf %259, %260 : vector<1x32xf32>
    %262 = arith.mulf %256, %241 : vector<1x32xf32>
    %263 = arith.addf %262, %258 : vector<1x32xf32>
    %264 = tpu.reciprocal %263 {approx = true} : vector<1x32xf32> -> vector<1x32xf32>
    %265 = arith.mulf %261, %264 : vector<1x32xf32>
    %c5 = arith.constant 5 : index
    %c0_69 = arith.constant 0 : index
    %c0_70 = arith.constant 0 : index
    %266 = vector.load %arg8[%c5, %c0_69, %c0_70] : memref<8x1x32xf32, #tpu.memory_space<vmem>>, vector<1x1x32xf32>
    %267 = vector.shape_cast %266 : vector<1x1x32xf32> to vector<1x32xf32>
    %268 = vector.shape_cast %265 : vector<1x32xf32> to vector<1x1x32xf32>
    tpu.vector_store %arg8[%c5, %c0_69, %c0_70], %268 {strides = array<i32>} : memref<8x1x32xf32, #tpu.memory_space<vmem>>, vector<1x1x32xf32>,
    %269 = arith.addf %242, %6 : vector<1x32xf32>
    %270 = arith.subf %269, %244 : vector<1x32xf32>
    %271 = math.absf %270 : vector<1x32xf32>
    %cst_71 = arith.constant 0.000000e+00 : f32
    %272 = vector.broadcast %cst_71 : f32 to vector<1x32xf32>
    %273 = arith.subf %272, %271 : vector<1x32xf32>
    %274 = math.exp %273 : vector<1x32xf32>
    %cst_72 = arith.constant 0.000000e+00 : f32
    %275 = vector.broadcast %cst_72 : f32 to vector<1x32xf32>
    %276 = arith.cmpf oge, %270, %275 : vector<1x32xf32>
    %cst_73 = arith.constant 1.000000e+00 : f32
    %277 = vector.broadcast %cst_73 : f32 to vector<1x32xf32>
    %278 = arith.select %276, %277, %274 : vector<1x32xi1>, vector<1x32xf32>
    %cst_74 = arith.constant 1.000000e+00 : f32
    %279 = vector.broadcast %cst_74 : f32 to vector<1x32xf32>
    %280 = arith.select %276, %274, %279 : vector<1x32xi1>, vector<1x32xf32>
    %281 = arith.mulf %278, %239 : vector<1x32xf32>
    %282 = arith.mulf %280, %246 : vector<1x32xf32>
    %283 = arith.addf %281, %282 : vector<1x32xf32>
    %284 = arith.mulf %278, %241 : vector<1x32xf32>
    %285 = arith.addf %284, %280 : vector<1x32xf32>
    %286 = arith.maximumf %269, %244 : vector<1x32xf32>
    %287 = vector.extract_strided_slice %14 {offsets = [6, 0, 0], sizes = [1, 1, 32], strides = [1, 1, 1]} : vector<8x1x32xf32> to vector<1x1x32xf32>
    %288 = vector.shape_cast %287 : vector<1x1x32xf32> to vector<1x32xf32>
    %289 = vector.extract_strided_slice %18 {offsets = [6, 0, 0], sizes = [1, 1, 32], strides = [1, 1, 1]} : vector<8x1x32xf32> to vector<1x1x32xf32>
    %290 = vector.shape_cast %289 : vector<1x1x32xf32> to vector<1x32xf32>
    %291 = arith.addf %2, %288 : vector<1x32xf32>
    %292 = arith.subf %286, %291 : vector<1x32xf32>
    %293 = math.absf %292 : vector<1x32xf32>
    %cst_75 = arith.constant 0.000000e+00 : f32
    %294 = vector.broadcast %cst_75 : f32 to vector<1x32xf32>
    %295 = arith.subf %294, %293 : vector<1x32xf32>
    %296 = math.exp %295 : vector<1x32xf32>
    %cst_76 = arith.constant 0.000000e+00 : f32
    %297 = vector.broadcast %cst_76 : f32 to vector<1x32xf32>
    %298 = arith.cmpf oge, %292, %297 : vector<1x32xf32>
    %cst_77 = arith.constant 1.000000e+00 : f32
    %299 = vector.broadcast %cst_77 : f32 to vector<1x32xf32>
    %300 = arith.select %298, %299, %296 : vector<1x32xi1>, vector<1x32xf32>
    %cst_78 = arith.constant 1.000000e+00 : f32
    %301 = vector.broadcast %cst_78 : f32 to vector<1x32xf32>
    %302 = arith.select %298, %296, %301 : vector<1x32xi1>, vector<1x32xf32>
    %303 = arith.mulf %300, %283 : vector<1x32xf32>
    %304 = arith.mulf %302, %290 : vector<1x32xf32>
    %305 = arith.addf %303, %304 : vector<1x32xf32>
    %306 = arith.mulf %300, %285 : vector<1x32xf32>
    %307 = arith.addf %306, %302 : vector<1x32xf32>
    %308 = tpu.reciprocal %307 {approx = true} : vector<1x32xf32> -> vector<1x32xf32>
    %309 = arith.mulf %305, %308 : vector<1x32xf32>
    %c6 = arith.constant 6 : index
    %c0_79 = arith.constant 0 : index
    %c0_80 = arith.constant 0 : index
    %310 = vector.load %arg8[%c6, %c0_79, %c0_80] : memref<8x1x32xf32, #tpu.memory_space<vmem>>, vector<1x1x32xf32>
    %311 = vector.shape_cast %310 : vector<1x1x32xf32> to vector<1x32xf32>
    %312 = vector.shape_cast %309 : vector<1x32xf32> to vector<1x1x32xf32>
    tpu.vector_store %arg8[%c6, %c0_79, %c0_80], %312 {strides = array<i32>} : memref<8x1x32xf32, #tpu.memory_space<vmem>>, vector<1x1x32xf32>,
    %313 = arith.addf %286, %6 : vector<1x32xf32>
    %314 = arith.subf %313, %288 : vector<1x32xf32>
    %315 = math.absf %314 : vector<1x32xf32>
    %cst_81 = arith.constant 0.000000e+00 : f32
    %316 = vector.broadcast %cst_81 : f32 to vector<1x32xf32>
    %317 = arith.subf %316, %315 : vector<1x32xf32>
    %318 = math.exp %317 : vector<1x32xf32>
    %cst_82 = arith.constant 0.000000e+00 : f32
    %319 = vector.broadcast %cst_82 : f32 to vector<1x32xf32>
    %320 = arith.cmpf oge, %314, %319 : vector<1x32xf32>
    %cst_83 = arith.constant 1.000000e+00 : f32
    %321 = vector.broadcast %cst_83 : f32 to vector<1x32xf32>
    %322 = arith.select %320, %321, %318 : vector<1x32xi1>, vector<1x32xf32>
    %cst_84 = arith.constant 1.000000e+00 : f32
    %323 = vector.broadcast %cst_84 : f32 to vector<1x32xf32>
    %324 = arith.select %320, %318, %323 : vector<1x32xi1>, vector<1x32xf32>
    %325 = arith.mulf %322, %283 : vector<1x32xf32>
    %326 = arith.mulf %324, %290 : vector<1x32xf32>
    %327 = arith.addf %325, %326 : vector<1x32xf32>
    %328 = arith.mulf %322, %285 : vector<1x32xf32>
    %329 = arith.addf %328, %324 : vector<1x32xf32>
    %330 = arith.maximumf %313, %288 : vector<1x32xf32>
    %331 = vector.extract_strided_slice %14 {offsets = [7, 0, 0], sizes = [1, 1, 32], strides = [1, 1, 1]} : vector<8x1x32xf32> to vector<1x1x32xf32>
    %332 = vector.shape_cast %331 : vector<1x1x32xf32> to vector<1x32xf32>
    %333 = vector.extract_strided_slice %18 {offsets = [7, 0, 0], sizes = [1, 1, 32], strides = [1, 1, 1]} : vector<8x1x32xf32> to vector<1x1x32xf32>
    %334 = vector.shape_cast %333 : vector<1x1x32xf32> to vector<1x32xf32>
    %335 = arith.addf %2, %332 : vector<1x32xf32>
    %336 = arith.subf %330, %335 : vector<1x32xf32>
    %337 = math.absf %336 : vector<1x32xf32>
    %cst_85 = arith.constant 0.000000e+00 : f32
    %338 = vector.broadcast %cst_85 : f32 to vector<1x32xf32>
    %339 = arith.subf %338, %337 : vector<1x32xf32>
    %340 = math.exp %339 : vector<1x32xf32>
    %cst_86 = arith.constant 0.000000e+00 : f32
    %341 = vector.broadcast %cst_86 : f32 to vector<1x32xf32>
    %342 = arith.cmpf oge, %336, %341 : vector<1x32xf32>
    %cst_87 = arith.constant 1.000000e+00 : f32
    %343 = vector.broadcast %cst_87 : f32 to vector<1x32xf32>
    %344 = arith.select %342, %343, %340 : vector<1x32xi1>, vector<1x32xf32>
    %cst_88 = arith.constant 1.000000e+00 : f32
    %345 = vector.broadcast %cst_88 : f32 to vector<1x32xf32>
    %346 = arith.select %342, %340, %345 : vector<1x32xi1>, vector<1x32xf32>
    %347 = arith.mulf %344, %327 : vector<1x32xf32>
    %348 = arith.mulf %346, %334 : vector<1x32xf32>
    %349 = arith.addf %347, %348 : vector<1x32xf32>
    %350 = arith.mulf %344, %329 : vector<1x32xf32>
    %351 = arith.addf %350, %346 : vector<1x32xf32>
    %352 = tpu.reciprocal %351 {approx = true} : vector<1x32xf32> -> vector<1x32xf32>
    %353 = arith.mulf %349, %352 : vector<1x32xf32>
    %c7 = arith.constant 7 : index
    %c0_89 = arith.constant 0 : index
    %c0_90 = arith.constant 0 : index
    %354 = vector.load %arg8[%c7, %c0_89, %c0_90] : memref<8x1x32xf32, #tpu.memory_space<vmem>>, vector<1x1x32xf32>
    %355 = vector.shape_cast %354 : vector<1x1x32xf32> to vector<1x32xf32>
    %356 = vector.shape_cast %353 : vector<1x32xf32> to vector<1x1x32xf32>
    tpu.vector_store %arg8[%c7, %c0_89, %c0_90], %356 {strides = array<i32>} : memref<8x1x32xf32, #tpu.memory_space<vmem>>, vector<1x1x32xf32>,
    %357 = arith.addf %330, %6 : vector<1x32xf32>
    %358 = arith.subf %357, %332 : vector<1x32xf32>
    %359 = math.absf %358 : vector<1x32xf32>
    %cst_91 = arith.constant 0.000000e+00 : f32
    %360 = vector.broadcast %cst_91 : f32 to vector<1x32xf32>
    %361 = arith.subf %360, %359 : vector<1x32xf32>
    %362 = math.exp %361 : vector<1x32xf32>
    %cst_92 = arith.constant 0.000000e+00 : f32
    %363 = vector.broadcast %cst_92 : f32 to vector<1x32xf32>
    %364 = arith.cmpf oge, %358, %363 : vector<1x32xf32>
    %cst_93 = arith.constant 1.000000e+00 : f32
    %365 = vector.broadcast %cst_93 : f32 to vector<1x32xf32>
    %366 = arith.select %364, %365, %362 : vector<1x32xi1>, vector<1x32xf32>
    %cst_94 = arith.constant 1.000000e+00 : f32
    %367 = vector.broadcast %cst_94 : f32 to vector<1x32xf32>
    %368 = arith.select %364, %362, %367 : vector<1x32xi1>, vector<1x32xf32>
    %369 = arith.mulf %366, %327 : vector<1x32xf32>
    %370 = arith.mulf %368, %334 : vector<1x32xf32>
    %371 = arith.addf %369, %370 : vector<1x32xf32>
    %372 = arith.mulf %366, %329 : vector<1x32xf32>
    %373 = arith.addf %372, %368 : vector<1x32xf32>
    %374 = arith.maximumf %357, %332 : vector<1x32xf32>
    %c0_95 = arith.constant 0 : index
    %c0_96 = arith.constant 0 : index
    %c0_97 = arith.constant 0 : index
    %375 = vector.load %arg8[%c0_95, %c0_96, %c0_97] : memref<8x1x32xf32, #tpu.memory_space<vmem>>, vector<8x1x32xf32>
    %376 = arith.truncf %375 : vector<8x1x32xf32> to vector<8x1x32xbf16>
    %377 = arith.extf %376 : vector<8x1x32xbf16> to vector<8x1x32xf32>
    %378 = arith.mulf %22, %377 : vector<8x1x32xf32>
    %379 = arith.truncf %378 : vector<8x1x32xf32> to vector<8x1x32xbf16>
    %c0_98 = arith.constant 0 : index
    %380 = arith.index_cast %10 : i32 to index
    %c0_99 = arith.constant 0 : index
    %c0_100 = arith.constant 0 : index
    %381 = vector.load %arg7[%c0_98, %380, %c0_99, %c0_100] : memref<1x8x1x32xbf16, #tpu.memory_space<vmem>>, vector<1x8x1x32xbf16>
    %382 = vector.shape_cast %381 : vector<1x8x1x32xbf16> to vector<8x1x32xbf16>
    %383 = vector.shape_cast %379 : vector<8x1x32xbf16> to vector<1x8x1x32xbf16>
    tpu.vector_store %arg7[%c0_98, %380, %c0_99, %c0_100], %383 {strides = array<i32>} : memref<1x8x1x32xbf16, #tpu.memory_space<vmem>>, vector<1x8x1x32xbf16>,
    %c1_i32 = arith.constant 1 : i32
    return
  }
  func.func @transform_0(%arg0: i32, %arg1: i32) -> (i32, i32) {
    %c0_i32 = arith.constant 0 : i32
    %c0_i32_0 = arith.constant 0 : i32
    return %arg1, %c0_i32 : i32, i32
  }
  func.func @transform_1(%arg0: i32, %arg1: i32) -> (i32, i32) {
    %c0_i32 = arith.constant 0 : i32
    %c0_i32_0 = arith.constant 0 : i32
    return %arg1, %c0_i32 : i32, i32
  }
  func.func @transform_2(%arg0: i32, %arg1: i32) -> (i32, i32, i32, i32) {
    %c0_i32 = arith.constant 0 : i32
    %c0_i32_0 = arith.constant 0 : i32
    %c0_i32_1 = arith.constant 0 : i32
    return %arg0, %c0_i32, %arg1, %c0_i32_0 : i32, i32, i32, i32
  }
  func.func @transform_3(%arg0: i32, %arg1: i32) -> (i32, i32, i32, i32) {
    %c0_i32 = arith.constant 0 : i32
    %c0_i32_0 = arith.constant 0 : i32
    %c0_i32_1 = arith.constant 0 : i32
    return %arg0, %c0_i32, %arg1, %c0_i32_0 : i32, i32, i32, i32
  }
  func.func @transform_4(%arg0: i32, %arg1: i32) -> (i32, i32, i32, i32) {
    %c0_i32 = arith.constant 0 : i32
    %c0_i32_0 = arith.constant 0 : i32
    %c0_i32_1 = arith.constant 0 : i32
    return %arg0, %c0_i32, %arg1, %c0_i32_0 : i32, i32, i32, i32
  }
  func.func @transform_5(%arg0: i32, %arg1: i32) -> (i32, i32, i32, i32) {
    %c0_i32 = arith.constant 0 : i32
    %c0_i32_0 = arith.constant 0 : i32
    %c0_i32_1 = arith.constant 0 : i32
    return %arg0, %c0_i32, %arg1, %c0_i32_0 : i32, i32, i32, i32
  }
}

module attributes {stable_mosaic.version = 11 : i64} {
  func.func @kernel(%arg0: i32, %arg1: i32, %arg2: i32, %arg3: memref<16x32xbf16, #tpu.memory_space<vmem>>, %arg4: memref<32x32xbf16, #tpu.memory_space<vmem>>, %arg5: memref<16x32xbf16, #tpu.memory_space<vmem>>, %arg6: memref<16x32xf32, #tpu.memory_space<vmem>>) attributes {dimension_semantics = [#tpu.dimension_semantics<parallel>, #tpu.dimension_semantics<parallel>, #tpu.dimension_semantics<arbitrary>], iteration_bounds = array<i64: 1, 1, 1>, scalar_prefetch = 0 : i64, scratch_operands = 1 : i64, tpu.core_type = #tpu.core_type<tc>, window_params = [{transform_indices = @transform_0, window_bounds = array<i64: 16, 32>}, {transform_indices = @transform_1, window_bounds = array<i64: 32, 32>}, {transform_indices = @transform_2, window_bounds = array<i64: 16, 32>}]} {
    %c0_i32 = arith.constant 0 : i32
    %0 = arith.cmpi eq, %arg2, %c0_i32 : i32
    %1 = arith.extui %0 : i1 to i32
    %c0_i32_0 = arith.constant 0 : i32
    %2 = arith.cmpi ne, %1, %c0_i32_0 : i32
    scf.if %2 {
      %cst_10 = arith.constant 0.000000e+00 : f32
      %12 = vector.broadcast %cst_10 : f32 to vector<16x32xf32>
      %c0_11 = arith.constant 0 : index
      %c0_12 = arith.constant 0 : index
      %13 = vector.load %arg6[%c0_11, %c0_12] : memref<16x32xf32, #tpu.memory_space<vmem>>, vector<16x32xf32>
      tpu.vector_store %arg6[%c0_11, %c0_12], %12 {strides = array<i32>} : memref<16x32xf32, #tpu.memory_space<vmem>>, vector<16x32xf32>,
    } else {
    }
    %c0 = arith.constant 0 : index
    %c0_1 = arith.constant 0 : index
    %3 = vector.load %arg6[%c0, %c0_1] : memref<16x32xf32, #tpu.memory_space<vmem>>, vector<16x32xf32>
    %c0_2 = arith.constant 0 : index
    %c0_3 = arith.constant 0 : index
    %4 = vector.load %arg3[%c0_2, %c0_3] : memref<16x32xbf16, #tpu.memory_space<vmem>>, vector<16x32xbf16>
    %c0_4 = arith.constant 0 : index
    %c0_5 = arith.constant 0 : index
    %5 = vector.load %arg4[%c0_4, %c0_5] : memref<32x32xbf16, #tpu.memory_space<vmem>>, vector<32x32xbf16>
    %cst = arith.constant dense<0.000000e+00> : vector<16x32xf32>
    %6 = tpu.matmul %4, %5, %cst {dimension_numbers = #tpu.dot_dimension_numbers<[1], [0], [0], [1], [0, 0, 1, 1], [], []>} : vector<16x32xbf16>, vector<32x32xbf16>, vector<16x32xf32> -> vector<16x32xf32>
    %7 = arith.addf %3, %6 : vector<16x32xf32>
    %c0_6 = arith.constant 0 : index
    %c0_7 = arith.constant 0 : index
    %8 = vector.load %arg6[%c0_6, %c0_7] : memref<16x32xf32, #tpu.memory_space<vmem>>, vector<16x32xf32>
    tpu.vector_store %arg6[%c0_6, %c0_7], %7 {strides = array<i32>} : memref<16x32xf32, #tpu.memory_space<vmem>>, vector<16x32xf32>,
    %c0_i32_8 = arith.constant 0 : i32
    %9 = arith.cmpi eq, %arg2, %c0_i32_8 : i32
    %10 = arith.extui %9 : i1 to i32
    %c0_i32_9 = arith.constant 0 : i32
    %11 = arith.cmpi ne, %10, %c0_i32_9 : i32
    scf.if %11 {
      %c0_10 = arith.constant 0 : index
      %c0_11 = arith.constant 0 : index
      %12 = vector.load %arg6[%c0_10, %c0_11] : memref<16x32xf32, #tpu.memory_space<vmem>>, vector<16x32xf32>
      %13 = arith.negf %12 : vector<16x32xf32>
      %14 = math.exp %13 : vector<16x32xf32>
      %cst_12 = arith.constant 1.000000e+00 : f32
      %15 = vector.broadcast %cst_12 : f32 to vector<16x32xf32>
      %16 = arith.addf %15, %14 : vector<16x32xf32>
      %17 = arith.divf %15, %16 : vector<16x32xf32>
      %18 = arith.truncf %17 : vector<16x32xf32> to vector<16x32xbf16>
      %c0_13 = arith.constant 0 : index
      %c0_14 = arith.constant 0 : index
      %19 = vector.load %arg5[%c0_13, %c0_14] : memref<16x32xbf16, #tpu.memory_space<vmem>>, vector<16x32xbf16>
      tpu.vector_store %arg5[%c0_13, %c0_14], %18 {strides = array<i32>} : memref<16x32xbf16, #tpu.memory_space<vmem>>, vector<16x32xbf16>,
    } else {
    }
    return
  }
  func.func @transform_0(%arg0: i32, %arg1: i32, %arg2: i32) -> (i32, i32) {
    %c0_i32 = arith.constant 0 : i32
    return %arg0, %arg2 : i32, i32
  }
  func.func @transform_1(%arg0: i32, %arg1: i32, %arg2: i32) -> (i32, i32) {
    %c0_i32 = arith.constant 0 : i32
    return %arg2, %arg1 : i32, i32
  }
  func.func @transform_2(%arg0: i32, %arg1: i32, %arg2: i32) -> (i32, i32) {
    %c0_i32 = arith.constant 0 : i32
    return %arg0, %arg1 : i32, i32
  }
}

module attributes {stable_mosaic.version = 11 : i64} {
  func.func @ffn_main_kernel(%arg0: i32, %arg1: i32, %arg2: memref<16x32xbf16, #tpu.memory_space<vmem>>, %arg3: memref<16x32xbf16, #tpu.memory_space<vmem>>, %arg4: memref<16x32xbf16, #tpu.memory_space<vmem>>, %arg5: memref<32x128xbf16, #tpu.memory_space<vmem>>, %arg6: memref<128x32xbf16, #tpu.memory_space<vmem>>, %arg7: memref<16x32xbf16, #tpu.memory_space<vmem>>, %arg8: memref<16x32xf32, #tpu.memory_space<vmem>>) attributes {dimension_semantics = [#tpu.dimension_semantics<parallel>, #tpu.dimension_semantics<arbitrary>], iteration_bounds = array<i64: 1, 1>, scalar_prefetch = 0 : i64, scratch_operands = 1 : i64, tpu.core_type = #tpu.core_type<tc>, window_params = [{transform_indices = @transform_0, window_bounds = array<i64: 16, 32>}, {transform_indices = @transform_1, window_bounds = array<i64: 16, 32>}, {transform_indices = @transform_2, window_bounds = array<i64: 16, 32>}, {transform_indices = @transform_3, window_bounds = array<i64: 32, 128>}, {transform_indices = @transform_4, window_bounds = array<i64: 128, 32>}, {transform_indices = @transform_5, window_bounds = array<i64: 16, 32>}]} {
    %c0_i32 = arith.constant 0 : i32
    %0 = arith.cmpi eq, %arg1, %c0_i32 : i32
    %1 = arith.extui %0 : i1 to i32
    %c0_i32_0 = arith.constant 0 : i32
    %2 = arith.cmpi ne, %1, %c0_i32_0 : i32
    scf.if %2 {
      %cst_14 = arith.constant 0.000000e+00 : f32
      %18 = vector.broadcast %cst_14 : f32 to vector<16x32xf32>
      %c0_15 = arith.constant 0 : index
      %c0_16 = arith.constant 0 : index
      %19 = vector.load %arg8[%c0_15, %c0_16] : memref<16x32xf32, #tpu.memory_space<vmem>>, vector<16x32xf32>
      tpu.vector_store %arg8[%c0_15, %c0_16], %18 {strides = array<i32>} : memref<16x32xf32, #tpu.memory_space<vmem>>, vector<16x32xf32>,
    } else {
    }
    %c0 = arith.constant 0 : index
    %c0_1 = arith.constant 0 : index
    %3 = vector.load %arg3[%c0, %c0_1] : memref<16x32xbf16, #tpu.memory_space<vmem>>, vector<16x32xbf16>
    %c0_2 = arith.constant 0 : index
    %c0_3 = arith.constant 0 : index
    %4 = vector.load %arg5[%c0_2, %c0_3] : memref<32x128xbf16, #tpu.memory_space<vmem>>, vector<32x128xbf16>
    %cst = arith.constant dense<0.000000e+00> : vector<16x128xf32>
    %5 = tpu.matmul %3, %4, %cst {dimension_numbers = #tpu.dot_dimension_numbers<[1], [0], [0], [1], [0, 0, 1, 1], [], []>} : vector<16x32xbf16>, vector<32x128xbf16>, vector<16x128xf32> -> vector<16x128xf32>
    %cst_4 = arith.constant 0.000000e+00 : f32
    %6 = vector.broadcast %cst_4 : f32 to vector<16x128xf32>
    %7 = arith.maximumf %5, %6 : vector<16x128xf32>
    %8 = arith.mulf %7, %7 : vector<16x128xf32>
    %9 = arith.truncf %8 : vector<16x128xf32> to vector<16x128xbf16>
    %c0_5 = arith.constant 0 : index
    %c0_6 = arith.constant 0 : index
    %10 = vector.load %arg8[%c0_5, %c0_6] : memref<16x32xf32, #tpu.memory_space<vmem>>, vector<16x32xf32>
    %c0_7 = arith.constant 0 : index
    %c0_8 = arith.constant 0 : index
    %11 = vector.load %arg6[%c0_7, %c0_8] : memref<128x32xbf16, #tpu.memory_space<vmem>>, vector<128x32xbf16>
    %cst_9 = arith.constant dense<0.000000e+00> : vector<16x32xf32>
    %12 = tpu.matmul %9, %11, %cst_9 {dimension_numbers = #tpu.dot_dimension_numbers<[1], [0], [0], [1], [0, 0, 1, 1], [], []>} : vector<16x128xbf16>, vector<128x32xbf16>, vector<16x32xf32> -> vector<16x32xf32>
    %13 = arith.addf %10, %12 : vector<16x32xf32>
    %c0_10 = arith.constant 0 : index
    %c0_11 = arith.constant 0 : index
    %14 = vector.load %arg8[%c0_10, %c0_11] : memref<16x32xf32, #tpu.memory_space<vmem>>, vector<16x32xf32>
    tpu.vector_store %arg8[%c0_10, %c0_11], %13 {strides = array<i32>} : memref<16x32xf32, #tpu.memory_space<vmem>>, vector<16x32xf32>,
    %c0_i32_12 = arith.constant 0 : i32
    %15 = arith.cmpi eq, %arg1, %c0_i32_12 : i32
    %16 = arith.extui %15 : i1 to i32
    %c0_i32_13 = arith.constant 0 : i32
    %17 = arith.cmpi ne, %16, %c0_i32_13 : i32
    scf.if %17 {
      %c0_14 = arith.constant 0 : index
      %c0_15 = arith.constant 0 : index
      %18 = vector.load %arg2[%c0_14, %c0_15] : memref<16x32xbf16, #tpu.memory_space<vmem>>, vector<16x32xbf16>
      %19 = arith.extf %18 : vector<16x32xbf16> to vector<16x32xf32>
      %c0_16 = arith.constant 0 : index
      %c0_17 = arith.constant 0 : index
      %20 = vector.load %arg4[%c0_16, %c0_17] : memref<16x32xbf16, #tpu.memory_space<vmem>>, vector<16x32xbf16>
      %21 = arith.extf %20 : vector<16x32xbf16> to vector<16x32xf32>
      %c0_18 = arith.constant 0 : index
      %c0_19 = arith.constant 0 : index
      %22 = vector.load %arg8[%c0_18, %c0_19] : memref<16x32xf32, #tpu.memory_space<vmem>>, vector<16x32xf32>
      %23 = arith.mulf %21, %22 : vector<16x32xf32>
      %24 = arith.addf %19, %23 : vector<16x32xf32>
      %25 = arith.truncf %24 : vector<16x32xf32> to vector<16x32xbf16>
      %c0_20 = arith.constant 0 : index
      %c0_21 = arith.constant 0 : index
      %26 = vector.load %arg7[%c0_20, %c0_21] : memref<16x32xbf16, #tpu.memory_space<vmem>>, vector<16x32xbf16>
      tpu.vector_store %arg7[%c0_20, %c0_21], %25 {strides = array<i32>} : memref<16x32xbf16, #tpu.memory_space<vmem>>, vector<16x32xbf16>,
    } else {
    }
    return
  }
  func.func @transform_0(%arg0: i32, %arg1: i32) -> (i32, i32) {
    %c0_i32 = arith.constant 0 : i32
    %c0_i32_0 = arith.constant 0 : i32
    return %arg0, %c0_i32 : i32, i32
  }
  func.func @transform_1(%arg0: i32, %arg1: i32) -> (i32, i32) {
    %c0_i32 = arith.constant 0 : i32
    %c0_i32_0 = arith.constant 0 : i32
    return %arg0, %c0_i32 : i32, i32
  }
  func.func @transform_2(%arg0: i32, %arg1: i32) -> (i32, i32) {
    %c0_i32 = arith.constant 0 : i32
    %c0_i32_0 = arith.constant 0 : i32
    return %arg0, %c0_i32 : i32, i32
  }
  func.func @transform_3(%arg0: i32, %arg1: i32) -> (i32, i32) {
    %c0_i32 = arith.constant 0 : i32
    %c0_i32_0 = arith.constant 0 : i32
    return %c0_i32, %arg1 : i32, i32
  }
  func.func @transform_4(%arg0: i32, %arg1: i32) -> (i32, i32) {
    %c0_i32 = arith.constant 0 : i32
    %c0_i32_0 = arith.constant 0 : i32
    return %arg1, %c0_i32 : i32, i32
  }
  func.func @transform_5(%arg0: i32, %arg1: i32) -> (i32, i32) {
    %c0_i32 = arith.constant 0 : i32
    %c0_i32_0 = arith.constant 0 : i32
    return %arg0, %c0_i32 : i32, i32
  }
}

module attributes {stable_mosaic.version = 11 : i64} {
  func.func @ffn_pre_kernel(%arg0: i32, %arg1: memref<1x8x32xbf16, #tpu.memory_space<vmem>>, %arg2: memref<1x32xf32, #tpu.memory_space<vmem>>, %arg3: memref<1x32xf32, #tpu.memory_space<vmem>>, %arg4: memref<1x32xf32, #tpu.memory_space<vmem>>, %arg5: memref<1x32xf32, #tpu.memory_space<vmem>>, %arg6: memref<1x8x32xbf16, #tpu.memory_space<vmem>>, %arg7: memref<1x8x32xbf16, #tpu.memory_space<vmem>>) attributes {dimension_semantics = [#tpu.dimension_semantics<parallel>], iteration_bounds = array<i64: 2>, scalar_prefetch = 0 : i64, scratch_operands = 0 : i64, tpu.core_type = #tpu.core_type<tc>, window_params = [{transform_indices = @transform_0, window_bounds = array<i64: 1, 8, 32>}, {pipeline_mode = #tpu.pipeline_mode<synchronous>, transform_indices = @transform_1, window_bounds = array<i64: 1, 32>}, {pipeline_mode = #tpu.pipeline_mode<synchronous>, transform_indices = @transform_2, window_bounds = array<i64: 1, 32>}, {pipeline_mode = #tpu.pipeline_mode<synchronous>, transform_indices = @transform_3, window_bounds = array<i64: 1, 32>}, {pipeline_mode = #tpu.pipeline_mode<synchronous>, transform_indices = @transform_4, window_bounds = array<i64: 1, 32>}, {transform_indices = @transform_5, window_bounds = array<i64: 1, 8, 32>}, {transform_indices = @transform_6, window_bounds = array<i64: 1, 8, 32>}]} {
    %c0 = arith.constant 0 : index
    %c0_0 = arith.constant 0 : index
    %c0_1 = arith.constant 0 : index
    %0 = vector.load %arg1[%c0, %c0_0, %c0_1] : memref<1x8x32xbf16, #tpu.memory_space<vmem>>, vector<1x8x32xbf16>
    %1 = vector.shape_cast %0 : vector<1x8x32xbf16> to vector<8x32xbf16>
    %2 = arith.extf %1 : vector<8x32xbf16> to vector<8x32xf32>
    %c0_2 = arith.constant 0 : index
    %c0_3 = arith.constant 0 : index
    %3 = vector.load %arg2[%c0_2, %c0_3] : memref<1x32xf32, #tpu.memory_space<vmem>>, vector<1x32xf32>
    %c0_4 = arith.constant 0 : index
    %c0_5 = arith.constant 0 : index
    %4 = vector.load %arg3[%c0_4, %c0_5] : memref<1x32xf32, #tpu.memory_space<vmem>>, vector<1x32xf32>
    %cst = arith.constant dense<0.000000e+00> : vector<8xf32>
    %5 = vector.multi_reduction <add>, %2, %cst [1] : vector<8x32xf32> to vector<8xf32>
    %6 = vector.shape_cast %5 : vector<8xf32> to vector<8x1xf32>
    %cst_6 = arith.constant 3.200000e+01 : f32
    %7 = vector.broadcast %cst_6 : f32 to vector<8x1xf32>
    %8 = arith.divf %6, %7 : vector<8x1xf32>
    %9 = vector.broadcast %8 : vector<8x1xf32> to vector<8x32xf32>
    %10 = arith.subf %2, %9 : vector<8x32xf32>
    %11 = arith.mulf %10, %10 : vector<8x32xf32>
    %cst_7 = arith.constant dense<0.000000e+00> : vector<8xf32>
    %12 = vector.multi_reduction <add>, %11, %cst_7 [1] : vector<8x32xf32> to vector<8xf32>
    %13 = vector.shape_cast %12 : vector<8xf32> to vector<8x1xf32>
    %cst_8 = arith.constant 3.200000e+01 : f32
    %14 = vector.broadcast %cst_8 : f32 to vector<8x1xf32>
    %15 = arith.divf %13, %14 : vector<8x1xf32>
    %cst_9 = arith.constant 9.99999974E-6 : f32
    %16 = vector.broadcast %cst_9 : f32 to vector<8x1xf32>
    %17 = arith.addf %15, %16 : vector<8x1xf32>
    %18 = math.rsqrt %17 : vector<8x1xf32>
    %19 = vector.broadcast %18 : vector<8x1xf32> to vector<8x32xf32>
    %20 = arith.mulf %10, %19 : vector<8x32xf32>
    %21 = vector.broadcast %3 : vector<1x32xf32> to vector<8x32xf32>
    %22 = arith.mulf %20, %21 : vector<8x32xf32>
    %23 = vector.broadcast %4 : vector<1x32xf32> to vector<8x32xf32>
    %24 = arith.addf %22, %23 : vector<8x32xf32>
    %c1_i32 = arith.constant 1 : i32
    %25 = tpu.dynamic_rotate %24 by %c1_i32 dim 0 : vector<8x32xf32>, i32 -> vector<8x32xf32>
    %26 = tpu.iota {dimensions = array<i32: 0>} : vector<8x32xi32>
    %c0_i32 = arith.constant 0 : i32
    %27 = vector.broadcast %c0_i32 : i32 to vector<8x32xi32>
    %28 = arith.cmpi eq, %26, %27 : vector<8x32xi32>
    %cst_10 = arith.constant 0.000000e+00 : f32
    %29 = vector.broadcast %cst_10 : f32 to vector<8x32xf32>
    %30 = arith.select %28, %29, %25 : vector<8x32xi1>, vector<8x32xf32>
    %c0_11 = arith.constant 0 : index
    %c0_12 = arith.constant 0 : index
    %31 = vector.load %arg4[%c0_11, %c0_12] : memref<1x32xf32, #tpu.memory_space<vmem>>, vector<1x32xf32>
    %c0_13 = arith.constant 0 : index
    %c0_14 = arith.constant 0 : index
    %32 = vector.load %arg5[%c0_13, %c0_14] : memref<1x32xf32, #tpu.memory_space<vmem>>, vector<1x32xf32>
    %33 = vector.broadcast %31 : vector<1x32xf32> to vector<8x32xf32>
    %34 = arith.mulf %24, %33 : vector<8x32xf32>
    %cst_15 = arith.constant 1.000000e+00 : f32
    %35 = vector.broadcast %cst_15 : f32 to vector<1x32xf32>
    %36 = arith.subf %35, %31 : vector<1x32xf32>
    %37 = vector.broadcast %36 : vector<1x32xf32> to vector<8x32xf32>
    %38 = arith.mulf %30, %37 : vector<8x32xf32>
    %39 = arith.addf %34, %38 : vector<8x32xf32>
    %40 = arith.truncf %39 : vector<8x32xf32> to vector<8x32xbf16>
    %c0_16 = arith.constant 0 : index
    %c0_17 = arith.constant 0 : index
    %c0_18 = arith.constant 0 : index
    %41 = vector.load %arg6[%c0_16, %c0_17, %c0_18] : memref<1x8x32xbf16, #tpu.memory_space<vmem>>, vector<1x8x32xbf16>
    %42 = vector.shape_cast %41 : vector<1x8x32xbf16> to vector<8x32xbf16>
    %43 = vector.shape_cast %40 : vector<8x32xbf16> to vector<1x8x32xbf16>
    tpu.vector_store %arg6[%c0_16, %c0_17, %c0_18], %43 {strides = array<i32>} : memref<1x8x32xbf16, #tpu.memory_space<vmem>>, vector<1x8x32xbf16>,
    %44 = vector.broadcast %32 : vector<1x32xf32> to vector<8x32xf32>
    %45 = arith.mulf %24, %44 : vector<8x32xf32>
    %cst_19 = arith.constant 1.000000e+00 : f32
    %46 = vector.broadcast %cst_19 : f32 to vector<1x32xf32>
    %47 = arith.subf %46, %32 : vector<1x32xf32>
    %48 = vector.broadcast %47 : vector<1x32xf32> to vector<8x32xf32>
    %49 = arith.mulf %30, %48 : vector<8x32xf32>
    %50 = arith.addf %45, %49 : vector<8x32xf32>
    %51 = arith.truncf %50 : vector<8x32xf32> to vector<8x32xbf16>
    %c0_20 = arith.constant 0 : index
    %c0_21 = arith.constant 0 : index
    %c0_22 = arith.constant 0 : index
    %52 = vector.load %arg7[%c0_20, %c0_21, %c0_22] : memref<1x8x32xbf16, #tpu.memory_space<vmem>>, vector<1x8x32xbf16>
    %53 = vector.shape_cast %52 : vector<1x8x32xbf16> to vector<8x32xbf16>
    %54 = vector.shape_cast %51 : vector<8x32xbf16> to vector<1x8x32xbf16>
    tpu.vector_store %arg7[%c0_20, %c0_21, %c0_22], %54 {strides = array<i32>} : memref<1x8x32xbf16, #tpu.memory_space<vmem>>, vector<1x8x32xbf16>,
    return
  }
  func.func @transform_0(%arg0: i32) -> (i32, i32, i32) {
    %c0_i32 = arith.constant 0 : i32
    %c0_i32_0 = arith.constant 0 : i32
    %c0_i32_1 = arith.constant 0 : i32
    return %arg0, %c0_i32, %c0_i32_0 : i32, i32, i32
  }
  func.func @transform_1(%arg0: i32) -> (i32, i32) {
    %c0_i32 = arith.constant 0 : i32
    %c0_i32_0 = arith.constant 0 : i32
    %c0_i32_1 = arith.constant 0 : i32
    return %c0_i32, %c0_i32_0 : i32, i32
  }
  func.func @transform_2(%arg0: i32) -> (i32, i32) {
    %c0_i32 = arith.constant 0 : i32
    %c0_i32_0 = arith.constant 0 : i32
    %c0_i32_1 = arith.constant 0 : i32
    return %c0_i32, %c0_i32_0 : i32, i32
  }
  func.func @transform_3(%arg0: i32) -> (i32, i32) {
    %c0_i32 = arith.constant 0 : i32
    %c0_i32_0 = arith.constant 0 : i32
    %c0_i32_1 = arith.constant 0 : i32
    return %c0_i32, %c0_i32_0 : i32, i32
  }
  func.func @transform_4(%arg0: i32) -> (i32, i32) {
    %c0_i32 = arith.constant 0 : i32
    %c0_i32_0 = arith.constant 0 : i32
    %c0_i32_1 = arith.constant 0 : i32
    return %c0_i32, %c0_i32_0 : i32, i32
  }
  func.func @transform_5(%arg0: i32) -> (i32, i32, i32) {
    %c0_i32 = arith.constant 0 : i32
    %c0_i32_0 = arith.constant 0 : i32
    %c0_i32_1 = arith.constant 0 : i32
    return %arg0, %c0_i32, %c0_i32_0 : i32, i32, i32
  }
  func.func @transform_6(%arg0: i32) -> (i32, i32, i32) {
    %c0_i32 = arith.constant 0 : i32
    %c0_i32_0 = arith.constant 0 : i32
    %c0_i32_1 = arith.constant 0 : i32
    return %arg0, %c0_i32, %c0_i32_0 : i32, i32, i32
  }
}

module attributes {stable_mosaic.version = 11 : i64} {
  func.func @head_kernel(%arg0: i32, %arg1: i32, %arg2: memref<16x32xbf16, #tpu.memory_space<vmem>>, %arg3: memref<1x32xf32, #tpu.memory_space<vmem>>, %arg4: memref<1x32xf32, #tpu.memory_space<vmem>>, %arg5: memref<32x64xbf16, #tpu.memory_space<vmem>>, %arg6: memref<16x64xf32, #tpu.memory_space<vmem>>) attributes {dimension_semantics = [#tpu.dimension_semantics<parallel>, #tpu.dimension_semantics<parallel>], iteration_bounds = array<i64: 1, 1>, scalar_prefetch = 0 : i64, scratch_operands = 0 : i64, tpu.core_type = #tpu.core_type<tc>, window_params = [{transform_indices = @transform_0, window_bounds = array<i64: 16, 32>}, {pipeline_mode = #tpu.pipeline_mode<synchronous>, transform_indices = @transform_1, window_bounds = array<i64: 1, 32>}, {pipeline_mode = #tpu.pipeline_mode<synchronous>, transform_indices = @transform_2, window_bounds = array<i64: 1, 32>}, {transform_indices = @transform_3, window_bounds = array<i64: 32, 64>}, {transform_indices = @transform_4, window_bounds = array<i64: 16, 64>}]} {
    %c0 = arith.constant 0 : index
    %c0_0 = arith.constant 0 : index
    %0 = vector.load %arg2[%c0, %c0_0] : memref<16x32xbf16, #tpu.memory_space<vmem>>, vector<16x32xbf16>
    %1 = arith.extf %0 : vector<16x32xbf16> to vector<16x32xf32>
    %c0_1 = arith.constant 0 : index
    %c0_2 = arith.constant 0 : index
    %2 = vector.load %arg3[%c0_1, %c0_2] : memref<1x32xf32, #tpu.memory_space<vmem>>, vector<1x32xf32>
    %c0_3 = arith.constant 0 : index
    %c0_4 = arith.constant 0 : index
    %3 = vector.load %arg4[%c0_3, %c0_4] : memref<1x32xf32, #tpu.memory_space<vmem>>, vector<1x32xf32>
    %cst = arith.constant dense<0.000000e+00> : vector<16xf32>
    %4 = vector.multi_reduction <add>, %1, %cst [1] : vector<16x32xf32> to vector<16xf32>
    %5 = vector.shape_cast %4 : vector<16xf32> to vector<16x1xf32>
    %cst_5 = arith.constant 3.200000e+01 : f32
    %6 = vector.broadcast %cst_5 : f32 to vector<16x1xf32>
    %7 = arith.divf %5, %6 : vector<16x1xf32>
    %8 = vector.broadcast %7 : vector<16x1xf32> to vector<16x32xf32>
    %9 = arith.subf %1, %8 : vector<16x32xf32>
    %10 = arith.mulf %9, %9 : vector<16x32xf32>
    %cst_6 = arith.constant dense<0.000000e+00> : vector<16xf32>
    %11 = vector.multi_reduction <add>, %10, %cst_6 [1] : vector<16x32xf32> to vector<16xf32>
    %12 = vector.shape_cast %11 : vector<16xf32> to vector<16x1xf32>
    %cst_7 = arith.constant 3.200000e+01 : f32
    %13 = vector.broadcast %cst_7 : f32 to vector<16x1xf32>
    %14 = arith.divf %12, %13 : vector<16x1xf32>
    %cst_8 = arith.constant 9.99999974E-6 : f32
    %15 = vector.broadcast %cst_8 : f32 to vector<16x1xf32>
    %16 = arith.addf %14, %15 : vector<16x1xf32>
    %17 = math.rsqrt %16 : vector<16x1xf32>
    %18 = vector.broadcast %17 : vector<16x1xf32> to vector<16x32xf32>
    %19 = arith.mulf %9, %18 : vector<16x32xf32>
    %20 = vector.broadcast %2 : vector<1x32xf32> to vector<16x32xf32>
    %21 = arith.mulf %19, %20 : vector<16x32xf32>
    %22 = vector.broadcast %3 : vector<1x32xf32> to vector<16x32xf32>
    %23 = arith.addf %21, %22 : vector<16x32xf32>
    %24 = arith.truncf %23 : vector<16x32xf32> to vector<16x32xbf16>
    %c0_9 = arith.constant 0 : index
    %c0_10 = arith.constant 0 : index
    %25 = vector.load %arg5[%c0_9, %c0_10] : memref<32x64xbf16, #tpu.memory_space<vmem>>, vector<32x64xbf16>
    %cst_11 = arith.constant dense<0.000000e+00> : vector<16x64xf32>
    %26 = tpu.matmul %24, %25, %cst_11 {dimension_numbers = #tpu.dot_dimension_numbers<[1], [0], [0], [1], [0, 0, 1, 1], [], []>} : vector<16x32xbf16>, vector<32x64xbf16>, vector<16x64xf32> -> vector<16x64xf32>
    %c0_12 = arith.constant 0 : index
    %c0_13 = arith.constant 0 : index
    %27 = vector.load %arg6[%c0_12, %c0_13] : memref<16x64xf32, #tpu.memory_space<vmem>>, vector<16x64xf32>
    tpu.vector_store %arg6[%c0_12, %c0_13], %26 {strides = array<i32>} : memref<16x64xf32, #tpu.memory_space<vmem>>, vector<16x64xf32>,
    return
  }
  func.func @transform_0(%arg0: i32, %arg1: i32) -> (i32, i32) {
    %c0_i32 = arith.constant 0 : i32
    %c0_i32_0 = arith.constant 0 : i32
    return %arg0, %c0_i32 : i32, i32
  }
  func.func @transform_1(%arg0: i32, %arg1: i32) -> (i32, i32) {
    %c0_i32 = arith.constant 0 : i32
    %c0_i32_0 = arith.constant 0 : i32
    %c0_i32_1 = arith.constant 0 : i32
    return %c0_i32, %c0_i32_0 : i32, i32
  }
  func.func @transform_2(%arg0: i32, %arg1: i32) -> (i32, i32) {
    %c0_i32 = arith.constant 0 : i32
    %c0_i32_0 = arith.constant 0 : i32
    %c0_i32_1 = arith.constant 0 : i32
    return %c0_i32, %c0_i32_0 : i32, i32
  }
  func.func @transform_3(%arg0: i32, %arg1: i32) -> (i32, i32) {
    %c0_i32 = arith.constant 0 : i32
    %c0_i32_0 = arith.constant 0 : i32
    return %c0_i32, %arg1 : i32, i32
  }
  func.func @transform_4(%arg0: i32, %arg1: i32) -> (i32, i32) {
    %c0_i32 = arith.constant 0 : i32
    return %arg0, %arg1 : i32, i32
  }
}

</mosaic_0001>

<bundles_post_ra>
// kernel: rwkv_forward.17
= control target key start
LH: loop header
LB: loop body
LE: loop exit
PB: predicated region body
PF: predicated region fallthrough
CT: control target
= control target key end

     0   :  { %vm19_vm0 = vcmask 261120   ;;  %v150_v0 = vmov 0.0   ;;  %vm151_vm1 = vmmov 0   ;;  %vm115_vm2 = vcmask 257024   ;;  %s195_s1 = inlined_call_operand.vmem [shape: bf16[32,32], index: 1, kind: input, shape index: {}]   ;;  %s196_s0 = inlined_call_operand.vmem [shape: bf16[16,32], index: 0, kind: input, shape index: {}]   ;;  %s197_s2 = inlined_call_operand.vmem [shape: bf16[16,32], index: 2, kind: input, shape index: {}]   ;;  %s198_s3 = inlined_call_operand.vmem [shape: bf16[16,32], index: 3, kind: output, shape index: {}]  }
   0x1   :  { %137 = vmatprep.subr.bf16.mxu0 %v150_v0  ;;  %v147_v1 = vld [vmem:[%s195_s1 + $0x8] sm:$0xff]   ;;  %141 = vmatprep.mubr.msk.bf16.mxu0 %vm151_vm1, %v150_v0  ;;  %20 = vst.msk [vmem:[#allocation2] sm:$0xff] %vm19_vm0, %v150_v0  ;;  %21 = vst.msk [vmem:[#allocation2 + $0x8] sm:$0xff] %vm19_vm0, %v150_v0  ;;  %v148_v2 = vld [vmem:[%s195_s1] sm:$0xff]  }
   0x2   :  { %138 = vmatpush3.bf16.msra.mxu0 %v147_v1  ;;  %v149_v3 = vld [vmem:[%s196_s0] sm:$0xff]  }
   0x3   :  { %139 = vmatprep.subr.bf16.mxu0 %v150_v0  ;;  %v131_v9 = vld [vmem:[%s197_s2] sm:$0xff]  }
   0x4   :  { %v132_v13 = vunpack.c.l.bf16 %v131_v9  ;;  %v133_v16 = vunpack.c.h.bf16 %v131_v9 }
   0x6   :  { %140 = vmatpush3.bf16.msra.mxu0 %v148_v2 }
   0x8   :  { %v22_v4 = vld [vmem:[#allocation2] sm:$0xff]  ;;  %v23_v8 = vld [vmem:[#allocation2 + $0x8] sm:$0xff] }
   0x9   :  { %142 = vmatmul.mubr.msk.bf16.vlgmr.msra.gmra.mxu0 %vm19_vm0, %v149_v3 }
  0xc9   :  { %v85_v5 = vpop.f32.mrf.mxu0 }
  0xca   :  { %v92_v6 = vadd.f32 %v85_v5, %v22_v4 }
  0xcb   :  { %v143_v7 = vpop.f32.mrf.mxu0 }
  0xcc   :  { %94 = vst.msk [vmem:[#allocation2] sm:$0xff] %vm19_vm0, %v92_v6 }
  0xcd   :  { %v88_v10 = vpop.f32.mrf.mxu0 }
  0xce   :  { %v93_v11 = vadd.f32 %v88_v10, %v23_v8 }
  0xcf   :  { %v144_v12 = vpop.f32.mrf.mxu0 }
  0xd0   :  { %95 = vst.msk [vmem:[#allocation2 + $0x8] sm:$0xff] %vm19_vm0, %v93_v11 }
  0xd3   :  { %v103_v14 = vld [vmem:[#allocation2] sm:$0xff] }
  0xd4   :  { %v105_v15 = vadd.f32 %v132_v13, %v103_v14 }
  0xd6   :  { %v128_v17 = vpack.c.bf16 %v105_v15, %v105_v15 }
  0xd7   :  { %v104_v18 = vld [vmem:[#allocation2 + $0x8] sm:$0xff] }
  0xd8   :  { %116 = vst.msk [vmem:[%s198_s3] sm:$0xf] %vm115_vm2, %v128_v17  ;;  %v106_v19 = vadd.f32 %v133_v16, %v104_v18 }
  0xda   :  { %v129_v20 = vpack.c.bf16 %v106_v19, %v106_v19 }
  0xdc   :  { %117 = vst.msk [vmem:[%s198_s3 + $0x4] sm:$0xf] %vm115_vm2, %v129_v20 }

// kernel: rwkv_forward.14
= control target key start
LH: loop header
LB: loop body
LE: loop exit
PB: predicated region body
PF: predicated region fallthrough
CT: control target
= control target key end

     0   :  { %vm18_vm0 = vcmask 261120   ;;  %vm70_vm1 = vcmask 257024   ;;  %s129_s0 = inlined_call_operand.vmem [shape: f32[16,32], index: 0, kind: input, shape index: {}]   ;;  %s130_s1 = inlined_call_operand.vmem [shape: f32[1,32], index: 1, kind: input, shape index: {}]   ;;  %s131_s2 = inlined_call_operand.vmem [shape: f32[1,32], index: 2, kind: input, shape index: {}]   ;;  %s132_s3 = inlined_call_operand.vmem [shape: bf16[16,32], index: 3, kind: output, shape index: {}]  }
   0x1   :  { %v14_v0 = vld [vmem:[%s129_s0] sm:$0xff]  ;;  %v15_v1 = vld [vmem:[%s129_s0 + $0x8] sm:$0xff] }
   0x2   :  { %v19_v2 = vsel %vm18_vm0, %v14_v0, 0.0  ;;  %v22_v3 = vsel %vm18_vm0, %v15_v1, 0.0  ;;  %v77_v21 = vld [vmem:[%s130_s1] ss:$0 sm:$0xff] }
   0x3   :  { %20 = vadd.xlane.f32.xlu0 %v19_v2  ;;  %v78_v23 = vld [vmem:[%s131_s2] ss:$0 sm:$0xff] }
   0x7   :  { %23 = vadd.xlane.f32.xlu0 %v22_v3 }
  0x8c   :  { %v21_v4 = vpop.xlane.xlu0 %20 }
  0x8d   :  { %v26_v5 = vmul.f32 0.03125, %v21_v4 }
  0x8f   :  { %v28_v6 = vsub.f32 %v14_v0, %v26_v5 }
  0x90   :  { %v24_v7 = vpop.xlane.xlu0 %23 }
  0x91   :  { %v27_v8 = vmul.f32 0.03125, %v24_v7  ;;  %v30_v9 = vmul.f32 %v28_v6, %v28_v6 }
  0x93   :  { %v29_v10 = vsub.f32 %v15_v1, %v27_v8  ;;  %v32_v11 = vsel %vm18_vm0, %v30_v9, 0.0 }
  0x94   :  { %33 = vadd.xlane.f32.xlu1 %v32_v11 }
  0x95   :  { %v31_v12 = vmul.f32 %v29_v10, %v29_v10 }
  0x97   :  { %v35_v13 = vsel %vm18_vm0, %v31_v12, 0.0 }
  0x98   :  { %36 = vadd.xlane.f32.xlu1 %v35_v13 }
 0x11d   :  { %v34_v14 = vpop.xlane.xlu1 %33 }
 0x11e   :  { %v38_v15 = vmul.f32 0.03125, %v34_v14 }
 0x120   :  { %v40_v16 = vadd.f32 1e-05, %v38_v15 }
 0x121   :  { %v37_v17 = vpop.xlane.xlu1 %36 }
 0x122   :  { %83 = vrsqrt.f32 %v40_v16  ;;  %v39_v18 = vmul.f32 0.03125, %v37_v17 }
 0x124   :  { %v41_v19 = vadd.f32 1e-05, %v39_v18 }
 0x126   :  { %85 = vrsqrt.f32 %v41_v19 }
 0x12f   :  { %v84_v20 = vpop.eup %83 }
 0x130   :  { %v44_v22 = vmul.f32 %v84_v20, %v28_v6 }
 0x132   :  { %v52_v24 = vmul.f32 %v77_v21, %v44_v22 }
 0x133   :  { %v86_v25 = vpop.eup %85 }
 0x134   :  { %v60_v26 = vadd.f32 %v78_v23, %v52_v24  ;;  %v45_v27 = vmul.f32 %v86_v25, %v29_v10 }
 0x136   :  { %v81_v28 = vpack.c.bf16 %v60_v26, %v60_v26  ;;  %v53_v29 = vmul.f32 %v77_v21, %v45_v27 }
 0x138   :  { %71 = vst.msk [vmem:[%s132_s3] sm:$0xf] %vm70_vm1, %v81_v28  ;;  %v61_v30 = vadd.f32 %v78_v23, %v53_v29 }
 0x13a   :  { %v82_v31 = vpack.c.bf16 %v61_v30, %v61_v30 }
 0x13c   :  { %72 = vst.msk [vmem:[%s132_s3 + $0x4] sm:$0xf] %vm70_vm1, %v82_v31 }

// kernel: rwkv_forward.15
= control target key start
LH: loop header
LB: loop body
LE: loop exit
PB: predicated region body
PF: predicated region fallthrough
CT: control target
= control target key end

     0   :  { %s1162_s17 = smov 0   ;;  %s1164_s18 = smov 0   ;;  %s1252_s0 = inlined_call_operand.vmem [shape: bf16[2,8,32], index: 0, kind: input, shape index: {}]   ;;  %s1253_s1 = inlined_call_operand.vmem [shape: f32[1,32], index: 1, kind: input, shape index: {}]   ;;  %s1254_s2 = inlined_call_operand.vmem [shape: f32[1,32], index: 2, kind: input, shape index: {}]   ;;  %s1255_s3 = inlined_call_operand.vmem [shape: f32[1,32], index: 3, kind: input, shape index: {}, may-alias: {3,4}]   ;;  %s1256_s4 = inlined_call_operand.vmem [shape: f32[1,32], index: 4, kind: input, shape index: {}, may-alias: {3,4}]   ;;  %s1257_s5 = inlined_call_operand.vmem [shape: f32[1,32], index: 5, kind: input, shape index: {}]   ;;  %s1258_s6 = inlined_call_operand.vmem [shape: bf16[32,32], index: 6, kind: input, shape index: {}]   ;;  %s1259_s7 = inlined_call_operand.vmem [shape: bf16[32,32], index: 7, kind: input, shape index: {}]   ;;  %s1260_s8 = inlined_call_operand.vmem [shape: bf16[32,32], index: 8, kind: input, shape index: {}]   ;;  %s1261_s9 = inlined_call_operand.vmem [shape: bf16[2,8,32], index: 9, kind: output, shape index: {0}]   ;;  %s1262_s10 = inlined_call_operand.vmem [shape: bf16[2,8,32], index: 10, kind: output, shape index: {1}]   ;;  %s1263_s11 = inlined_call_operand.vmem [shape: bf16[2,8,32], index: 11, kind: output, shape index: {2}]  }
   0x1   :  { %s1166_s19 = smov 0  }
   0x2 LB: > { %s34_s20 = sadd.s32 1, %s1094_s18  ;;  %p986_p0 = scmp.ge.s32.totalorder %s1098_s19, 1  ;;  %s1098_s19 = sphi %s1166_s19, %s22_s19   ;;  %s1094_s18 = sphi %s1164_s18, %s1265_s18   ;;  %s1090_s17 = sphi %s1162_s17, %s1264_s17  }
   0x3   : > { %p36_p1 = scmp.ge.s32.totalorder %s34_s20, 2  ;;  %p386_p2 = scmp.lt.s32.totalorder %s1098_s19, 3 }
   0x5   : > { %s1267_s20 = smov (%p36_p1, %s34_s20), 0  ;;  %p387_p3 = pnand %p986_p0, %p386_p2 }
   0x6   : > { %p453_p4 = scmp.lt.s32.totalorder (!%p387_p3), %s1090_s17, 1 }
   0x7   : > { %390 = sbr.rel (%p387_p3) target bundleno = 579 (0x243), region = 56 }
   0xc   : > { %s1269_s17 = smov (!%p453_p4, %s1090_s17), 1  ;;  %vm499_vm0 = vcmask 261120   ;;  %v1064_v8 = vld [vmem:[%s1258_s6 + $0x8] sm:$0xff]   ;;  %v1100_v10 = vmov 0.0   ;;  %v1066_v11 = vld [vmem:[%s1258_s6] sm:$0xff]   ;;  %vm1101_vm1 = vmmov 0   ;;  %v531_v19 = vlaneseq }
   0xd   : > { %s1180_s21 = sshll.u32 %s1269_s17, 2  ;;  %v1065_v9 = vld [vmem:[%s1259_s7 + $0x8] sm:$0xff]   ;;  %1014 = vmatprep.subr.bf16.mxu0 %v1100_v10  ;;  %1022 = vmatprep.subr.bf16.mxu1 %v1100_v10  ;;  %v1067_v12 = vld [vmem:[%s1259_s7] sm:$0xff]   ;;  %vm650_vm3 = vcmask 257024  }
   0xe   : > { %s456_s24 = scalar_lea.vmem %s1252_s0, %s1180_s21  ;;  %1015 = vmatpush3.bf16.msra.mxu0 %v1064_v8  ;;  %1023 = vmatpush3.bf16.msra.mxu1 %v1065_v9  ;;  %v991_v17 = vld [vmem:[%s1253_s1] ss:$0 sm:$0xff]  ;;  %v532_v23 = vshrl.u32 %v531_v19, 7  ;;  %v1068_v46 = vld [vmem:[%s1260_s8 + $0x8] sm:$0xff]   ;;  %s475_s15 = scalar_lea.vmem %s1261_s9, %s1180_s21 }
   0xf   : > { %v495_v0 = vld [vmem:[%s456_s24] sm:$0xf]  ;;  %1016 = vmatprep.subr.bf16.mxu0 %v1100_v10  ;;  %1024 = vmatprep.subr.bf16.mxu1 %v1100_v10  ;;  %s482_s22 = scalar_lea.vmem %s1262_s10, %s1180_s21  ;;  %s489_s25 = scalar_lea.vmem %s1263_s11, %s1180_s21 }
  0x10   : > { %v496_v1 = vunpack.c.l.bf16 %v495_v0  ;;  %1018 = vmatprep.mubr.msk.bf16.mxu0 %vm1101_vm1, %v1100_v10  ;;  %1026 = vmatprep.mubr.msk.bf16.mxu1 %vm1101_vm1, %v1100_v10  ;;  %v992_v20 = vld [vmem:[%s1254_s2] ss:$0 sm:$0xff]  ;;  %v541_v26 = vsub.s32 0, %v532_v23  ;;  %vm533_vm2 = vcmp.eq.s32.totalorder %v532_v23, 0 }
  0x11   : > { %v535_v24 = vld [vmem:[%s1255_s3] sm:$0x1] }
  0x12   : > { %v500_v2 = vsel %vm499_vm0, %v496_v1, 0.0  ;;  %1017 = vmatpush3.bf16.msra.mxu0 %v1066_v11  ;;  %1025 = vmatpush3.bf16.msra.mxu1 %v1067_v12  ;;  %v536_v25 = vld [vmem:[%s1256_s4] sm:$0x1]  ;;  %v545_v27 = vsub.f32 1.0, %v535_v24  ;;  %v542_v30 = vrot.slane %v535_v24, %v541_v26 }
  0x13   : > { %501 = vadd.xlane.f32.xlu0 %v500_v2  ;;  %1030 = vmatprep.subr.bf16.mxu0 %v1100_v10  ;;  %v562_v28 = vsub.f32 1.0, %v536_v25  ;;  %v537_v29 = vld [vmem:[%s1257_s5] sm:$0x1]  ;;  %v559_v34 = vrot.slane %v536_v25, %v541_v26 }
  0x14   : > { %v579_v31 = vsub.f32 1.0, %v537_v29  ;;  %v550_v33 = vrot.slane %v545_v27, %v541_v26  ;;  %v576_v45 = vrot.slane %v537_v29, %v541_v26  ;;  %v1069_v51 = vld [vmem:[%s1260_s8] sm:$0xff]  }
  0x15   : > { %v567_v35 = vrot.slane %v562_v28, %v541_v26 }
  0x16   : > { %v584_v38 = vrot.slane %v579_v31, %v541_v26 }
  0x9c   : > { %v502_v3 = vpop.xlane.xlu0 %501 }
  0x9d   : > { %v504_v4 = vmul.f32 0.03125, %v502_v3 }
  0x9f   : > { %v505_v5 = vsub.f32 %v496_v1, %v504_v4 }
  0xa1   : > { %v506_v6 = vmul.f32 %v505_v5, %v505_v5 }
  0xa3   : > { %v507_v7 = vsel %vm499_vm0, %v506_v6, 0.0 }
  0xa4   : > { %508 = vadd.xlane.f32.xlu0 %v507_v7 }
 0x12d   : > { %v509_v13 = vpop.xlane.xlu0 %508 }
 0x12e   : > { %v510_v14 = vmul.f32 0.03125, %v509_v13 }
 0x130   : > { %v511_v15 = vadd.f32 1e-05, %v510_v14 }
 0x132   : > { %1070 = vrsqrt.f32 %v511_v15 }
 0x13f   : > { %v1071_v16 = vpop.eup %1070 }
 0x140   : > { %v513_v18 = vmul.f32 %v1071_v16, %v505_v5 }
 0x142   : > { %v520_v21 = vmul.f32 %v991_v17, %v513_v18 }
 0x144   : > { %v527_v22 = vadd.f32 %v992_v20, %v520_v21 }
 0x146   : > { %528 = vst.msk [vmem:[#allocation2] sm:$0xff] %vm499_vm0, %v527_v22 }
 0x14d   : > { %v529_v32 = vld [vmem:[#allocation2] sm:$0xff] }
 0x14e   : > { %v530_v36 = vrot.slane %v529_v32, 7  ;;  %v544_v39 = vmul.f32 %v542_v30, %v529_v32  ;;  %v561_v41 = vmul.f32 %v559_v34, %v529_v32  ;;  %v578_v50 = vmul.f32 %v576_v45, %v529_v32 }
 0x150   : > { %v534_v37 = vsel %vm533_vm2, 0.0, %v530_v36 }
 0x151   : > { %v552_v40 = vmul.f32 %v550_v33, %v534_v37  ;;  %v569_v42 = vmul.f32 %v567_v35, %v534_v37  ;;  %v586_v49 = vmul.f32 %v584_v38, %v534_v37 }
 0x153   : > { %v553_v43 = vadd.f32 %v552_v40, %v544_v39  ;;  %v570_v44 = vadd.f32 %v569_v42, %v561_v41  ;;  %v587_v52 = vadd.f32 %v586_v49, %v578_v50 }
 0x155   : > { %v554_v47 = vpack.c.bf16 %v553_v43, %v553_v43  ;;  %v571_v48 = vpack.c.bf16 %v570_v44, %v570_v44  ;;  %v588_v53 = vpack.c.bf16 %v587_v52, %v587_v52 }
 0x157   : > { %1019 = vmatmul.mubr.msk.bf16.vlgmr.msra.gmra.mxu0 %vm499_vm0, %v554_v47  ;;  %1027 = vmatmul.mubr.msk.bf16.vlgmr.msra.gmra.mxu1 %vm499_vm0, %v571_v48 }
 0x158   : > { %1031 = vmatpush3.bf16.msra.mxu0 %v1068_v46  ;;  %1034 = vmatprep.mubr.msk.bf16.mxu0 %vm1101_vm1, %v1100_v10 }
 0x159   : > { %1032 = vmatprep.subr.bf16.mxu0 %v1100_v10 }
 0x15c   : > { %1033 = vmatpush3.bf16.msra.mxu0 %v1069_v51 }
 0x15f   : > { %1035 = vmatmul.mubr.msk.bf16.vlgmr.msra.gmra.mxu0 %vm499_vm0, %v588_v53 }
 0x217   : > { %v643_v54 = vpop.f32.mrf.mxu0  ;;  %v705_v55 = vpop.f32.mrf.mxu1 }
 0x218   : > { %v649_v56 = vpack.c.bf16 %v643_v54, %v643_v54  ;;  %v711_v57 = vpack.c.bf16 %v705_v55, %v705_v55 }
 0x219   : > { %v1020_v58 = vpop.f32.mrf.mxu0  ;;  %v1028_v59 = vpop.f32.mrf.mxu1 }
 0x21a   : > { %651 = vst.msk [vmem:[%s475_s15] sm:$0xf] %vm650_vm3, %v649_v56  ;;  %712 = vst.msk [vmem:[%s482_s22] sm:$0xf] %vm650_vm3, %v711_v57 }
 0x21b   : > { %v646_v60 = vpop.f32.mrf.mxu0  ;;  %v708_v61 = vpop.f32.mrf.mxu1 }
 0x21d   : > { %v1021_v62 = vpop.f32.mrf.mxu0  ;;  %v1029_v63 = vpop.f32.mrf.mxu1 }
 0x21f   : > { %v766_v0 = vpop.f32.mrf.mxu0 }
 0x220   : > { %v1002_v1 = vmul.f32 -1.442695, %v766_v0 }
 0x221   : > { %v1036_v2 = vpop.f32.mrf.mxu0 }
 0x222   : > { %1072 = vpow2.f32 %v1002_v1 }
 0x223   : > { %v769_v3 = vpop.f32.mrf.mxu0 }
 0x225   : > { %v1037_v4 = vpop.f32.mrf.mxu0 }
 0x22f   : > { %v1073_v5 = vpop.eup %1072 }
 0x230   : > { %v775_v6 = vadd.f32 1.0, %v1073_v5 }
 0x232   : > { %1074 = vrcp.f32 %v775_v6 }
 0x23f   : > { %v1075_v7 = vpop.eup %1074 }
 0x240   : > { %v778_v8 = vpack.c.bf16 %v1075_v7, %v1075_v7 }
 0x242   : > { %779 = vst.msk [vmem:[%s489_s25] sm:$0xf] %vm650_vm3, %v778_v8 }
 0x243 PF: > { %s22_s19 = sadd.s32 1, %s1098_s19   ;;  %s1264_s17 = smov %s1094_s18 }
 0x244   : > { %p19_p5 = scmp.ge.s32.totalorder %s22_s19, 4   ;;  %s1265_s18 = smov %s1267_s20 }
 0x246   :  { %21 = sbr.rel (!%p19_p5) target bundleno = 2 (0x2), region = 123 }

// kernel: rwkv_forward.16
= control target key start
LH: loop header
LB: loop body
LE: loop exit
PB: predicated region body
PF: predicated region fallthrough
CT: control target
= control target key end

     0   :  { %s972_s18 = smov 0   ;;  %s974_s19 = smov 0   ;;  %s1287_s0 = inlined_call_operand.vmem [shape: f32[1,32], index: 0, kind: input, shape index: {}]   ;;  %s1288_s1 = inlined_call_operand.vmem [shape: f32[1,32], index: 1, kind: input, shape index: {}]   ;;  %s1289_s2 = inlined_call_operand.vmem [shape: bf16[2,8,1,32], index: 2, kind: input, shape index: {}]   ;;  %s1290_s3 = inlined_call_operand.vmem [shape: bf16[2,8,1,32], index: 3, kind: input, shape index: {}]   ;;  %s1291_s4 = inlined_call_operand.vmem [shape: bf16[2,8,1,32], index: 4, kind: input, shape index: {}]   ;;  %s1292_s5 = inlined_call_operand.vmem [shape: bf16[2,8,1,32], index: 5, kind: output, shape index: {}]  }
   0x1   :  { %s976_s20 = smov 0  }
   0x2 LB: > { %s27_s21 = sadd.s32 1, %s936_s19  ;;  %p839_p0 = scmp.ge.s32.totalorder %s940_s20, 1  ;;  %s940_s20 = sphi %s976_s20, %s15_s20   ;;  %s936_s19 = sphi %s974_s19, %s1298_s19   ;;  %s932_s18 = sphi %s972_s18, %s1297_s18  }
   0x3   : > { %p29_p1 = scmp.ge.s32.totalorder %s27_s21, 2  ;;  %p249_p2 = scmp.lt.s32.totalorder %s940_s20, 3 }
   0x5   : > { %s1300_s21 = smov (%p29_p1, %s27_s21), 0  ;;  %p250_p3 = pnand %p839_p0, %p249_p2 }
   0x6   : > { %p307_p4 = scmp.lt.s32.totalorder (!%p250_p3), %s932_s18, 1 }
   0x7   : > { %253 = sbr.rel (%p250_p3) target bundleno = 141 (0x8d), region = 40 }
   0xc   : > { %v335_v0 = vld [vmem:[%s1288_s1] sm:$0x1]  ;;  %s1302_s18 = smov (!%p307_p4, %s932_s18), 1  ;;  %vm405_vm4 = vcmask 253952   ;;  %vm678_vm13 = vsmask.f32 256 }
   0xd   : > { %v338_v1 = vld [vmem:[%s1287_s0] sm:$0x1]  ;;  %v336_v2 = vpack.c.bf16 %v335_v0, %v335_v0  ;;  %s996_s26 = sshll.u32 %s1302_s18, 3  ;;  %vm1217_vm14 = vmand %vm405_vm4, %vm678_vm13 }
   0xe   : > { %v339_v3 = vmul.f32 1.442695, %v338_v1  ;;  %s1002_s29 = scalar_lea.vmem %s1289_s2, %s996_s26  ;;  %s1031_s7 = scalar_lea.vmem %s1290_s3, %s996_s26 }
   0xf   : > { %v1004_v4 = vunpack.c.l.bf16 %v336_v2  ;;  %v342_v5 = vld [vmem:[%s1002_s29] sm:$0x1]  ;;  %v343_v10 = vld [vmem:[%s1002_s29 + $0x1] sm:$0x1]  ;;  %v344_v18 = vld [vmem:[%s1002_s29 + $0x2] sm:$0x1]  ;;  %s1136_s10 = scalar_lea.vmem %s1291_s4, %s996_s26  ;;  %s1199_s13 = scalar_lea.vmem %s1292_s5, %s996_s26 }
  0x10   : > { %870 = vpow2.f32 %v339_v3  ;;  %v350_v6 = vunpack.c.l.bf16 %v342_v5  ;;  %v351_v15 = vunpack.c.l.bf16 %v343_v10  ;;  %v352_v21 = vunpack.c.l.bf16 %v344_v18  ;;  %v345_v25 = vld [vmem:[%s1002_s29 + $0x3] sm:$0x1]  ;;  %v346_v32 = vld [vmem:[%s1002_s29 + $0x4] sm:$0x1]  ;;  %v358_v46 = vld [vmem:[%s1031_s7] sm:$0x1] }
  0x11   : > { %v353_v31 = vunpack.c.l.bf16 %v345_v25  ;;  %v354_v41 = vunpack.c.l.bf16 %v346_v32  ;;  %v1046_v49 = vld [vmem:[%s1031_s7 + $0x1] sm:$0x1]  ;;  %v347_v57 = vld [vmem:[%s1002_s29 + $0x5] sm:$0x1]  ;;  %v366_v58 = vunpack.c.l.bf16 %v358_v46  ;;  %v1061_v60 = vld [vmem:[%s1031_s7 + $0x2] sm:$0x1] }
  0x12   : > { %v390_v7 = vadd.f32 %v350_v6, %v1004_v4  ;;  %v421_v17 = vadd.f32 %v351_v15, %v1004_v4  ;;  %v454_v26 = vadd.f32 %v352_v21, %v1004_v4  ;;  %v367_v63 = vunpack.c.l.bf16 %v1046_v49  ;;  %v1065_v0 = vld [vmem:[%s1031_s7 + $0x3] sm:$0x1] }
  0x13   : > { %v487_v38 = vadd.f32 %v353_v31, %v1004_v4  ;;  %v520_v53 = vadd.f32 %v354_v41, %v1004_v4 }
  0x14   : > { %v391_v8 = vsub.f32 -1e+38, %v390_v7  ;;  %v1071_v7 = vunpack.c.l.bf16 %v347_v57 }
  0x16   : > { %v392_v9 = vand.u32 2147483647, %v391_v8  ;;  %vm1037_vm0 = vcmp.ge.f32.partialorder %v391_v8, 0.0  ;;  %v368_v8 = vunpack.c.l.bf16 %v1061_v60 }
  0x18   : > { %v393_v11 = vsub.f32 0.0, %v392_v9 }
  0x1a   : > { %v394_v13 = vmul.f32 1.442695, %v393_v11 }
  0x1c   : > { %872 = vpow2.f32 %v394_v13 }
  0x1d   : > { %v871_v12 = vpop.eup %870 }
  0x1e   : > { %v1009_v14 = vsub.f32 0.0, %v871_v12  ;;  %v369_v12 = vunpack.c.l.bf16 %v1065_v0 }
  0x20   : > { %v407_v16 = vadd.f32 -1e+38, %v1009_v14 }
  0x22   : > { %v1014_v19 = vsub.f32 %v407_v16, %v350_v6  ;;  %v420_v20 = vmax.f32 %v407_v16, %v350_v6 }
  0x24   : > { %v409_v22 = vand.u32 2147483647, %v1014_v19  ;;  %v1017_v23 = vsub.f32 %v420_v20, %v421_v17  ;;  %v439_v24 = vadd.f32 %v420_v20, %v1009_v14  ;;  %vm413_vm1 = vcmp.ge.f32.partialorder %v1014_v19, 0.0 }
  0x26   : > { %v410_v27 = vsub.f32 0.0, %v409_v22  ;;  %v423_v28 = vand.u32 2147483647, %v1017_v23  ;;  %v1023_v29 = vsub.f32 %v439_v24, %v351_v15  ;;  %v453_v30 = vmax.f32 %v439_v24, %v351_v15 }
  0x27   : > { %v553_v15 = vadd.f32 %v1071_v7, %v1004_v4  ;;  %vm427_vm2 = vcmp.ge.f32.partialorder %v1017_v23, 0.0 }
  0x28   : > { %v411_v33 = vmul.f32 1.442695, %v410_v27  ;;  %v424_v34 = vsub.f32 0.0, %v423_v28  ;;  %v441_v35 = vand.u32 2147483647, %v1023_v29  ;;  %v1033_v36 = vsub.f32 %v453_v30, %v454_v26 }
  0x29   : > { %v472_v37 = vadd.f32 %v453_v30, %v1009_v14  ;;  %v873_v48 = vpop.eup %872  ;;  %vm445_vm3 = vcmp.ge.f32.partialorder %v1023_v29, 0.0  ;;  %v348_v30 = vld [vmem:[%s1002_s29 + $0x6] sm:$0x1] }
  0x2a   : > { %874 = vpow2.f32 %v411_v33  ;;  %v425_v39 = vmul.f32 1.442695, %v424_v34  ;;  %v442_v40 = vsub.f32 0.0, %v441_v35  ;;  %v456_v43 = vand.u32 2147483647, %v1033_v36 }
  0x2b   : > { %v1042_v44 = vsub.f32 %v472_v37, %v352_v21  ;;  %v486_v45 = vmax.f32 %v472_v37, %v352_v21  ;;  %v397_v54 = vsel %vm1037_vm0, 1.0, %v873_v48  ;;  %v398_v55 = vsel %vm1037_vm0, %v873_v48, 1.0 }
  0x2c   : > { %876 = vpow2.f32 %v425_v39  ;;  %v443_v47 = vmul.f32 1.442695, %v442_v40  ;;  %v457_v50 = vsub.f32 0.0, %v456_v43  ;;  %v1058_v59 = vmul.f32 0.0, %v397_v54  ;;  %v349_v54 = vld [vmem:[%s1002_s29 + $0x7] sm:$0x1] }
  0x2d   : > { %v474_v51 = vand.u32 2147483647, %v1042_v44  ;;  %v1049_v52 = vsub.f32 %v486_v45, %v487_v38  ;;  %v505_v56 = vadd.f32 %v486_v45, %v1009_v14  ;;  %v400_v26 = vmul.f32 %v398_v55, %v366_v58 }
  0x2e   : > { %878 = vpow2.f32 %v443_v47  ;;  %v458_v61 = vmul.f32 1.442695, %v457_v50  ;;  %v402_v5 = vadd.f32 %v1058_v59, %v398_v55  ;;  %vm460_vm5 = vcmp.ge.f32.partialorder %v1033_v36, 0.0 }
  0x2f   : > { %v475_v62 = vsub.f32 0.0, %v474_v51  ;;  %v489_v1 = vand.u32 2147483647, %v1049_v52  ;;  %v1068_v2 = vsub.f32 %v505_v56, %v353_v31  ;;  %v519_v3 = vmax.f32 %v505_v56, %v353_v31 }
  0x30   : > { %880 = vpow2.f32 %v458_v61  ;;  %v1104_v42 = vunpack.c.l.bf16 %v348_v30  ;;  %v401_v55 = vadd.f32 %v400_v26, %v1058_v59  ;;  %vm478_vm6 = vcmp.ge.f32.partialorder %v1042_v44, 0.0 }
  0x31   : > { %v476_v6 = vmul.f32 1.442695, %v475_v62  ;;  %v490_v9 = vsub.f32 0.0, %v489_v1  ;;  %v507_v10 = vand.u32 2147483647, %v1068_v2  ;;  %v1075_v11 = vsub.f32 %v519_v3, %v520_v53 }
  0x32   : > { %882 = vrcp.f32 %v402_v5  ;;  %v538_v13 = vadd.f32 %v519_v3, %v1009_v14  ;;  %v1126_v5 = vld [vmem:[%s1031_s7 + $0x4] sm:$0x1]  ;;  %v357_v59 = vunpack.c.l.bf16 %v349_v54  ;;  %vm493_vm7 = vcmp.ge.f32.partialorder %v1049_v52, 0.0 }
  0x33   : > { %884 = vpow2.f32 %v476_v6  ;;  %v491_v16 = vmul.f32 1.442695, %v490_v9  ;;  %v508_v17 = vsub.f32 0.0, %v507_v10  ;;  %v522_v18 = vand.u32 2147483647, %v1075_v11 }
  0x34   : > { %v1084_v20 = vsub.f32 %v538_v13, %v354_v41  ;;  %v552_v21 = vmax.f32 %v538_v13, %v354_v41  ;;  %vm511_vm8 = vcmp.ge.f32.partialorder %v1068_v2, 0.0  ;;  %v586_v36 = vadd.f32 %v1104_v42, %v1004_v4 }
  0x35   : > { %886 = vpow2.f32 %v491_v16  ;;  %v509_v22 = vmul.f32 1.442695, %v508_v17  ;;  %v523_v24 = vsub.f32 0.0, %v522_v18  ;;  %vm526_vm9 = vcmp.ge.f32.partialorder %v1075_v11, 0.0 }
  0x36   : > { %v540_v27 = vand.u32 2147483647, %v1084_v20  ;;  %v1088_v28 = vsub.f32 %v552_v21, %v553_v15  ;;  %v1092_v31 = vadd.f32 %v552_v21, %v1009_v14  ;;  %vm544_vm10 = vcmp.ge.f32.partialorder %v1084_v20, 0.0 }
  0x37   : > { %v875_v25 = vpop.eup %874  ;;  %888 = vpow2.f32 %v509_v22  ;;  %v524_v34 = vmul.f32 1.442695, %v523_v24  ;;  %v370_v22 = vunpack.c.l.bf16 %v1126_v5 }
  0x38   : > { %v414_v32 = vsel %vm413_vm1, 1.0, %v875_v25  ;;  %v415_v33 = vsel %vm413_vm1, %v875_v25, 1.0  ;;  %v541_v39 = vsub.f32 0.0, %v540_v27  ;;  %v555_v40 = vand.u32 2147483647, %v1088_v28 }
  0x39   : > { %v877_v35 = vpop.eup %876  ;;  %v416_v37 = vmul.f32 0.0, %v414_v32  ;;  %v417_v38 = vmul.f32 %v415_v33, %v366_v58  ;;  %890 = vpow2.f32 %v524_v34  ;;  %v1114_v53 = vsub.f32 %v1092_v31, %v1071_v7 }
  0x3a   : > { %v1101_v41 = vsel %vm427_vm2, 1.0, %v877_v35  ;;  %v429_v46 = vsel %vm427_vm2, %v877_v35, 1.0  ;;  %v542_v47 = vmul.f32 1.442695, %v541_v39  ;;  %v556_v51 = vsub.f32 0.0, %v555_v40 }
  0x3b   : > { %v879_v19 = vpop.eup %878  ;;  %v418_v43 = vadd.f32 %v417_v38, %v416_v37  ;;  %v419_v45 = vadd.f32 %v416_v37, %v415_v33  ;;  %v573_v62 = vand.u32 2147483647, %v1114_v53  ;;  %v1146_v32 = vadd.f32 %v357_v59, %v1004_v4  ;;  %v1153_v39 = vld [vmem:[%s1136_s10] sm:$0x1] }
  0x3c   : > { %v446_v48 = vsel %vm445_vm3, 1.0, %v879_v19  ;;  %v447_v50 = vsel %vm445_vm3, %v879_v19, 1.0  ;;  %892 = vpow2.f32 %v542_v47  ;;  %v557_v29 = vmul.f32 1.442695, %v556_v51 }
  0x3d   : > { %v433_v56 = vmul.f32 %v1101_v41, %v419_v45  ;;  %v448_v23 = vmul.f32 %v446_v48, %v418_v43  ;;  %v449_v57 = vmul.f32 %v447_v50, %v367_v63  ;;  %v881_v58 = vpop.eup %880  ;;  %v451_v61 = vmul.f32 %v446_v48, %v419_v45 }
  0x3e   : > { %v461_v3 = vsel %vm460_vm5, 1.0, %v881_v58  ;;  %894 = vpow2.f32 %v557_v29  ;;  %v574_v10 = vsub.f32 0.0, %v573_v62  ;;  %v462_v17 = vsel %vm460_vm5, %v881_v58, 1.0 }
  0x3f   : > { %v434_v1 = vadd.f32 %v433_v56, %v429_v46  ;;  %v883_v6 = vpop.eup %882  ;;  %v452_v9 = vadd.f32 %v451_v61, %v447_v50  ;;  %v450_v16 = vadd.f32 %v449_v57, %v448_v23  ;;  %v431_v34 = vmul.f32 %v429_v46, %v367_v63 }
  0x40   : > { %v885_v13 = vpop.eup %884  ;;  %v404_v15 = vmul.f32 %v883_v6, %v401_v55  ;;  %v575_v26 = vmul.f32 1.442695, %v574_v10  ;;  %v585_v4 = vmax.f32 %v1092_v31, %v1071_v7  ;;  %v430_v49 = vmul.f32 %v1101_v41, %v418_v43 }
  0x41   : > { %896 = vrcp.f32 %v434_v1  ;;  %v466_v18 = vmul.f32 %v461_v3, %v452_v9  ;;  %v479_v21 = vsel %vm478_vm6, 1.0, %v885_v13  ;;  %v480_v44 = vsel %vm478_vm6, %v885_v13, 1.0 }
  0x42   : > { %v887_v24 = vpop.eup %886  ;;  %406 = vst.msk [vmem:[#allocation2] sm:$0x1] %vm405_vm4, %v404_v15  ;;  %v484_v25 = vmul.f32 %v479_v21, %v452_v9  ;;  %v481_v35 = vmul.f32 %v479_v21, %v450_v16  ;;  %v482_v37 = vmul.f32 %v480_v44, %v368_v8  ;;  %v1165_v48 = vsub.f32 %v585_v4, %v586_v36 }
  0x43   : > { %v467_v27 = vadd.f32 %v466_v18, %v462_v17  ;;  %v494_v30 = vsel %vm493_vm7, 1.0, %v887_v24  ;;  %v495_v40 = vsel %vm493_vm7, %v887_v24, 1.0  ;;  %v382_v52 = vunpack.c.l.bf16 %v1153_v39 }
  0x44   : > { %v889_v33 = vpop.eup %888  ;;  %v485_v38 = vadd.f32 %v484_v25, %v480_v44  ;;  %v483_v50 = vadd.f32 %v482_v37, %v481_v35  ;;  %vm559_vm11 = vcmp.ge.f32.partialorder %v1088_v28, 0.0  ;;  %v463_v31 = vmul.f32 %v461_v3, %v450_v16 }
  0x45   : > { %898 = vrcp.f32 %v467_v27  ;;  %v512_v19 = vsel %vm511_vm8, 1.0, %v889_v33  ;;  %v513_v46 = vsel %vm511_vm8, %v889_v33, 1.0  ;;  %v464_v2 = vmul.f32 %v462_v17, %v368_v8  ;;  %v1206_v33 = vld [vmem:[%s1031_s7 + $0x5] sm:$0x1] }
  0x46   : > { %v891_v45 = vpop.eup %890  ;;  %v499_v63 = vmul.f32 %v494_v30, %v485_v38  ;;  %900 = vpow2.f32 %v575_v26  ;;  %v517_v47 = vmul.f32 %v512_v19, %v485_v38  ;;  %v588_v43 = vand.u32 2147483647, %v1165_v48  ;;  %v375_v38 = vld [vmem:[%s1136_s10 + $0x1] sm:$0x1] }
  0x47   : > { %v527_v7 = vsel %vm526_vm9, 1.0, %v891_v45  ;;  %v432_v56 = vadd.f32 %v431_v34, %v430_v49  ;;  %v528_v23 = vsel %vm526_vm9, %v891_v45, 1.0  ;;  %v604_v57 = vadd.f32 %v585_v4, %v1009_v14  ;;  %v680_v45 = vld [vmem:[%s1199_s13] sm:$0x1] }
  0x48   : > { %v500_v51 = vadd.f32 %v499_v63, %v495_v40  ;;  %v518_v41 = vadd.f32 %v517_v47, %v513_v46  ;;  %v589_v8 = vsub.f32 0.0, %v588_v43  ;;  %v514_v62 = vmul.f32 %v512_v19, %v483_v50 }
  0x49   : > { %v637_v54 = vld [vmem:[#allocation2] sm:$0x1]  ;;  %v893_v55 = vpop.eup %892  ;;  %v515_v1 = vmul.f32 %v513_v46, %v369_v12  ;;  %v465_v11 = vadd.f32 %v464_v2, %v463_v31  ;;  %v496_v15 = vmul.f32 %v494_v30, %v483_v50  ;;  %v497_v20 = vmul.f32 %v495_v40, %v369_v12 }
  0x4a   : > { %902 = vrcp.f32 %v500_v51  ;;  %v532_v58 = vmul.f32 %v527_v7, %v518_v41  ;;  %v545_v61 = vsel %vm544_vm10, 1.0, %v893_v55  ;;  %v546_v60 = vsel %vm544_vm10, %v893_v55, 1.0 }
  0x4b   : > { %v895_v29 = vpop.eup %894  ;;  %v550_v3 = vmul.f32 %v545_v61, %v518_v41  ;;  %v645_v59 = vpack.c.bf16 %v637_v54, %v637_v54  ;;  %v590_v10 = vmul.f32 1.442695, %v589_v8  ;;  %v1190_v18 = vsub.f32 %v604_v57, %v1104_v42 }
  0x4c   : > { %v533_v9 = vadd.f32 %v532_v58, %v528_v23  ;;  %v560_v14 = vsel %vm559_vm11, 1.0, %v895_v29  ;;  %v561_v17 = vsel %vm559_vm11, %v895_v29, 1.0  ;;  %v618_v21 = vmax.f32 %v604_v57, %v1104_v42  ;;  %v376_v57 = vld [vmem:[%s1136_s10 + $0x2] sm:$0x1] }
  0x4d   : > { %v551_v16 = vadd.f32 %v550_v3, %v546_v60  ;;  %v516_v44 = vadd.f32 %v515_v1, %v514_v62  ;;  %v653_v25 = vunpack.c.l.bf16 %v645_v59  ;;  %v606_v0 = vand.u32 2147483647, %v1190_v18  ;;  %v683_v1 = vld [vmem:[%s1199_s13 + $0x1] sm:$0x1] }
  0x4e   : > { %v897_v6 = vpop.eup %896  ;;  %904 = vrcp.f32 %v533_v9  ;;  %vm577_vm12 = vcmp.ge.f32.partialorder %v1114_v53, 0.0  ;;  %v498_v36 = vadd.f32 %v497_v20, %v496_v15  ;;  %v1203_v30 = vsub.f32 %v618_v21, %v1146_v32 }
  0x4f   : > { %v436_v13 = vmul.f32 %v897_v6, %v432_v56  ;;  %v565_v24 = vmul.f32 %v560_v14, %v551_v16  ;;  %906 = vpow2.f32 %v590_v10  ;;  %v607_v27 = vsub.f32 0.0, %v606_v0  ;;  %v686_v0 = vld [vmem:[%s1199_s13 + $0x2] sm:$0x1] }
  0x50   : > { %v547_v34 = vmul.f32 %v545_v61, %v516_v44  ;;  %v548_v35 = vmul.f32 %v546_v60, %v370_v22  ;;  %v661_v37 = vmul.f32 %v653_v25, %v382_v52  ;;  %v529_v39 = vmul.f32 %v527_v7, %v516_v44 }
  0x51   : > { %438 = vst.msk [vmem:[#allocation2 + $0x1] sm:$0x1] %vm405_vm4, %v436_v13  ;;  %v566_v28 = vadd.f32 %v565_v24, %v561_v17  ;;  %v530_v40 = vmul.f32 %v528_v23, %v370_v22  ;;  %v608_v19 = vmul.f32 1.442695, %v607_v27  ;;  %v621_v4 = vand.u32 2147483647, %v1203_v30 }
  0x52   : > { %v899_v12 = vpop.eup %898  ;;  %v669_v63 = vpack.c.bf16 %v661_v37, %v661_v37  ;;  %v371_v47 = vunpack.c.l.bf16 %v1206_v33  ;;  %v383_v22 = vunpack.c.l.bf16 %v375_v38  ;;  %v549_v51 = vadd.f32 %v548_v35, %v547_v34  ;;  %v378_v27 = vld [vmem:[%s1136_s10 + $0x4] sm:$0x1] }
  0x53   : > { %v901_v42 = vpop.eup %900  ;;  %v469_v26 = vmul.f32 %v899_v12, %v465_v11  ;;  %908 = vrcp.f32 %v566_v28  ;;  %v622_v5 = vsub.f32 0.0, %v621_v4  ;;  %v531_v2 = vadd.f32 %v530_v40, %v529_v39  ;;  %v689_v4 = vld [vmem:[%s1199_s13 + $0x3] sm:$0x1] }
  0x54   : > { %v578_v49 = vsel %vm577_vm12, 1.0, %v901_v42  ;;  %910 = vpow2.f32 %v608_v19  ;;  %v681_v7 = vsel %vm1217_vm14, %v669_v63, %v680_v45  ;;  %v562_v54 = vmul.f32 %v560_v14, %v549_v51  ;;  %v377_v14 = vld [vmem:[%s1136_s10 + $0x3] sm:$0x1] }
  0x55   : > { %471 = vst.msk [vmem:[#allocation2 + $0x2] sm:$0x1] %vm405_vm4, %v469_v26  ;;  %v583_v41 = vmul.f32 %v578_v49, %v551_v16  ;;  %v623_v43 = vmul.f32 1.442695, %v622_v5  ;;  %682 = vst [vmem:[%s1199_s13] sm:$0x1] %v681_v7  ;;  %v563_v55 = vmul.f32 %v561_v17, %v371_v47  ;;  %v579_v56 = vsel %vm577_vm12, %v901_v42, 1.0 }
  0x56   : > { %vm592_vm15 = vcmp.ge.f32.partialorder %v1165_v48, 0.0  ;;  %v384_v3 = vunpack.c.l.bf16 %v376_v57  ;;  %vm610_vm0 = vcmp.ge.f32.partialorder %v1190_v18, 0.0  ;;  %v385_v17 = vunpack.c.l.bf16 %v377_v14  ;;  %v364_v26 = vld [vmem:[%s1031_s7 + $0x6] sm:$0x1]  ;;  %v379_v5 = vld [vmem:[%s1136_s10 + $0x5] sm:$0x1] }
  0x57   : > { %v903_v46 = vpop.eup %902  ;;  %912 = vpow2.f32 %v623_v43  ;;  %v584_v62 = vadd.f32 %v583_v41, %v579_v56  ;;  %v564_v6 = vadd.f32 %v563_v55, %v562_v54  ;;  %v580_v24 = vmul.f32 %v578_v49, %v549_v51 }
  0x58   : > { %v638_v52 = vld [vmem:[#allocation2 + $0x1] sm:$0x1]  ;;  %v502_v50 = vmul.f32 %v903_v46, %v498_v36  ;;  %v581_v25 = vmul.f32 %v579_v56, %v371_v47  ;;  %vm625_vm1 = vcmp.ge.f32.partialorder %v1203_v30, 0.0  ;;  %v372_v19 = vunpack.c.l.bf16 %v364_v26  ;;  %v692_v56 = vld [vmem:[%s1199_s13 + $0x4] sm:$0x1] }
  0x59   : > { %v646_v31 = vpack.c.bf16 %v638_v52, %v638_v52  ;;  %v386_v45 = vunpack.c.l.bf16 %v378_v27 }
  0x5a   : > { %504 = vst.msk [vmem:[#allocation2 + $0x3] sm:$0x1] %vm405_vm4, %v502_v50  ;;  %v582_v37 = vadd.f32 %v581_v25, %v580_v24  ;;  %v698_v24 = vld [vmem:[%s1199_s13 + $0x6] sm:$0x1] }
  0x5b   : > { %v654_v23 = vunpack.c.l.bf16 %v646_v31  ;;  %v905_v58 = vpop.eup %904 }
  0x5c   : > { %v639_v60 = vld [vmem:[#allocation2 + $0x2] sm:$0x1]  ;;  %v907_v8 = vpop.eup %906  ;;  %v535_v29 = vmul.f32 %v905_v58, %v531_v2  ;;  %v387_v2 = vunpack.c.l.bf16 %v379_v5  ;;  %v365_v58 = vld [vmem:[%s1031_s7 + $0x7] sm:$0x1] }
  0x5d   : > { %v662_v61 = vmul.f32 %v654_v23, %v383_v22  ;;  %v647_v59 = vpack.c.bf16 %v639_v60, %v639_v60  ;;  %v593_v11 = vsel %vm592_vm15, 1.0, %v907_v8  ;;  %v594_v53 = vsel %vm592_vm15, %v907_v8, 1.0 }
  0x5e   : > { %537 = vst.msk [vmem:[#allocation2 + $0x4] sm:$0x1] %vm405_vm4, %v535_v29  ;;  %v598_v48 = vmul.f32 %v593_v11, %v584_v62  ;;  %v595_v46 = vmul.f32 %v593_v11, %v582_v37  ;;  %v596_v22 = vmul.f32 %v594_v53, %v372_v19 }
  0x5f   : > { %v670_v9 = vpack.c.bf16 %v662_v61, %v662_v61  ;;  %v655_v10 = vunpack.c.l.bf16 %v647_v59 }
  0x60   : > { %v909_v15 = vpop.eup %908  ;;  %v599_v20 = vadd.f32 %v598_v48, %v594_v53  ;;  %v597_v57 = vadd.f32 %v596_v22, %v595_v46 }
  0x61   : > { %v684_v13 = vsel %vm1217_vm14, %v670_v9, %v683_v1  ;;  %v663_v16 = vmul.f32 %v655_v10, %v384_v3  ;;  %v640_v21 = vld [vmem:[#allocation2 + $0x3] sm:$0x1]  ;;  %v568_v44 = vmul.f32 %v909_v15, %v564_v6  ;;  %v911_v42 = vpop.eup %910  ;;  %v695_v6 = vld [vmem:[%s1199_s13 + $0x5] sm:$0x1]  ;;  %v380_v10 = vld [vmem:[%s1136_s10 + $0x6] sm:$0x1] }
  0x62   : > { %685 = vst [vmem:[%s1199_s13 + $0x1] sm:$0x1] %v684_v13  ;;  %v648_v12 = vpack.c.bf16 %v640_v21, %v640_v21  ;;  %914 = vrcp.f32 %v599_v20  ;;  %v611_v33 = vsel %vm610_vm0, 1.0, %v911_v42  ;;  %v612_v34 = vsel %vm610_vm0, %v911_v42, 1.0 }
  0x63   : > { %v671_v28 = vpack.c.bf16 %v663_v16, %v663_v16  ;;  %570 = vst.msk [vmem:[#allocation2 + $0x5] sm:$0x1] %vm405_vm4, %v568_v44  ;;  %v616_v38 = vmul.f32 %v611_v33, %v584_v62  ;;  %v613_v43 = vmul.f32 %v611_v33, %v582_v37  ;;  %v614_v54 = vmul.f32 %v612_v34, %v372_v19  ;;  %v701_v33 = vld [vmem:[%s1199_s13 + $0x7] sm:$0x1] }
  0x64   : > { %v656_v36 = vunpack.c.l.bf16 %v648_v12  ;;  %v913_v63 = vpop.eup %912  ;;  %v373_v62 = vunpack.c.l.bf16 %v365_v58  ;;  %v388_v20 = vunpack.c.l.bf16 %v380_v10  ;;  %v381_v12 = vld [vmem:[%s1136_s10 + $0x7] sm:$0x1] }
  0x65   : > { %v687_v35 = vsel %vm1217_vm14, %v671_v28, %v686_v0  ;;  %v641_v40 = vld [vmem:[#allocation2 + $0x4] sm:$0x1]  ;;  %v617_v18 = vadd.f32 %v616_v38, %v612_v34  ;;  %v626_v52 = vsel %vm625_vm1, 1.0, %v913_v63  ;;  %v627_v50 = vsel %vm625_vm1, %v913_v63, 1.0 }
  0x66   : > { %688 = vst [vmem:[%s1199_s13 + $0x2] sm:$0x1] %v687_v35  ;;  %v664_v39 = vmul.f32 %v656_v36, %v385_v17  ;;  %v649_v49 = vpack.c.bf16 %v641_v40, %v641_v40  ;;  %v615_v1 = vadd.f32 %v614_v54, %v613_v43  ;;  %v629_v9 = vmul.f32 %v627_v50, %v373_v62 }
  0x67   : > { %v631_v30 = vmul.f32 %v626_v52, %v617_v18  ;;  %v389_v42 = vunpack.c.l.bf16 %v381_v12 }
  0x68   : > { %v672_v47 = vpack.c.bf16 %v664_v39, %v664_v39  ;;  %v657_v51 = vunpack.c.l.bf16 %v649_v49  ;;  %v628_v53 = vmul.f32 %v626_v52, %v615_v1 }
  0x69   : > { %v632_v55 = vadd.f32 %v631_v30, %v627_v50 }
  0x6a   : > { %v690_v7 = vsel %vm1217_vm14, %v672_v47, %v689_v4  ;;  %v665_v31 = vmul.f32 %v657_v51, %v386_v45  ;;  %v642_v41 = vld [vmem:[#allocation2 + $0x5] sm:$0x1]  ;;  %v630_v48 = vadd.f32 %v629_v9, %v628_v53 }
  0x6b   : > { %691 = vst [vmem:[%s1199_s13 + $0x3] sm:$0x1] %v690_v7  ;;  %v650_v23 = vpack.c.bf16 %v642_v41, %v642_v41  ;;  %916 = vrcp.f32 %v632_v55 }
  0x6c   : > { %v673_v61 = vpack.c.bf16 %v665_v31, %v665_v31 }
  0x6d   : > { %v658_v60 = vunpack.c.l.bf16 %v650_v23 }
  0x6e   : > { %v693_v8 = vsel %vm1217_vm14, %v673_v61, %v692_v56 }
  0x6f   : > { %v915_v29 = vpop.eup %914  ;;  %694 = vst [vmem:[%s1199_s13 + $0x4] sm:$0x1] %v693_v8  ;;  %v666_v3 = vmul.f32 %v658_v60, %v387_v2 }
  0x70   : > { %v601_v59 = vmul.f32 %v915_v29, %v597_v57 }
  0x71   : > { %v674_v11 = vpack.c.bf16 %v666_v3, %v666_v3 }
  0x72   : > { %603 = vst.msk [vmem:[#allocation2 + $0x6] sm:$0x1] %vm405_vm4, %v601_v59 }
  0x73   : > { %v696_v14 = vsel %vm1217_vm14, %v674_v11, %v695_v6 }
  0x74   : > { %697 = vst [vmem:[%s1199_s13 + $0x5] sm:$0x1] %v696_v14 }
  0x78   : > { %v917_v15 = vpop.eup %916 }
  0x79   : > { %v643_v13 = vld [vmem:[#allocation2 + $0x6] sm:$0x1]  ;;  %v634_v17 = vmul.f32 %v917_v15, %v630_v48 }
  0x7a   : > { %v651_v16 = vpack.c.bf16 %v643_v13, %v643_v13 }
  0x7b   : > { %636 = vst.msk [vmem:[#allocation2 + $0x7] sm:$0x1] %vm405_vm4, %v634_v17 }
  0x7c   : > { %v659_v21 = vunpack.c.l.bf16 %v651_v16 }
  0x7e   : > { %v667_v44 = vmul.f32 %v659_v21, %v388_v20 }
  0x80   : > { %v675_v25 = vpack.c.bf16 %v667_v44, %v667_v44 }
  0x82   : > { %v699_v0 = vsel %vm1217_vm14, %v675_v25, %v698_v24  ;;  %v644_v28 = vld [vmem:[#allocation2 + $0x7] sm:$0x1] }
  0x83   : > { %700 = vst [vmem:[%s1199_s13 + $0x6] sm:$0x1] %v699_v0  ;;  %v652_v26 = vpack.c.bf16 %v644_v28, %v644_v28 }
  0x85   : > { %v660_v36 = vunpack.c.l.bf16 %v652_v26 }
  0x87   : > { %v668_v27 = vmul.f32 %v660_v36, %v389_v42 }
  0x89   : > { %v676_v34 = vpack.c.bf16 %v668_v27, %v668_v27 }
  0x8b   : > { %v702_v35 = vsel %vm1217_vm14, %v676_v34, %v701_v33 }
  0x8c   : > { %703 = vst [vmem:[%s1199_s13 + $0x7] sm:$0x1] %v702_v35 }
  0x8d PF: > { %s15_s20 = sadd.s32 1, %s940_s20   ;;  %s1297_s18 = smov %s936_s19 }
  0x8e   : > { %p12_p5 = scmp.ge.s32.totalorder %s15_s20, 4   ;;  %s1298_s19 = smov %s1300_s21 }
  0x90   :  { %14 = sbr.rel (!%p12_p5) target bundleno = 2 (0x2), region = 89 }

// kernel: rwkv_forward.19
= control target key start
LH: loop header
LB: loop body
LE: loop exit
PB: predicated region body
PF: predicated region fallthrough
CT: control target
= control target key end

     0   :  { %vm16_vm0 = vcmask 261120   ;;  %v159_v0 = vmov 0.0   ;;  %vm160_vm1 = vmmov 0   ;;  %vm118_vm2 = vcmask 257024   ;;  %s196_s1 = inlined_call_operand.vmem [shape: bf16[32,32], index: 1, kind: input, shape index: {}]   ;;  %s197_s0 = inlined_call_operand.vmem [shape: bf16[16,32], index: 0, kind: input, shape index: {}]   ;;  %s198_s2 = inlined_call_operand.vmem [shape: bf16[16,32], index: 2, kind: output, shape index: {}]  }
   0x1   :  { %138 = vmatprep.subr.bf16.mxu0 %v159_v0  ;;  %v148_v1 = vld [vmem:[%s196_s1 + $0x8] sm:$0xff]   ;;  %142 = vmatprep.mubr.msk.bf16.mxu0 %vm160_vm1, %v159_v0  ;;  %17 = vst.msk [vmem:[#allocation2] sm:$0xff] %vm16_vm0, %v159_v0  ;;  %18 = vst.msk [vmem:[#allocation2 + $0x8] sm:$0xff] %vm16_vm0, %v159_v0  ;;  %v149_v2 = vld [vmem:[%s196_s1] sm:$0xff]  }
   0x2   :  { %139 = vmatpush3.bf16.msra.mxu0 %v148_v1  ;;  %v150_v3 = vld [vmem:[%s197_s0] sm:$0xff]  }
   0x3   :  { %140 = vmatprep.subr.bf16.mxu0 %v159_v0 }
   0x6   :  { %141 = vmatpush3.bf16.msra.mxu0 %v149_v2 }
   0x8   :  { %v19_v4 = vld [vmem:[#allocation2] sm:$0xff]  ;;  %v20_v8 = vld [vmem:[#allocation2 + $0x8] sm:$0xff] }
   0x9   :  { %143 = vmatmul.mubr.msk.bf16.vlgmr.msra.gmra.mxu0 %vm16_vm0, %v150_v3 }
  0xc9   :  { %v82_v5 = vpop.f32.mrf.mxu0 }
  0xca   :  { %v89_v6 = vadd.f32 %v82_v5, %v19_v4 }
  0xcb   :  { %v144_v7 = vpop.f32.mrf.mxu0 }
  0xcc   :  { %91 = vst.msk [vmem:[#allocation2] sm:$0xff] %vm16_vm0, %v89_v6 }
  0xcd   :  { %v85_v9 = vpop.f32.mrf.mxu0 }
  0xce   :  { %v90_v10 = vadd.f32 %v85_v9, %v20_v8 }
  0xcf   :  { %v145_v11 = vpop.f32.mrf.mxu0 }
  0xd0   :  { %92 = vst.msk [vmem:[#allocation2 + $0x8] sm:$0xff] %vm16_vm0, %v90_v10 }
  0xd3   :  { %v96_v12 = vld [vmem:[#allocation2] sm:$0xff] }
  0xd4   :  { %v129_v13 = vmul.f32 -1.442695, %v96_v12 }
  0xd6   :  { %151 = vpow2.f32 %v129_v13 }
  0xd7   :  { %v97_v14 = vld [vmem:[#allocation2 + $0x8] sm:$0xff] }
  0xd8   :  { %v130_v15 = vmul.f32 -1.442695, %v97_v14 }
  0xda   :  { %153 = vpow2.f32 %v130_v15 }
  0xe3   :  { %v152_v16 = vpop.eup %151 }
  0xe4   :  { %v104_v17 = vadd.f32 1.0, %v152_v16 }
  0xe6   :  { %155 = vrcp.f32 %v104_v17 }
  0xe7   :  { %v154_v18 = vpop.eup %153 }
  0xe8   :  { %v105_v19 = vadd.f32 1.0, %v154_v18 }
  0xea   :  { %157 = vrcp.f32 %v105_v19 }
  0xf3   :  { %v156_v20 = vpop.eup %155 }
  0xf4   :  { %v133_v21 = vpack.c.bf16 %v156_v20, %v156_v20 }
  0xf6   :  { %119 = vst.msk [vmem:[%s198_s2] sm:$0xf] %vm118_vm2, %v133_v21 }
  0xf7   :  { %v158_v22 = vpop.eup %157 }
  0xf8   :  { %v134_v23 = vpack.c.bf16 %v158_v22, %v158_v22 }
  0xfa   :  { %120 = vst.msk [vmem:[%s198_s2 + $0x4] sm:$0xf] %vm118_vm2, %v134_v23 }

// kernel: rwkv_forward.20
= control target key start
LH: loop header
LB: loop body
LE: loop exit
PB: predicated region body
PF: predicated region fallthrough
CT: control target
= control target key end

     0   :  { %vm25_vm0 = vcmask 261120   ;;  %v321_v0 = vmov 0.0   ;;  %vm322_vm1 = vmmov 0   ;;  %vm237_vm2 = vcmask 257024   ;;  %s403_s3 = inlined_call_operand.vmem [shape: bf16[32,128], index: 3, kind: input, shape index: {}]   ;;  %s404_s4 = inlined_call_operand.vmem [shape: bf16[128,32], index: 4, kind: input, shape index: {}]   ;;  %s405_s1 = inlined_call_operand.vmem [shape: bf16[16,32], index: 1, kind: input, shape index: {}]   ;;  %s406_s2 = inlined_call_operand.vmem [shape: bf16[16,32], index: 2, kind: input, shape index: {}]   ;;  %s407_s0 = inlined_call_operand.vmem [shape: bf16[16,32], index: 0, kind: input, shape index: {}]   ;;  %s408_s5 = inlined_call_operand.vmem [shape: bf16[16,32], index: 5, kind: output, shape index: {}]  }
   0x1   :  { %280 = vmatprep.subr.bf16.mxu0 %v321_v0  ;;  %v310_v1 = vld [vmem:[%s403_s3 + $0x8] sm:$0xff]   ;;  %284 = vmatprep.mubr.msk.bf16.mxu0 %vm322_vm1, %v321_v0  ;;  %26 = vst.msk [vmem:[#allocation2] sm:$0xff] %vm25_vm0, %v321_v0  ;;  %27 = vst.msk [vmem:[#allocation2 + $0x8] sm:$0xff] %vm25_vm0, %v321_v0  ;;  %v311_v2 = vld [vmem:[%s403_s3] sm:$0xff]  }
   0x2   :  { %288 = vmatprep.subr.bf16.mxu1 %v321_v0  ;;  %304 = vmatprep.mubr.msk.bf16.mxu1 %vm322_vm1, %v321_v0  ;;  %v313_v3 = vld [vmem:[%s404_s4 + $0x38] sm:$0xff]   ;;  %v312_v4 = vld [vmem:[%s405_s1] sm:$0xff]   ;;  %v314_v5 = vld [vmem:[%s404_s4 + $0x30] sm:$0xff]  }
   0x3   :  { %281 = vmatpush3.bf16.msra.mxu0 %v310_v1  ;;  %289 = vmatpush3.bf16.msra.mxu1 %v313_v3  ;;  %v315_v6 = vld [vmem:[%s404_s4 + $0x28] sm:$0xff]   ;;  %v316_v7 = vld [vmem:[%s404_s4 + $0x20] sm:$0xff]   ;;  %v317_v8 = vld [vmem:[%s404_s4 + $0x18] sm:$0xff]  }
   0x4   :  { %282 = vmatprep.subr.bf16.mxu0 %v321_v0  ;;  %290 = vmatprep.subr.bf16.mxu1 %v321_v0  ;;  %v318_v9 = vld [vmem:[%s404_s4 + $0x10] sm:$0xff]   ;;  %v319_v10 = vld [vmem:[%s404_s4 + $0x8] sm:$0xff]   ;;  %v320_v11 = vld [vmem:[%s404_s4] sm:$0xff]  }
   0x5   :  { %v265_v26 = vld [vmem:[%s406_s2] sm:$0xff]  }
   0x6   :  { %v261_v29 = vld [vmem:[%s407_s0] sm:$0xff]   ;;  %v266_v31 = vunpack.c.l.bf16 %v265_v26  ;;  %v267_v35 = vunpack.c.h.bf16 %v265_v26 }
   0x7   :  { %283 = vmatpush3.bf16.msra.mxu0 %v311_v2  ;;  %291 = vmatpush3.bf16.msra.mxu1 %v314_v5  ;;  %v262_v32 = vunpack.c.l.bf16 %v261_v29  ;;  %v263_v37 = vunpack.c.h.bf16 %v261_v29 }
   0x8   :  { %292 = vmatprep.subr.bf16.mxu1 %v321_v0  ;;  %v101_v21 = vld [vmem:[#allocation2] sm:$0xff]  ;;  %v102_v25 = vld [vmem:[#allocation2 + $0x8] sm:$0xff] }
   0xa   :  { %285 = vmatmul.mubr.msk.bf16.vlgmr.msra.gmra.mxu0 %vm25_vm0, %v312_v4 }
   0xb   :  { %293 = vmatpush3.bf16.msra.mxu1 %v315_v6 }
   0xc   :  { %294 = vmatprep.subr.bf16.mxu1 %v321_v0 }
   0xf   :  { %295 = vmatpush3.bf16.msra.mxu1 %v316_v7 }
  0x10   :  { %296 = vmatprep.subr.bf16.mxu1 %v321_v0 }
  0x13   :  { %297 = vmatpush3.bf16.msra.mxu1 %v317_v8 }
  0x14   :  { %298 = vmatprep.subr.bf16.mxu1 %v321_v0 }
  0x17   :  { %299 = vmatpush3.bf16.msra.mxu1 %v318_v9 }
  0x18   :  { %300 = vmatprep.subr.bf16.mxu1 %v321_v0 }
  0x1b   :  { %301 = vmatpush3.bf16.msra.mxu1 %v319_v10 }
  0x1c   :  { %302 = vmatprep.subr.bf16.mxu1 %v321_v0 }
  0x1f   :  { %303 = vmatpush3.bf16.msra.mxu1 %v320_v11 }
  0xca   :  { %v89_v12 = vpop.f32.mrf.mxu0 }
  0xcb   :  { %v96_v14 = vmax.f32 %v89_v12, 0.0 }
  0xcc   :  { %v286_v13 = vpop.f32.mrf.mxu0 }
  0xcd   :  { %v98_v18 = vmul.f32 %v96_v14, %v96_v14 }
  0xce   :  { %v92_v15 = vpop.f32.mrf.mxu0 }
  0xcf   :  { %v97_v16 = vmax.f32 %v92_v15, 0.0 }
  0xd0   :  { %v287_v17 = vpop.f32.mrf.mxu0 }
  0xd1   :  { %v99_v19 = vmul.f32 %v97_v16, %v97_v16 }
  0xd3   :  { %v100_v20 = vpack.c.bf16 %v99_v19, %v98_v18 }
  0xd5   :  { %305 = vmatmul.mubr.bf16.vlgmr.msra.gmra.mxu1 %v100_v20 }
 0x195   :  { %v201_v22 = vpop.f32.mrf.mxu1 }
 0x196   :  { %v208_v23 = vadd.f32 %v201_v22, %v101_v21 }
 0x197   :  { %v306_v24 = vpop.f32.mrf.mxu1 }
 0x198   :  { %210 = vst.msk [vmem:[#allocation2] sm:$0xff] %vm25_vm0, %v208_v23 }
 0x199   :  { %v204_v27 = vpop.f32.mrf.mxu1 }
 0x19a   :  { %v209_v28 = vadd.f32 %v204_v27, %v102_v25 }
 0x19b   :  { %v307_v30 = vpop.f32.mrf.mxu1 }
 0x19c   :  { %211 = vst.msk [vmem:[#allocation2 + $0x8] sm:$0xff] %vm25_vm0, %v209_v28 }
 0x19f   :  { %v223_v33 = vld [vmem:[#allocation2] sm:$0xff] }
 0x1a0   :  { %v225_v34 = vmul.f32 %v266_v31, %v223_v33 }
 0x1a2   :  { %v227_v36 = vadd.f32 %v262_v32, %v225_v34 }
 0x1a3   :  { %v224_v38 = vld [vmem:[#allocation2 + $0x8] sm:$0xff] }
 0x1a4   :  { %v258_v39 = vpack.c.bf16 %v227_v36, %v227_v36  ;;  %v226_v40 = vmul.f32 %v267_v35, %v224_v38 }
 0x1a6   :  { %238 = vst.msk [vmem:[%s408_s5] sm:$0xf] %vm237_vm2, %v258_v39  ;;  %v228_v41 = vadd.f32 %v263_v37, %v226_v40 }
 0x1a8   :  { %v259_v42 = vpack.c.bf16 %v228_v41, %v228_v41 }
 0x1aa   :  { %239 = vst.msk [vmem:[%s408_s5 + $0x4] sm:$0xf] %vm237_vm2, %v259_v42 }

// kernel: rwkv_forward.18
= control target key start
LH: loop header
LB: loop body
LE: loop exit
PB: predicated region body
PF: predicated region fallthrough
CT: control target
= control target key end

     0   :  { %s484_s21 = smov 0   ;;  %s521_s0 = inlined_call_operand.vmem [shape: bf16[2,8,32], index: 0, kind: input, shape index: {}]   ;;  %s522_s1 = inlined_call_operand.vmem [shape: f32[1,32], index: 1, kind: input, shape index: {}]   ;;  %s523_s2 = inlined_call_operand.vmem [shape: f32[1,32], index: 2, kind: input, shape index: {}]   ;;  %s524_s3 = inlined_call_operand.vmem [shape: f32[1,32], index: 3, kind: input, shape index: {}, may-alias: {3,4}]   ;;  %s525_s4 = inlined_call_operand.vmem [shape: f32[1,32], index: 4, kind: input, shape index: {}, may-alias: {3,4}]   ;;  %s526_s5 = inlined_call_operand.vmem [shape: bf16[2,8,32], index: 5, kind: output, shape index: {0}]   ;;  %s527_s6 = inlined_call_operand.vmem [shape: bf16[2,8,32], index: 6, kind: output, shape index: {1}]  }
   0x1 LB: > { %s419_s22 = sadd.s32 4294967295, %s447_s21   ;;  %p423_p0 = scmp.ge.s32.totalorder %s447_s21, 1  ;;  %s447_s21 = sphi %s484_s21, %s17_s21  }
   0x2   : > { %p214_p1 = scmp.lt.s32.totalorder %s447_s21, 3 }
   0x4   : > { %p215_p2 = pnand %p423_p0, %p214_p1 }
   0x5   : > { %p246_p3 = scmp.lt.s32.totalorder (!%p215_p2), %s419_s22, 1 }
   0x6   : > { %218 = sbr.rel (%p215_p2) target bundleno = 335 (0x14f), region = 40 }
   0xb   : > { %s529_s22 = smov (!%p246_p3, %s419_s22), 1  ;;  %vm262_vm0 = vcmask 261120   ;;  %v292_v11 = vlaneseq  ;;  %v296_v13 = vld [vmem:[%s524_s3] sm:$0x1]  ;;  %vm315_vm2 = vcmask 257024  }
   0xc   : > { %s492_s23 = sshll.u32 %s529_s22, 2  ;;  %v297_v14 = vld [vmem:[%s525_s4] sm:$0x1]  ;;  %v305_v20 = vsub.f32 1.0, %v296_v13 }
   0xd   : > { %s249_s26 = scalar_lea.vmem %s521_s0, %s492_s23  ;;  %v293_v12 = vshrl.u32 %v292_v11, 7  ;;  %v427_v16 = vld [vmem:[%s522_s1] ss:$0 sm:$0xff]  ;;  %v324_v21 = vsub.f32 1.0, %v297_v14  ;;  %s253_s13 = scalar_lea.vmem %s526_s5, %s492_s23 }
   0xe   : > { %v258_v0 = vld [vmem:[%s249_s26] sm:$0xf]  ;;  %s257_s16 = scalar_lea.vmem %s527_s6, %s492_s23 }
   0xf   : > { %v259_v1 = vunpack.c.l.bf16 %v258_v0  ;;  %v428_v18 = vld [vmem:[%s523_s2] ss:$0 sm:$0xff]  ;;  %v301_v19 = vsub.s32 0, %v293_v12  ;;  %vm294_vm1 = vcmp.eq.s32.totalorder %v293_v12, 0 }
  0x11   : > { %v263_v2 = vsel %vm262_vm0, %v259_v1, 0.0  ;;  %v302_v24 = vrot.slane %v296_v13, %v301_v19  ;;  %v310_v25 = vrot.slane %v305_v20, %v301_v19  ;;  %v321_v26 = vrot.slane %v297_v14, %v301_v19 }
  0x12   : > { %264 = vadd.xlane.f32.xlu0 %v263_v2  ;;  %v329_v27 = vrot.slane %v324_v21, %v301_v19 }
  0x9b   : > { %v265_v3 = vpop.xlane.xlu0 %264 }
  0x9c   : > { %v267_v4 = vmul.f32 0.03125, %v265_v3 }
  0x9e   : > { %v268_v5 = vsub.f32 %v259_v1, %v267_v4 }
  0xa0   : > { %v269_v6 = vmul.f32 %v268_v5, %v268_v5 }
  0xa2   : > { %v270_v7 = vsel %vm262_vm0, %v269_v6, 0.0 }
  0xa3   : > { %271 = vadd.xlane.f32.xlu0 %v270_v7 }
 0x12c   : > { %v272_v8 = vpop.xlane.xlu0 %271 }
 0x12d   : > { %v273_v9 = vmul.f32 0.03125, %v272_v8 }
 0x12f   : > { %v274_v10 = vadd.f32 1e-05, %v273_v9 }
 0x131   : > { %439 = vrsqrt.f32 %v274_v10 }
 0x13e   : > { %v440_v15 = vpop.eup %439 }
 0x13f   : > { %v276_v17 = vmul.f32 %v440_v15, %v268_v5 }
 0x141   : > { %v283_v22 = vmul.f32 %v427_v16, %v276_v17 }
 0x143   : > { %v290_v23 = vadd.f32 %v428_v18, %v283_v22 }
 0x145   : > { %v291_v28 = vrot.slane %v290_v23, 7  ;;  %v304_v30 = vmul.f32 %v302_v24, %v290_v23  ;;  %v323_v32 = vmul.f32 %v321_v26, %v290_v23 }
 0x147   : > { %v295_v29 = vsel %vm294_vm1, 0.0, %v291_v28 }
 0x148   : > { %v312_v31 = vmul.f32 %v310_v25, %v295_v29  ;;  %v331_v33 = vmul.f32 %v329_v27, %v295_v29 }
 0x14a   : > { %v313_v34 = vadd.f32 %v312_v31, %v304_v30  ;;  %v332_v35 = vadd.f32 %v331_v33, %v323_v32 }
 0x14c   : > { %v314_v36 = vpack.c.bf16 %v313_v34, %v313_v34  ;;  %v333_v37 = vpack.c.bf16 %v332_v35, %v332_v35 }
 0x14e   : > { %316 = vst.msk [vmem:[%s253_s13] sm:$0xf] %vm315_vm2, %v314_v36  ;;  %334 = vst.msk [vmem:[%s257_s16] sm:$0xf] %vm315_vm2, %v333_v37 }
 0x14f PF: > { %s17_s21 = sadd.s32 1, %s447_s21  }
 0x150   : > { %p14_p4 = scmp.ge.s32.totalorder %s17_s21, 4  }
 0x152   :  { %16 = sbr.rel (!%p14_p4) target bundleno = 1 (0x1), region = 82 }

// kernel: rwkv_forward.27
= control target key start
LH: loop header
LB: loop body
LE: loop exit
PB: predicated region body
PF: predicated region fallthrough
CT: control target
= control target key end

     0   :  { %vm25_vm0 = vcmask 261120   ;;  %s255_s0 = inlined_call_operand.vmem [shape: bf16[16,32], index: 0, kind: input, shape index: {}]   ;;  %s256_s1 = inlined_call_operand.vmem [shape: f32[1,32], index: 1, kind: input, shape index: {}]   ;;  %s257_s2 = inlined_call_operand.vmem [shape: f32[1,32], index: 2, kind: input, shape index: {}]   ;;  %s258_s3 = inlined_call_operand.vmem [shape: bf16[32,64], index: 3, kind: input, shape index: {}]   ;;  %s259_s4 = inlined_call_operand.hbm [shape: f32[16,64], index: 4, kind: output, shape index: {}]  }
   0x1   :  { %v155_v0 = vld [vmem:[%s255_s0] sm:$0xff]  }
   0x2   :  { %v156_v1 = vunpack.c.l.bf16 %v155_v0  ;;  %v157_v2 = vunpack.c.h.bf16 %v155_v0 }
   0x3   :  { %9 = vsyncpa [#allocation3], 0  ;;  %v174_v15 = vld [vmem:[%s258_s3 + $0x8] sm:$0xff]   ;;  %v202_v16 = vmov 0.0   ;;  %vm203_vm1 = vmmov 0   ;;  %v175_v17 = vld [vmem:[%s258_s3] sm:$0xff]  }
   0x4   :  { %v26_v3 = vsel %vm25_vm0, %v156_v1, 0.0  ;;  %v29_v4 = vsel %vm25_vm0, %v157_v2, 0.0  ;;  %161 = vmatprep.subr.bf16.mxu0 %v202_v16  ;;  %165 = vmatprep.mubr.msk.bf16.mxu0 %vm203_vm1, %v202_v16  ;;  %v149_v26 = vld [vmem:[%s256_s1] ss:$0 sm:$0xff]  ;;  %vm130_vm2 = vcmask 523264   ;;  %s204_s23 = smov [#allocation2]  }
   0x5   :  { %27 = vadd.xlane.f32.xlu0 %v26_v3  ;;  %162 = vmatpush3.bf16.msra.mxu0 %v174_v15  ;;  %v150_v30 = vld [vmem:[%s257_s2] ss:$0 sm:$0xff]  ;;  %s138_s24 = sshll.u32 %s204_s23, 4  ;;  %s139_s24 = int_to_ptr.vmem [resolvable:$true] %s138_s24 }
   0x6   :  { %163 = vmatprep.subr.bf16.mxu0 %v202_v16  ;;  %s180_s1 = scalar_lea.vmem %s139_s24, 256  ;;  %p185_p1 = scmp.lt.s32.totalorder %s139_s24, %s139_s24 }
   0x7   :  { %p181_p0 = scmp.ne.s32.totalorder %s139_s24, %s180_s1  ;;  %p186_p2 = scmp.lt.s32.totalorder %s180_s1, %s180_s1 }
   0x9   :  { %30 = vadd.xlane.f32.xlu0 %v29_v4  ;;  %164 = vmatpush3.bf16.msra.mxu0 %v175_v17  ;;  %p187_p3 = por %p186_p2, %p185_p1 }
   0xb   :  { %p188_p4 = pnand %p187_p3, %p181_p0 }
  0x8e   :  { %v28_v5 = vpop.xlane.xlu0 %27 }
  0x8f   :  { %v33_v6 = vmul.f32 0.03125, %v28_v5 }
  0x91   :  { %v35_v7 = vsub.f32 %v156_v1, %v33_v6 }
  0x92   :  { %v31_v8 = vpop.xlane.xlu0 %30 }
  0x93   :  { %v34_v9 = vmul.f32 0.03125, %v31_v8  ;;  %v37_v10 = vmul.f32 %v35_v7, %v35_v7 }
  0x95   :  { %v36_v11 = vsub.f32 %v157_v2, %v34_v9  ;;  %v39_v12 = vsel %vm25_vm0, %v37_v10, 0.0 }
  0x96   :  { %40 = vadd.xlane.f32.xlu1 %v39_v12 }
  0x97   :  { %v38_v13 = vmul.f32 %v36_v11, %v36_v11 }
  0x99   :  { %v42_v14 = vsel %vm25_vm0, %v38_v13, 0.0 }
  0x9a   :  { %43 = vadd.xlane.f32.xlu1 %v42_v14 }
 0x11f   :  { %v41_v18 = vpop.xlane.xlu1 %40 }
 0x120   :  { %v45_v19 = vmul.f32 0.03125, %v41_v18 }
 0x122   :  { %v47_v20 = vadd.f32 1e-05, %v45_v19 }
 0x123   :  { %v44_v21 = vpop.xlane.xlu1 %43 }
 0x124   :  { %176 = vrsqrt.f32 %v47_v20  ;;  %v46_v22 = vmul.f32 0.03125, %v44_v21 }
 0x126   :  { %v48_v23 = vadd.f32 1e-05, %v46_v22 }
 0x128   :  { %178 = vrsqrt.f32 %v48_v23 }
 0x131   :  { %v177_v24 = vpop.eup %176 }
 0x132   :  { %v51_v25 = vmul.f32 %v177_v24, %v35_v7 }
 0x134   :  { %v59_v29 = vmul.f32 %v149_v26, %v51_v25 }
 0x135   :  { %v179_v27 = vpop.eup %178 }
 0x136   :  { %v52_v28 = vmul.f32 %v179_v27, %v36_v11  ;;  %v67_v32 = vadd.f32 %v150_v30, %v59_v29 }
 0x138   :  { %v60_v31 = vmul.f32 %v149_v26, %v52_v28 }
 0x13a   :  { %v68_v33 = vadd.f32 %v150_v30, %v60_v31 }
 0x13c   :  { %v69_v34 = vpack.c.bf16 %v68_v33, %v67_v32 }
 0x13e   :  { %166 = vmatmul.mubr.msk.bf16.vlgmr.msra.gmra.mxu0 %vm25_vm0, %v69_v34 }
 0x1fe   :  { %v123_v35 = vpop.f32.mrf.mxu0 }
 0x1ff   :  { %131 = vst.msk [vmem:[#allocation2] sm:$0xff] %vm130_vm2, %v123_v35 }
 0x200   :  { %v167_v36 = vpop.f32.mrf.mxu0 }
 0x202   :  { %v126_v37 = vpop.f32.mrf.mxu0 }
 0x203   :  { %132 = vst.msk [vmem:[#allocation2 + $0x8] sm:$0xff] %vm130_vm2, %v126_v37 }
 0x204   :  { %v168_v38 = vpop.f32.mrf.mxu0 }
 0x205   :  { %191 = shalt.err (!%p188_p4)
}
 0x206   :  { %s205_s2 = smov 128   ;;  %s206_s25 = smov 8  }
 0x207   :  { %144 = dma.vmem_to_hbm [thread:$0]  %s139_s24, 256, %s259_s4, [#allocation3], %s205_s2, %s205_s2, %s206_s25  }
 0x208   :  { %200 = dma.done.wait [#allocation3], 256  }
 0x209   :  { %201 = vsyncadd [#allocation3], 4294967040 }
 0x20a   :  { %148 = vsyncpa [#allocation3], 1 }

</bundles_post_ra>
